<compile_context>
chip_gen: v5e
topology: v5e:2x2
jax: 0.10.0
libtpu: 0.0.40
codegen_flags: <defaults>
</compile_context>

<pallas_src>
import functools

import jax
import jax.numpy as jnp
from jax import lax
from jax.experimental import pallas as pl
from jax.experimental.pallas import tpu as pltpu

# ----------------------------- config (cfg.*) -------------------------------
LEAKY_SLOPE = 0.2          # cfg.leaky_slope
ATTN_LEAKY_SLOPE = 0.2     # AttentionEdgeModel uses LeakyReLU(0.2) explicitly
VAR_LEAKY_SLOPE = 0.01     # F.leaky_relu default slope
NUM_BLOCKS = 2             # cfg.num_blocks
NUM_CLASSES = 5            # cfg.num_classes
TOTAL_EXPOSURES = 6        # cfg.total_exposures
EDGE_OUT_PAD = 128         # lane-dense decoder output width (sliced outside)
RMS_EPS = 1.1920929e-07    # torch RMSNorm default eps for float32
NEG_INF = -1e30
NUM_VEC_ROWS = 16          # packed per-block bias/norm rows (15 used)
VMEM_LIMIT = 32 * 1024 * 1024

# ----------------------------- in-kernel helpers ----------------------------
def _f32dot(a, b):
    return jnp.dot(a, b, preferred_element_type=jnp.float32)


def _bf16dot(mask_bf16, x):
    """bf16 one-hot gather matmul on the MXU, f32 accumulation."""
    return jnp.dot(mask_bf16, x.astype(jnp.bfloat16),
                   preferred_element_type=jnp.float32)


def _segsum(onehot_f32, data_f32):
    """Trans-A segment sum: contract edge dim 0 of (E,N) one-hot with (E,D) data."""
    return lax.dot_general(onehot_f32, data_f32,
                           (((0,), (0,)), ((), ())),
                           preferred_element_type=jnp.float32)


def _leaky(x, slope):
    return jnp.where(x >= 0, x, slope * x)


def _rmsnorm(x, w, eps=RMS_EPS):
    ms = jnp.mean(x * x, axis=-1, keepdims=True)
    return x * lax.rsqrt(ms + eps) * w


def _vmem_specs(n):
    return [pl.BlockSpec(memory_space=pltpu.MemorySpace.VMEM) for _ in range(n)]


# ----------------------------- encoder kernel (fused) -----------------------
def _encoder_kernel(xs_raw_ref, xt_raw_ref, labels_ref, emb_ref, ea_raw_ref,
                    sw1_ref, sb1_ref, sw2_ref, sb2_ref,
                    tw1x_ref, tw1c_ref, tb1_ref, tw2_ref, tb2_ref,
                    ew1_ref, eb1_ref, ew2_ref, eb2_ref,
                    xs_out_ref, xt_out_ref, ea_out_ref, *, slope):
    # source encoder (2-layer MLP)
    h = _leaky(_f32dot(xs_raw_ref[...], sw1_ref[...]) + sb1_ref[...], slope)
    xs_out_ref[...] = _f32dot(h, sw2_ref[...]) + sb2_ref[...]

    # class-embedding gather in-kernel: one-hot(labels) @ embedding_table
    Nt = xt_raw_ref.shape[0]
    ncls = emb_ref.shape[0]
    lab = labels_ref[...]                                            # (Nt, 1) int32
    lab_oh = jnp.where(
        lax.broadcasted_iota(jnp.int32, (Nt, ncls), 1) == lab, 1.0, 0.0)
    ce = _f32dot(lab_oh, emb_ref[...])                               # (Nt, Dt)

    # target encoder: concat([x_t_raw, ce]) @ W1  ==  x_t_raw @ W1x + ce @ W1c
    h = _leaky(_f32dot(xt_raw_ref[...], tw1x_ref[...])
               + _f32dot(ce, tw1c_ref[...]) + tb1_ref[...], slope)
    xt_out_ref[...] = _f32dot(h, tw2_ref[...]) + tb2_ref[...]

    # edge encoder
    h = _leaky(_f32dot(ea_raw_ref[...], ew1_ref[...]) + eb1_ref[...], slope)
    ea_out_ref[...] = _f32dot(h, ew2_ref[...]) + eb2_ref[...]


def run_encoders(params, x_s_raw, x_t_raw, labels, edge_attr_raw, Ds, Dt, De):
    Ns, Nt, E = x_s_raw.shape[0], x_t_raw.shape[0], edge_attr_raw.shape[0]
    args = (x_s_raw, x_t_raw, labels, params['class_embedding'], edge_attr_raw,
            *params['src_encoder'], *params['tgt_encoder'], *params['edge_encoder'])
    return pl.pallas_call(
        functools.partial(_encoder_kernel, slope=LEAKY_SLOPE),
        out_shape=(jax.ShapeDtypeStruct((Ns, Ds), jnp.float32),
                   jax.ShapeDtypeStruct((Nt, Dt), jnp.float32),
                   jax.ShapeDtypeStruct((E, De), jnp.float32)),
        in_specs=_vmem_specs(len(args)),
        out_specs=tuple(_vmem_specs(3)),
        compiler_params=pltpu.CompilerParams(vmem_limit_bytes=VMEM_LIMIT),
    )(*args)


# ----------------------------- fused all-blocks kernel -----------------------
# Packed bias/norm row order (must match init_params packing):
#  0: e_wa(De)   1: e_wn(De)
#  2: s_mb1(Dm_s) 3: s_mb2(Dm_s) 4: s_ub1(Us) 5: s_ub2(Ds) 6: s_wn(Ds)
#  7: t_mb1(Dm_t) 8: t_mb2(Dm_t) 9: t_ub1(Ut) 10: t_ub2(Dt) 11: t_wn(Dt)
# 12: g_b1(Ug)  13: g_b2(Dg)  14: g_wn(Dg)
def _blocks_kernel(src_ref, tgt_ref, inv_ref, xs_in, xt_in, ea_in, xu_in,
                   e_w_ref, s_mw1_ref, s_mw2_ref, s_uw1_ref, s_uw2_ref,
                   t_mw1_ref, t_mw2_ref, t_uw1_ref, t_uw2_ref,
                   g_w1_ref, g_w2_ref, vec_ref,
                   xs_out, xt_out, ea_out, xu_out, *, slope):
    # ---- state init on the first block; activations stay resident in VMEM ----
    @pl.when(pl.program_id(0) == 0)
    def _():
        xs_out[...] = xs_in[...]
        xt_out[...] = xt_in[...]
        ea_out[...] = ea_in[...]
        xu_out[...] = xu_in[...]

    x_s = xs_out[...]
    x_t = xt_out[...]
    ea = ea_out[...]
    x_u = xu_out[...]
    inv = inv_ref[...]                                               # (Ns,1) 1/deg or 0

    Ns, Ds = x_s.shape
    Nt, Dt = x_t.shape
    E, De = ea.shape
    Dg = x_u.shape[1]
    Dm_s = s_mw2_ref.shape[-1]
    Us = s_uw1_ref.shape[-1]
    Dm_t = t_mw2_ref.shape[-1]
    Ut = t_uw1_ref.shape[-1]
    Ug = g_w1_ref.shape[-1]

    # ---- current block's weights (streamed per grid step) ----
    e_w = e_w_ref[0]                                                 # (Ds+Dt+De, De)
    s_mw1 = s_mw1_ref[0]
    s_mw2 = s_mw2_ref[0]
    s_uw1 = s_uw1_ref[0]
    s_uw2 = s_uw2_ref[0]
    t_mw1 = t_mw1_ref[0]
    t_mw2 = t_mw2_ref[0]
    t_uw1 = t_uw1_ref[0]
    t_uw2 = t_uw2_ref[0]
    g_w1 = g_w1_ref[0]
    g_w2 = g_w2_ref[0]
    vec = vec_ref[0]                                                 # (16, MAXW)

    def row(i, w):
        return vec[i:i + 1, :w]

    e_wa, e_wn = row(0, De), row(1, De)
    s_mb1, s_mb2 = row(2, Dm_s), row(3, Dm_s)
    s_ub1, s_ub2, s_wn = row(4, Us), row(5, Ds), row(6, Ds)
    t_mb1, t_mb2 = row(7, Dm_t), row(8, Dm_t)
    t_ub1, t_ub2, t_wn = row(9, Ut), row(10, Dt), row(11, Dt)
    g_b1, g_b2, g_wn = row(12, Ug), row(13, Dg), row(14, Dg)

    # ---- one-hot masks built in-kernel from int32 index vectors ----
    src_col = src_ref[...]                                           # (E,1) int32
    tgt_col = tgt_ref[...]                                           # (E,1) int32
    src_mask = lax.broadcasted_iota(jnp.int32, (E, Ns), 1) == src_col    # (E,Ns) bool
    tgt_mask = lax.broadcasted_iota(jnp.int32, (E, Nt), 1) == tgt_col    # (E,Nt) bool
    src_oh_f32 = jnp.where(src_mask, 1.0, 0.0)                       # f32 (moment path)
    tgt_oh_f32 = jnp.where(tgt_mask, 1.0, 0.0)
    src_oh_bf = src_oh_f32.astype(jnp.bfloat16)                      # bf16 (gathers)
    tgt_oh_bf = tgt_oh_f32.astype(jnp.bfloat16)

    # ------------------ AttentionEdgeModel (+ residual) ------------------
    # reassociated: project node features first, then one-hot gather on MXU
    hs_nodes = _f32dot(x_s, e_w[:Ds])                                # (Ns, De)
    ht_nodes = _f32dot(x_t, e_w[Ds:Ds + Dt])                         # (Nt, De)
    h = (_bf16dot(src_oh_bf, hs_nodes) + _bf16dot(tgt_oh_bf, ht_nodes)
         + _f32dot(ea, e_w[Ds + Dt:]))                               # (E, De)
    e_logit = _leaky(jnp.sum(h * e_wa, axis=-1, keepdims=True), ATTN_LEAKY_SLOPE)

    # segment softmax over src; exp only over the (E,1) logits
    masked = jnp.where(src_mask, e_logit, NEG_INF)                   # (E, Ns)
    seg_max = jnp.max(masked, axis=0, keepdims=True)                 # (1, Ns)
    max_e = jnp.sum(jnp.where(src_mask, seg_max, 0.0), axis=1, keepdims=True)   # (E,1)
    exp_e = jnp.exp(e_logit - max_e)                                 # (E,1) - E exps only
    seg_sum = jnp.sum(jnp.where(src_mask, exp_e, 0.0), axis=0, keepdims=True)   # (1,Ns)
    inv_sum = jnp.where(seg_sum > 0.0, 1.0 / seg_sum, 0.0)           # exact reciprocal
    inv_e = jnp.sum(jnp.where(src_mask, inv_sum, 0.0), axis=1, keepdims=True)   # (E,1)
    alpha = exp_e * inv_e
    ea_new = ea + _rmsnorm(h * alpha, e_wn)                          # fused residual
    ea_out[...] = ea_new

    # ------------------ SourceModel (+ residual) ------------------
    # msg = MLP(concat([x_t[tgt], ea_new])); reassociated: project x_t then gather
    xt_proj = _f32dot(x_t, s_mw1[:Dt])                               # (Nt, Dm_s)
    msg_pre = _bf16dot(tgt_oh_bf, xt_proj) + _f32dot(ea_new, s_mw1[Dt:]) + s_mb1
    msg = _f32dot(_leaky(msg_pre, slope), s_mw2) + s_mb2             # (E, Dm_s)

    mean = _segsum(src_oh_f32, msg) * inv                            # scatter_mean
    mean2 = _segsum(src_oh_f32, msg * msg) * inv
    var = jnp.maximum(_leaky(mean2 - mean * mean, VAR_LEAKY_SLOPE), 0.0)  # NaN guard
    inv_std = lax.rsqrt(var + 1e-6)                                  # single EUP rsqrt
    std = (var + 1e-6) * inv_std                                     # sqrt via v*rsqrt(v)
    mean_e = _f32dot(src_oh_f32, mean)                               # mean[src] (E, Dm_s)
    d = msg - mean_e
    d3 = d * d * d
    i2 = inv_std * inv_std
    skew = (_segsum(src_oh_f32, d3) * inv) * (i2 * inv_std)
    kurt = (_segsum(src_oh_f32, d3 * d) * inv) * (i2 * i2)

    # one wide-K update matmul instead of 6 split small-K matmuls
    upd_in = jnp.concatenate(
        [x_s, mean, std, skew, kurt, jnp.broadcast_to(x_u, (Ns, Dg))], axis=-1)
    upd = _f32dot(_leaky(_f32dot(upd_in, s_uw1) + s_ub1, slope), s_uw2) + s_ub2
    x_s_new = x_s + _rmsnorm(upd, s_wn)                              # fused residual
    xs_out[...] = x_s_new

    # ------------------ TargetModel (+ residual) ------------------
    xs_proj = _f32dot(x_s_new, t_mw1[:Ds])                           # (Ns, Dm_t)
    msg_pre = _bf16dot(src_oh_bf, xs_proj) + _f32dot(ea_new, t_mw1[Ds:]) + t_mb1
    msg_t = _f32dot(_leaky(msg_pre, slope), t_mw2) + t_mb2           # (E, Dm_t)
    agg = _segsum(tgt_oh_f32, msg_t)                                 # scatter_add (Nt,Dm_t)
    upd_in = jnp.concatenate([x_t, agg, jnp.broadcast_to(x_u, (Nt, Dg))], axis=-1)
    upd = _f32dot(_leaky(_f32dot(upd_in, t_uw1) + t_ub1, slope), t_uw2) + t_ub2
    x_t_new = x_t + _rmsnorm(upd, t_wn)                              # fused residual
    xt_out[...] = x_t_new

    # ------------------ GlobalModel (+ residual) ------------------
    src_mean = jnp.mean(x_s_new, axis=0, keepdims=True)              # (1, Ds)
    tgt_mean = jnp.mean(x_t_new, axis=0, keepdims=True)              # (1, Dt)
    upd_in = jnp.concatenate([x_u, src_mean, tgt_mean], axis=-1)     # (1, Ug)
    upd = _f32dot(_leaky(_f32dot(upd_in, g_w1) + g_b1, slope), g_w2) + g_b2
    xu_out[...] = x_u + _rmsnorm(upd, g_wn)                          # fused residual


_WEIGHT_ORDER = ['e_w', 's_mw1', 's_mw2', 's_uw1', 's_uw2',
                 't_mw1', 't_mw2', 't_uw1', 't_uw2', 'g_w1', 'g_w2', 'vec']


def run_blocks(blocks, src_col, tgt_col, inv_cnt, x_s, x_t, edge_attr, x_u):
    B = blocks['e_w'].shape[0]
    Ns, Ds = x_s.shape
    Nt, Dt = x_t.shape
    E, De = edge_attr.shape
    Dg = x_u.shape[1]

    def full2(shape):
        return pl.BlockSpec(shape, lambda b: (0, 0))

    def stacked(arr):
        return pl.BlockSpec((1,) + arr.shape[1:], lambda b: (b, 0, 0))

    weights = [blocks[k] for k in _WEIGHT_ORDER]
    in_specs = ([full2((E, 1)), full2((E, 1)), full2((Ns, 1)),
                 full2((Ns, Ds)), full2((Nt, Dt)), full2((E, De)), full2((1, Dg))]
                + [stacked(w) for w in weights])
    out_specs = (full2((Ns, Ds)), full2((Nt, Dt)), full2((E, De)), full2((1, Dg)))

    return pl.pallas_call(
        functools.partial(_blocks_kernel, slope=LEAKY_SLOPE),
        grid=(B,),
        out_shape=(jax.ShapeDtypeStruct((Ns, Ds), jnp.float32),
                   jax.ShapeDtypeStruct((Nt, Dt), jnp.float32),
                   jax.ShapeDtypeStruct((E, De), jnp.float32),
                   jax.ShapeDtypeStruct((1, Dg), jnp.float32)),
        in_specs=in_specs,
        out_specs=out_specs,
        compiler_params=pltpu.CompilerParams(
            dimension_semantics=("arbitrary",),
            vmem_limit_bytes=VMEM_LIMIT),
    )(src_col, tgt_col, inv_cnt, x_s, x_t, edge_attr, x_u, *weights)


# ----------------------------- finalize kernel (residuals + edge decoder) ---
def _finalize_kernel(xs_ref, xs0_ref, xt_ref, xt0_ref, ea_ref, ea0_ref, xu_ref, xu0_ref,
                     dw1_ref, db1_ref, dw2_ref, db2_ref,
                     xs_out, xt_out, ed_out, xu_out, *, slope):
    xs_out[...] = xs_ref[...] + xs0_ref[...]
    xt_out[...] = xt_ref[...] + xt0_ref[...]
    xu_out[...] = xu_ref[...] + xu0_ref[...]
    ea = ea_ref[...] + ea0_ref[...]
    h = _leaky(_f32dot(ea, dw1_ref[...]) + db1_ref[...], slope)
    ed_out[...] = _f32dot(h, dw2_ref[...]) + db2_ref[...]            # (E,128) lane-dense


def run_finalize(params, x_s, x_s0, x_t, x_t0, ea, ea0, x_u, xu0):
    Ns, Ds = x_s.shape
    Nt, Dt = x_t.shape
    E = ea.shape[0]
    Dg = x_u.shape[1]
    args = (x_s, x_s0, x_t, x_t0, ea, ea0, x_u, xu0, *params['edge_decoder'])
    return pl.pallas_call(
        functools.partial(_finalize_kernel, slope=LEAKY_SLOPE),
        out_shape=(jax.ShapeDtypeStruct((Ns, Ds), jnp.float32),
                   jax.ShapeDtypeStruct((Nt, Dt), jnp.float32),
                   jax.ShapeDtypeStruct((E, EDGE_OUT_PAD), jnp.float32),
                   jax.ShapeDtypeStruct((1, Dg), jnp.float32)),
        in_specs=_vmem_specs(len(args)),
        out_specs=tuple(_vmem_specs(4)),
        compiler_params=pltpu.CompilerParams(vmem_limit_bytes=VMEM_LIMIT),
    )(*args)


# ----------------------------- parameter init -------------------------------
def _init_linear(key, din, dout, bias=True):
    k1, k2 = jax.random.split(key)
    bound = 1.0 / (din ** 0.5)
    w = jax.random.uniform(k1, (din, dout), jnp.float32, -bound, bound)
    if bias:
        b = jax.random.uniform(k2, (1, dout), jnp.float32, -bound, bound)
        return w, b
    return w


def _init_mlp2(key, din, dhid, dout):
    k1, k2 = jax.random.split(key)
    w1, b1 = _init_linear(k1, din, dhid)
    w2, b2 = _init_linear(k2, dhid, dout)
    return (w1, b1, w2, b2)


def init_params(key, src_dim, tgt_dim, edge_dim, Ds, Dt, De, Dg):
    keys = jax.random.split(key, 8 + NUM_BLOCKS)

    # encoders
    src_enc = _init_mlp2(keys[0], src_dim, Ds, Ds)
    k1a, k1b = jax.random.split(keys[1])
    tw1, tb1 = _init_linear(k1a, tgt_dim + Dt, Dt)
    tw2, tb2 = _init_linear(k1b, Dt, Dt)
    tgt_enc = (tw1[:tgt_dim], tw1[tgt_dim:], tb1, tw2, tb2)          # pre-split [x, ce]
    edge_enc = _init_mlp2(keys[2], edge_dim, De, De)

    # edge decoder, padded to a lane-dense (De, 128) output
    dw1, db1, dw2, db2 = _init_mlp2(keys[3], De, De, TOTAL_EXPOSURES)
    dw2p = jnp.zeros((De, EDGE_OUT_PAD), jnp.float32).at[:, :TOTAL_EXPOSURES].set(dw2)
    db2p = jnp.zeros((1, EDGE_OUT_PAD), jnp.float32).at[:, :TOTAL_EXPOSURES].set(db2)
    edge_dec = (dw1, db1, dw2p, db2p)

    class_emb = jax.random.normal(keys[4], (NUM_CLASSES, Dt), jnp.float32)

    Dm_s = Dt + De
    Us = Ds + 4 * Dm_s + Dg
    Dm_t = Ds + De
    Ut = Dt + Dm_t + Dg
    Ug = Dg + Ds + Dt
    vec_w = max(De, Dm_s, Us, Ds, Dm_t, Ut, Dt, Ug, Dg)
    vec_w = ((vec_w + 127) // 128) * 128

    per_block = []
    for b in range(NUM_BLOCKS):
        kb = jax.random.split(keys[8 + b], 16)
        # edge model
        ws = _init_linear(kb[0], Ds, De, bias=False)
        wt = _init_linear(kb[1], Dt, De, bias=False)
        we = _init_linear(kb[2], De, De, bias=False)
        wa = _init_linear(kb[3], De, 1, bias=False).reshape(1, De)
        e_wn = jnp.ones((1, De), jnp.float32)
        # source model
        s_mw1, s_mb1 = _init_linear(kb[4], Dm_s, Dm_s)
        s_mw2, s_mb2 = _init_linear(kb[5], Dm_s, Dm_s)
        s_uw1, s_ub1 = _init_linear(kb[6], Us, Us)
        s_uw2, s_ub2 = _init_linear(kb[7], Us, Ds)
        s_wn = jnp.ones((1, Ds), jnp.float32)
        # target model
        t_mw1, t_mb1 = _init_linear(kb[8], Dm_t, Dm_t)
        t_mw2, t_mb2 = _init_linear(kb[9], Dm_t, Dm_t)
        t_uw1, t_ub1 = _init_linear(kb[10], Ut, Ut)
        t_uw2, t_ub2 = _init_linear(kb[11], Ut, Dt)
        t_wn = jnp.ones((1, Dt), jnp.float32)
        # global model
        g_w1, g_b1 = _init_linear(kb[12], Ug, Ug)
        g_w2, g_b2 = _init_linear(kb[13], Ug, Dg)
        g_wn = jnp.ones((1, Dg), jnp.float32)

        # pack the 15 (1, D) vectors into one (16, vec_w) array (order = kernel unpack)
        vec_rows = [wa, e_wn, s_mb1, s_mb2, s_ub1, s_ub2, s_wn,
                    t_mb1, t_mb2, t_ub1, t_ub2, t_wn, g_b1, g_b2, g_wn]
        vec = jnp.zeros((NUM_VEC_ROWS, vec_w), jnp.float32)
        for i, r in enumerate(vec_rows):
            vec = vec.at[i, :r.shape[-1]].set(r.reshape(-1))

        per_block.append(dict(
            e_w=jnp.concatenate([ws, wt, we], axis=0),               # (Ds+Dt+De, De)
            s_mw1=s_mw1, s_mw2=s_mw2, s_uw1=s_uw1, s_uw2=s_uw2,
            t_mw1=t_mw1, t_mw2=t_mw2, t_uw1=t_uw1, t_uw2=t_uw2,
            g_w1=g_w1, g_w2=g_w2, vec=vec))

    blocks = {k: jnp.stack([pb[k] for pb in per_block]) for k in _WEIGHT_ORDER}

    return {'src_encoder': src_enc, 'tgt_encoder': tgt_enc, 'edge_encoder': edge_enc,
            'edge_decoder': edge_dec, 'class_embedding': class_emb, 'blocks': blocks}


# ----------------------------- full forward ---------------------------------
def graph_network_forward(params, x_s_raw, x_t_raw, edge_index, edge_attr_raw, x_u,
                          Ds, Dt, De, Dg):
    src, tgt = edge_index[0], edge_index[1]
    Ns, Nt, E = x_s_raw.shape[0], x_t_raw.shape[0], edge_attr_raw.shape[0]

    labels = x_t_raw[:, :1].astype(jnp.int32)                        # (Nt, 1)
    src_col = src.reshape(E, 1).astype(jnp.int32)
    tgt_col = tgt.reshape(E, 1).astype(jnp.int32)

    # loop-invariant per-source-node 1/degree, hoisted out of the block kernel
    counts = jnp.zeros((Ns,), jnp.float32).at[src].add(1.0)
    inv_cnt = jnp.where(counts > 0, 1.0 / jnp.maximum(counts, 1.0), 0.0).reshape(Ns, 1)

    # fused encoders (src / tgt-with-class-embedding / edge) — one pallas_call
    x_s, x_t, edge_attr = run_encoders(params, x_s_raw, x_t_raw, labels,
                                       edge_attr_raw, Ds, Dt, De)
    x_s0, x_t0, ea0, xu0 = x_s, x_t, edge_attr, x_u

    # ALL MetaLayer blocks in one pallas_call (grid over blocks, resident activations)
    x_s, x_t, edge_attr, x_u = run_blocks(params['blocks'], src_col, tgt_col, inv_cnt,
                                          x_s, x_t, edge_attr, x_u)

    # fused final residuals + edge decoder (lane-dense padded output, sliced here)
    x_s, x_t, edge_out_pad, x_u = run_finalize(params, x_s, x_s0, x_t, x_t0,
                                               edge_attr, ea0, x_u, xu0)
    edge_out = edge_out_pad[:, :TOTAL_EXPOSURES]
    return x_s, x_t, edge_index, edge_out, x_u


# ----------------------------- main ------------------------------------------
if __name__ == "__main__":
    # small shapes
    Ns, Nt, E = 8, 8, 16
    src_dim, tgt_dim, edge_dim = 4, 4, 4
    Ds, Dt, De, Dg = 32, 32, 32, 16

    key = jax.random.PRNGKey(0)
    kp, kd = jax.random.split(key)
    params = init_params(kp, src_dim, tgt_dim, edge_dim, Ds, Dt, De, Dg)

    k1, k2, k3, k4, k5, k6 = jax.random.split(kd, 6)
    x_s_raw = jax.random.normal(k1, (Ns, src_dim), jnp.float32)
    labels = jax.random.randint(k2, (Nt, 1), 0, NUM_CLASSES).astype(jnp.float32)
    x_t_rest = jax.random.normal(k3, (Nt, tgt_dim - 1), jnp.float32)
    x_t_raw = jnp.concatenate([labels, x_t_rest], axis=1)
    edge_index = jnp.stack([
        jax.random.randint(k4, (E,), 0, Ns),
        jax.random.randint(k5, (E,), 0, Nt),
    ], axis=0).astype(jnp.int32)
    edge_attr_raw = jax.random.normal(k6, (E, edge_dim), jnp.float32)
    x_u = jax.random.normal(jax.random.PRNGKey(42), (1, Dg), jnp.float32)

    fwd = jax.jit(functools.partial(graph_network_forward, Ds=Ds, Dt=Dt, De=De, Dg=Dg))
    x_s_out, x_t_out, ei_out, edge_out, x_u_out = fwd(
        params, x_s_raw, x_t_raw, edge_index, edge_attr_raw, x_u)
    jax.block_until_ready((x_s_out, x_t_out, edge_out, x_u_out))

    assert x_s_out.shape == (Ns, Ds)
    assert x_t_out.shape == (Nt, Dt)
    assert edge_out.shape == (E, TOTAL_EXPOSURES)
    assert x_u_out.shape == (1, Dg)
    assert bool(jnp.all(jnp.isfinite(x_s_out)))
    assert bool(jnp.all(jnp.isfinite(edge_out)))
    print("KERNEL_OK")
</pallas_src>

<mosaic_0001>
module attributes {stable_mosaic.version = 11 : i64} {
  func.func @_encoder_kernel(%arg0: memref<8x4xf32, #tpu.memory_space<vmem>>, %arg1: memref<8x4xf32, #tpu.memory_space<vmem>>, %arg2: memref<8x1xi32, #tpu.memory_space<vmem>>, %arg3: memref<5x32xf32, #tpu.memory_space<vmem>>, %arg4: memref<16x4xf32, #tpu.memory_space<vmem>>, %arg5: memref<4x32xf32, #tpu.memory_space<vmem>>, %arg6: memref<1x32xf32, #tpu.memory_space<vmem>>, %arg7: memref<32x32xf32, #tpu.memory_space<vmem>>, %arg8: memref<1x32xf32, #tpu.memory_space<vmem>>, %arg9: memref<4x32xf32, #tpu.memory_space<vmem>>, %arg10: memref<32x32xf32, #tpu.memory_space<vmem>>, %arg11: memref<1x32xf32, #tpu.memory_space<vmem>>, %arg12: memref<32x32xf32, #tpu.memory_space<vmem>>, %arg13: memref<1x32xf32, #tpu.memory_space<vmem>>, %arg14: memref<4x32xf32, #tpu.memory_space<vmem>>, %arg15: memref<1x32xf32, #tpu.memory_space<vmem>>, %arg16: memref<32x32xf32, #tpu.memory_space<vmem>>, %arg17: memref<1x32xf32, #tpu.memory_space<vmem>>, %arg18: memref<8x32xf32, #tpu.memory_space<vmem>>, %arg19: memref<8x32xf32, #tpu.memory_space<vmem>>, %arg20: memref<16x32xf32, #tpu.memory_space<vmem>>) attributes {dimension_semantics = [], scalar_prefetch = 0 : i64, scratch_operands = 0 : i64, tpu.core_type = #tpu.core_type<tc>} {
    %c0 = arith.constant 0 : index
    %c0_0 = arith.constant 0 : index
    %0 = vector.load %arg0[%c0, %c0_0] : memref<8x4xf32, #tpu.memory_space<vmem>>, vector<8x4xf32>
    %c0_1 = arith.constant 0 : index
    %c0_2 = arith.constant 0 : index
    %1 = vector.load %arg5[%c0_1, %c0_2] : memref<4x32xf32, #tpu.memory_space<vmem>>, vector<4x32xf32>
    %cst = arith.constant dense<0.000000e+00> : vector<8x32xf32>
    %2 = tpu.matmul %0, %1, %cst {dimension_numbers = #tpu.dot_dimension_numbers<[1], [0], [0], [1], [0, 0, 1, 1], [], []>} : vector<8x4xf32>, vector<4x32xf32>, vector<8x32xf32> -> vector<8x32xf32>
    %c0_3 = arith.constant 0 : index
    %c0_4 = arith.constant 0 : index
    %3 = vector.load %arg6[%c0_3, %c0_4] : memref<1x32xf32, #tpu.memory_space<vmem>>, vector<1x32xf32>
    %4 = vector.broadcast %3 : vector<1x32xf32> to vector<8x32xf32>
    %5 = arith.addf %2, %4 : vector<8x32xf32>
    %cst_5 = arith.constant 0.000000e+00 : f32
    %6 = vector.broadcast %cst_5 : f32 to vector<8x32xf32>
    %7 = arith.cmpf oge, %5, %6 : vector<8x32xf32>
    %cst_6 = arith.constant 2.000000e-01 : f32
    %8 = vector.broadcast %cst_6 : f32 to vector<8x32xf32>
    %9 = arith.mulf %8, %5 : vector<8x32xf32>
    %10 = arith.select %7, %5, %9 : vector<8x32xi1>, vector<8x32xf32>
    %c0_7 = arith.constant 0 : index
    %c0_8 = arith.constant 0 : index
    %11 = vector.load %arg7[%c0_7, %c0_8] : memref<32x32xf32, #tpu.memory_space<vmem>>, vector<32x32xf32>
    %cst_9 = arith.constant dense<0.000000e+00> : vector<8x32xf32>
    %12 = tpu.matmul %10, %11, %cst_9 {dimension_numbers = #tpu.dot_dimension_numbers<[1], [0], [0], [1], [0, 0, 1, 1], [], []>} : vector<8x32xf32>, vector<32x32xf32>, vector<8x32xf32> -> vector<8x32xf32>
    %c0_10 = arith.constant 0 : index
    %c0_11 = arith.constant 0 : index
    %13 = vector.load %arg8[%c0_10, %c0_11] : memref<1x32xf32, #tpu.memory_space<vmem>>, vector<1x32xf32>
    %14 = vector.broadcast %13 : vector<1x32xf32> to vector<8x32xf32>
    %15 = arith.addf %12, %14 : vector<8x32xf32>
    %c0_12 = arith.constant 0 : index
    %c0_13 = arith.constant 0 : index
    %16 = vector.load %arg18[%c0_12, %c0_13] : memref<8x32xf32, #tpu.memory_space<vmem>>, vector<8x32xf32>
    tpu.vector_store %arg18[%c0_12, %c0_13], %15 {strides = array<i32>} : memref<8x32xf32, #tpu.memory_space<vmem>>, vector<8x32xf32>,
    %c0_14 = arith.constant 0 : index
    %c0_15 = arith.constant 0 : index
    %17 = vector.load %arg2[%c0_14, %c0_15] : memref<8x1xi32, #tpu.memory_space<vmem>>, vector<8x1xi32>
    %18 = tpu.iota {dimensions = array<i32: 1>} : vector<8x5xi32>
    %19 = vector.broadcast %17 : vector<8x1xi32> to vector<8x5xi32>
    %20 = arith.cmpi eq, %18, %19 : vector<8x5xi32>
    %cst_16 = arith.constant 1.000000e+00 : f32
    %cst_17 = arith.constant 0.000000e+00 : f32
    %21 = vector.broadcast %cst_16 : f32 to vector<8x5xf32>
    %22 = vector.broadcast %cst_17 : f32 to vector<8x5xf32>
    %23 = arith.select %20, %21, %22 : vector<8x5xi1>, vector<8x5xf32>
    %c0_18 = arith.constant 0 : index
    %c0_19 = arith.constant 0 : index
    %24 = vector.load %arg3[%c0_18, %c0_19] : memref<5x32xf32, #tpu.memory_space<vmem>>, vector<5x32xf32>
    %cst_20 = arith.constant dense<0.000000e+00> : vector<8x32xf32>
    %25 = tpu.matmul %23, %24, %cst_20 {dimension_numbers = #tpu.dot_dimension_numbers<[1], [0], [0], [1], [0, 0, 1, 1], [], []>} : vector<8x5xf32>, vector<5x32xf32>, vector<8x32xf32> -> vector<8x32xf32>
    %c0_21 = arith.constant 0 : index
    %c0_22 = arith.constant 0 : index
    %26 = vector.load %arg1[%c0_21, %c0_22] : memref<8x4xf32, #tpu.memory_space<vmem>>, vector<8x4xf32>
    %c0_23 = arith.constant 0 : index
    %c0_24 = arith.constant 0 : index
    %27 = vector.load %arg9[%c0_23, %c0_24] : memref<4x32xf32, #tpu.memory_space<vmem>>, vector<4x32xf32>
    %cst_25 = arith.constant dense<0.000000e+00> : vector<8x32xf32>
    %28 = tpu.matmul %26, %27, %cst_25 {dimension_numbers = #tpu.dot_dimension_numbers<[1], [0], [0], [1], [0, 0, 1, 1], [], []>} : vector<8x4xf32>, vector<4x32xf32>, vector<8x32xf32> -> vector<8x32xf32>
    %c0_26 = arith.constant 0 : index
    %c0_27 = arith.constant 0 : index
    %29 = vector.load %arg10[%c0_26, %c0_27] : memref<32x32xf32, #tpu.memory_space<vmem>>, vector<32x32xf32>
    %cst_28 = arith.constant dense<0.000000e+00> : vector<8x32xf32>
    %30 = tpu.matmul %25, %29, %cst_28 {dimension_numbers = #tpu.dot_dimension_numbers<[1], [0], [0], [1], [0, 0, 1, 1], [], []>} : vector<8x32xf32>, vector<32x32xf32>, vector<8x32xf32> -> vector<8x32xf32>
    %31 = arith.addf %28, %30 : vector<8x32xf32>
    %c0_29 = arith.constant 0 : index
    %c0_30 = arith.constant 0 : index
    %32 = vector.load %arg11[%c0_29, %c0_30] : memref<1x32xf32, #tpu.memory_space<vmem>>, vector<1x32xf32>
    %33 = vector.broadcast %32 : vector<1x32xf32> to vector<8x32xf32>
    %34 = arith.addf %31, %33 : vector<8x32xf32>
    %cst_31 = arith.constant 0.000000e+00 : f32
    %35 = vector.broadcast %cst_31 : f32 to vector<8x32xf32>
    %36 = arith.cmpf oge, %34, %35 : vector<8x32xf32>
    %cst_32 = arith.constant 2.000000e-01 : f32
    %37 = vector.broadcast %cst_32 : f32 to vector<8x32xf32>
    %38 = arith.mulf %37, %34 : vector<8x32xf32>
    %39 = arith.select %36, %34, %38 : vector<8x32xi1>, vector<8x32xf32>
    %c0_33 = arith.constant 0 : index
    %c0_34 = arith.constant 0 : index
    %40 = vector.load %arg12[%c0_33, %c0_34] : memref<32x32xf32, #tpu.memory_space<vmem>>, vector<32x32xf32>
    %cst_35 = arith.constant dense<0.000000e+00> : vector<8x32xf32>
    %41 = tpu.matmul %39, %40, %cst_35 {dimension_numbers = #tpu.dot_dimension_numbers<[1], [0], [0], [1], [0, 0, 1, 1], [], []>} : vector<8x32xf32>, vector<32x32xf32>, vector<8x32xf32> -> vector<8x32xf32>
    %c0_36 = arith.constant 0 : index
    %c0_37 = arith.constant 0 : index
    %42 = vector.load %arg13[%c0_36, %c0_37] : memref<1x32xf32, #tpu.memory_space<vmem>>, vector<1x32xf32>
    %43 = vector.broadcast %42 : vector<1x32xf32> to vector<8x32xf32>
    %44 = arith.addf %41, %43 : vector<8x32xf32>
    %c0_38 = arith.constant 0 : index
    %c0_39 = arith.constant 0 : index
    %45 = vector.load %arg19[%c0_38, %c0_39] : memref<8x32xf32, #tpu.memory_space<vmem>>, vector<8x32xf32>
    tpu.vector_store %arg19[%c0_38, %c0_39], %44 {strides = array<i32>} : memref<8x32xf32, #tpu.memory_space<vmem>>, vector<8x32xf32>,
    %c0_40 = arith.constant 0 : index
    %c0_41 = arith.constant 0 : index
    %46 = vector.load %arg4[%c0_40, %c0_41] : memref<16x4xf32, #tpu.memory_space<vmem>>, vector<16x4xf32>
    %c0_42 = arith.constant 0 : index
    %c0_43 = arith.constant 0 : index
    %47 = vector.load %arg14[%c0_42, %c0_43] : memref<4x32xf32, #tpu.memory_space<vmem>>, vector<4x32xf32>
    %cst_44 = arith.constant dense<0.000000e+00> : vector<16x32xf32>
    %48 = tpu.matmul %46, %47, %cst_44 {dimension_numbers = #tpu.dot_dimension_numbers<[1], [0], [0], [1], [0, 0, 1, 1], [], []>} : vector<16x4xf32>, vector<4x32xf32>, vector<16x32xf32> -> vector<16x32xf32>
    %c0_45 = arith.constant 0 : index
    %c0_46 = arith.constant 0 : index
    %49 = vector.load %arg15[%c0_45, %c0_46] : memref<1x32xf32, #tpu.memory_space<vmem>>, vector<1x32xf32>
    %50 = vector.broadcast %49 : vector<1x32xf32> to vector<16x32xf32>
    %51 = arith.addf %48, %50 : vector<16x32xf32>
    %cst_47 = arith.constant 0.000000e+00 : f32
    %52 = vector.broadcast %cst_47 : f32 to vector<16x32xf32>
    %53 = arith.cmpf oge, %51, %52 : vector<16x32xf32>
    %cst_48 = arith.constant 2.000000e-01 : f32
    %54 = vector.broadcast %cst_48 : f32 to vector<16x32xf32>
    %55 = arith.mulf %54, %51 : vector<16x32xf32>
    %56 = arith.select %53, %51, %55 : vector<16x32xi1>, vector<16x32xf32>
    %c0_49 = arith.constant 0 : index
    %c0_50 = arith.constant 0 : index
    %57 = vector.load %arg16[%c0_49, %c0_50] : memref<32x32xf32, #tpu.memory_space<vmem>>, vector<32x32xf32>
    %cst_51 = arith.constant dense<0.000000e+00> : vector<16x32xf32>
    %58 = tpu.matmul %56, %57, %cst_51 {dimension_numbers = #tpu.dot_dimension_numbers<[1], [0], [0], [1], [0, 0, 1, 1], [], []>} : vector<16x32xf32>, vector<32x32xf32>, vector<16x32xf32> -> vector<16x32xf32>
    %c0_52 = arith.constant 0 : index
    %c0_53 = arith.constant 0 : index
    %59 = vector.load %arg17[%c0_52, %c0_53] : memref<1x32xf32, #tpu.memory_space<vmem>>, vector<1x32xf32>
    %60 = vector.broadcast %59 : vector<1x32xf32> to vector<16x32xf32>
    %61 = arith.addf %58, %60 : vector<16x32xf32>
    %c0_54 = arith.constant 0 : index
    %c0_55 = arith.constant 0 : index
    %62 = vector.load %arg20[%c0_54, %c0_55] : memref<16x32xf32, #tpu.memory_space<vmem>>, vector<16x32xf32>
    tpu.vector_store %arg20[%c0_54, %c0_55], %61 {strides = array<i32>} : memref<16x32xf32, #tpu.memory_space<vmem>>, vector<16x32xf32>,
    return
  }
}

module attributes {stable_mosaic.version = 11 : i64} {
  func.func @_finalize_kernel(%arg0: memref<8x32xf32, #tpu.memory_space<vmem>>, %arg1: memref<8x32xf32, #tpu.memory_space<vmem>>, %arg2: memref<8x32xf32, #tpu.memory_space<vmem>>, %arg3: memref<8x32xf32, #tpu.memory_space<vmem>>, %arg4: memref<16x32xf32, #tpu.memory_space<vmem>>, %arg5: memref<16x32xf32, #tpu.memory_space<vmem>>, %arg6: memref<1x16xf32, #tpu.memory_space<vmem>>, %arg7: memref<1x16xf32, #tpu.memory_space<vmem>>, %arg8: memref<32x32xf32, #tpu.memory_space<vmem>>, %arg9: memref<1x32xf32, #tpu.memory_space<vmem>>, %arg10: memref<32x128xf32, #tpu.memory_space<vmem>>, %arg11: memref<1x128xf32, #tpu.memory_space<vmem>>, %arg12: memref<8x32xf32, #tpu.memory_space<vmem>>, %arg13: memref<8x32xf32, #tpu.memory_space<vmem>>, %arg14: memref<16x128xf32, #tpu.memory_space<vmem>>, %arg15: memref<1x16xf32, #tpu.memory_space<vmem>>) attributes {dimension_semantics = [], scalar_prefetch = 0 : i64, scratch_operands = 0 : i64, tpu.core_type = #tpu.core_type<tc>} {
    %c0 = arith.constant 0 : index
    %c0_0 = arith.constant 0 : index
    %0 = vector.load %arg0[%c0, %c0_0] : memref<8x32xf32, #tpu.memory_space<vmem>>, vector<8x32xf32>
    %c0_1 = arith.constant 0 : index
    %c0_2 = arith.constant 0 : index
    %1 = vector.load %arg1[%c0_1, %c0_2] : memref<8x32xf32, #tpu.memory_space<vmem>>, vector<8x32xf32>
    %2 = arith.addf %0, %1 : vector<8x32xf32>
    %c0_3 = arith.constant 0 : index
    %c0_4 = arith.constant 0 : index
    %3 = vector.load %arg12[%c0_3, %c0_4] : memref<8x32xf32, #tpu.memory_space<vmem>>, vector<8x32xf32>
    tpu.vector_store %arg12[%c0_3, %c0_4], %2 {strides = array<i32>} : memref<8x32xf32, #tpu.memory_space<vmem>>, vector<8x32xf32>,
    %c0_5 = arith.constant 0 : index
    %c0_6 = arith.constant 0 : index
    %4 = vector.load %arg2[%c0_5, %c0_6] : memref<8x32xf32, #tpu.memory_space<vmem>>, vector<8x32xf32>
    %c0_7 = arith.constant 0 : index
    %c0_8 = arith.constant 0 : index
    %5 = vector.load %arg3[%c0_7, %c0_8] : memref<8x32xf32, #tpu.memory_space<vmem>>, vector<8x32xf32>
    %6 = arith.addf %4, %5 : vector<8x32xf32>
    %c0_9 = arith.constant 0 : index
    %c0_10 = arith.constant 0 : index
    %7 = vector.load %arg13[%c0_9, %c0_10] : memref<8x32xf32, #tpu.memory_space<vmem>>, vector<8x32xf32>
    tpu.vector_store %arg13[%c0_9, %c0_10], %6 {strides = array<i32>} : memref<8x32xf32, #tpu.memory_space<vmem>>, vector<8x32xf32>,
    %c0_11 = arith.constant 0 : index
    %c0_12 = arith.constant 0 : index
    %8 = vector.load %arg6[%c0_11, %c0_12] : memref<1x16xf32, #tpu.memory_space<vmem>>, vector<1x16xf32>
    %c0_13 = arith.constant 0 : index
    %c0_14 = arith.constant 0 : index
    %9 = vector.load %arg7[%c0_13, %c0_14] : memref<1x16xf32, #tpu.memory_space<vmem>>, vector<1x16xf32>
    %10 = arith.addf %8, %9 : vector<1x16xf32>
    %c0_15 = arith.constant 0 : index
    %c0_16 = arith.constant 0 : index
    %11 = vector.load %arg15[%c0_15, %c0_16] : memref<1x16xf32, #tpu.memory_space<vmem>>, vector<1x16xf32>
    tpu.vector_store %arg15[%c0_15, %c0_16], %10 {strides = array<i32>} : memref<1x16xf32, #tpu.memory_space<vmem>>, vector<1x16xf32>,
    %c0_17 = arith.constant 0 : index
    %c0_18 = arith.constant 0 : index
    %12 = vector.load %arg4[%c0_17, %c0_18] : memref<16x32xf32, #tpu.memory_space<vmem>>, vector<16x32xf32>
    %c0_19 = arith.constant 0 : index
    %c0_20 = arith.constant 0 : index
    %13 = vector.load %arg5[%c0_19, %c0_20] : memref<16x32xf32, #tpu.memory_space<vmem>>, vector<16x32xf32>
    %14 = arith.addf %12, %13 : vector<16x32xf32>
    %c0_21 = arith.constant 0 : index
    %c0_22 = arith.constant 0 : index
    %15 = vector.load %arg8[%c0_21, %c0_22] : memref<32x32xf32, #tpu.memory_space<vmem>>, vector<32x32xf32>
    %cst = arith.constant dense<0.000000e+00> : vector<16x32xf32>
    %16 = tpu.matmul %14, %15, %cst {dimension_numbers = #tpu.dot_dimension_numbers<[1], [0], [0], [1], [0, 0, 1, 1], [], []>} : vector<16x32xf32>, vector<32x32xf32>, vector<16x32xf32> -> vector<16x32xf32>
    %c0_23 = arith.constant 0 : index
    %c0_24 = arith.constant 0 : index
    %17 = vector.load %arg9[%c0_23, %c0_24] : memref<1x32xf32, #tpu.memory_space<vmem>>, vector<1x32xf32>
    %18 = vector.broadcast %17 : vector<1x32xf32> to vector<16x32xf32>
    %19 = arith.addf %16, %18 : vector<16x32xf32>
    %cst_25 = arith.constant 0.000000e+00 : f32
    %20 = vector.broadcast %cst_25 : f32 to vector<16x32xf32>
    %21 = arith.cmpf oge, %19, %20 : vector<16x32xf32>
    %cst_26 = arith.constant 2.000000e-01 : f32
    %22 = vector.broadcast %cst_26 : f32 to vector<16x32xf32>
    %23 = arith.mulf %22, %19 : vector<16x32xf32>
    %24 = arith.select %21, %19, %23 : vector<16x32xi1>, vector<16x32xf32>
    %c0_27 = arith.constant 0 : index
    %c0_28 = arith.constant 0 : index
    %25 = vector.load %arg10[%c0_27, %c0_28] : memref<32x128xf32, #tpu.memory_space<vmem>>, vector<32x128xf32>
    %cst_29 = arith.constant dense<0.000000e+00> : vector<16x128xf32>
    %26 = tpu.matmul %24, %25, %cst_29 {dimension_numbers = #tpu.dot_dimension_numbers<[1], [0], [0], [1], [0, 0, 1, 1], [], []>} : vector<16x32xf32>, vector<32x128xf32>, vector<16x128xf32> -> vector<16x128xf32>
    %c0_30 = arith.constant 0 : index
    %c0_31 = arith.constant 0 : index
    %27 = vector.load %arg11[%c0_30, %c0_31] : memref<1x128xf32, #tpu.memory_space<vmem>>, vector<1x128xf32>
    %28 = vector.broadcast %27 : vector<1x128xf32> to vector<16x128xf32>
    %29 = arith.addf %26, %28 : vector<16x128xf32>
    %c0_32 = arith.constant 0 : index
    %c0_33 = arith.constant 0 : index
    %30 = vector.load %arg14[%c0_32, %c0_33] : memref<16x128xf32, #tpu.memory_space<vmem>>, vector<16x128xf32>
    tpu.vector_store %arg14[%c0_32, %c0_33], %29 {strides = array<i32>} : memref<16x128xf32, #tpu.memory_space<vmem>>, vector<16x128xf32>,
    return
  }
}

module attributes {stable_mosaic.version = 11 : i64} {
  func.func @_blocks_kernel(%arg0: i32, %arg1: memref<16x1xi32, #tpu.memory_space<vmem>>, %arg2: memref<16x1xi32, #tpu.memory_space<vmem>>, %arg3: memref<8x1xf32, #tpu.memory_space<vmem>>, %arg4: memref<8x32xf32, #tpu.memory_space<vmem>>, %arg5: memref<8x32xf32, #tpu.memory_space<vmem>>, %arg6: memref<16x32xf32, #tpu.memory_space<vmem>>, %arg7: memref<1x16xf32, #tpu.memory_space<vmem>>, %arg8: memref<1x96x32xf32, #tpu.memory_space<vmem>>, %arg9: memref<1x64x64xf32, #tpu.memory_space<vmem>>, %arg10: memref<1x64x64xf32, #tpu.memory_space<vmem>>, %arg11: memref<1x304x304xf32, #tpu.memory_space<vmem>>, %arg12: memref<1x304x32xf32, #tpu.memory_space<vmem>>, %arg13: memref<1x64x64xf32, #tpu.memory_space<vmem>>, %arg14: memref<1x64x64xf32, #tpu.memory_space<vmem>>, %arg15: memref<1x112x112xf32, #tpu.memory_space<vmem>>, %arg16: memref<1x112x32xf32, #tpu.memory_space<vmem>>, %arg17: memref<1x80x80xf32, #tpu.memory_space<vmem>>, %arg18: memref<1x80x16xf32, #tpu.memory_space<vmem>>, %arg19: memref<1x16x384xf32, #tpu.memory_space<vmem>>, %arg20: memref<8x32xf32, #tpu.memory_space<vmem>>, %arg21: memref<8x32xf32, #tpu.memory_space<vmem>>, %arg22: memref<16x32xf32, #tpu.memory_space<vmem>>, %arg23: memref<1x16xf32, #tpu.memory_space<vmem>>) attributes {dimension_semantics = [#tpu.dimension_semantics<arbitrary>], iteration_bounds = array<i64: 2>, scalar_prefetch = 0 : i64, scratch_operands = 0 : i64, tpu.core_type = #tpu.core_type<tc>, window_params = [{pipeline_mode = #tpu.pipeline_mode<synchronous>, transform_indices = @transform_0, window_bounds = array<i64: 16, 1>}, {pipeline_mode = #tpu.pipeline_mode<synchronous>, transform_indices = @transform_1, window_bounds = array<i64: 16, 1>}, {pipeline_mode = #tpu.pipeline_mode<synchronous>, transform_indices = @transform_2, window_bounds = array<i64: 8, 1>}, {pipeline_mode = #tpu.pipeline_mode<synchronous>, transform_indices = @transform_3, window_bounds = array<i64: 8, 32>}, {pipeline_mode = #tpu.pipeline_mode<synchronous>, transform_indices = @transform_4, window_bounds = array<i64: 8, 32>}, {pipeline_mode = #tpu.pipeline_mode<synchronous>, transform_indices = @transform_5, window_bounds = array<i64: 16, 32>}, {pipeline_mode = #tpu.pipeline_mode<synchronous>, transform_indices = @transform_6, window_bounds = array<i64: 1, 16>}, {transform_indices = @transform_7, window_bounds = array<i64: 1, 96, 32>}, {transform_indices = @transform_8, window_bounds = array<i64: 1, 64, 64>}, {transform_indices = @transform_9, window_bounds = array<i64: 1, 64, 64>}, {transform_indices = @transform_10, window_bounds = array<i64: 1, 304, 304>}, {transform_indices = @transform_11, window_bounds = array<i64: 1, 304, 32>}, {transform_indices = @transform_12, window_bounds = array<i64: 1, 64, 64>}, {transform_indices = @transform_13, window_bounds = array<i64: 1, 64, 64>}, {transform_indices = @transform_14, window_bounds = array<i64: 1, 112, 112>}, {transform_indices = @transform_15, window_bounds = array<i64: 1, 112, 32>}, {transform_indices = @transform_16, window_bounds = array<i64: 1, 80, 80>}, {transform_indices = @transform_17, window_bounds = array<i64: 1, 80, 16>}, {transform_indices = @transform_18, window_bounds = array<i64: 1, 16, 384>}, {pipeline_mode = #tpu.pipeline_mode<synchronous>, transform_indices = @transform_19, window_bounds = array<i64: 8, 32>}, {pipeline_mode = #tpu.pipeline_mode<synchronous>, transform_indices = @transform_20, window_bounds = array<i64: 8, 32>}, {pipeline_mode = #tpu.pipeline_mode<synchronous>, transform_indices = @transform_21, window_bounds = array<i64: 16, 32>}, {pipeline_mode = #tpu.pipeline_mode<synchronous>, transform_indices = @transform_22, window_bounds = array<i64: 1, 16>}]} {
    %c0_i32 = arith.constant 0 : i32
    %0 = arith.cmpi eq, %arg0, %c0_i32 : i32
    %1 = arith.extui %0 : i1 to i32
    %c0_i32_0 = arith.constant 0 : i32
    %2 = arith.cmpi ne, %1, %c0_i32_0 : i32
    scf.if %2 {
      %c0_131 = arith.constant 0 : index
      %c0_132 = arith.constant 0 : index
      %293 = vector.load %arg4[%c0_131, %c0_132] : memref<8x32xf32, #tpu.memory_space<vmem>>, vector<8x32xf32>
      %c0_133 = arith.constant 0 : index
      %c0_134 = arith.constant 0 : index
      %294 = vector.load %arg20[%c0_133, %c0_134] : memref<8x32xf32, #tpu.memory_space<vmem>>, vector<8x32xf32>
      tpu.vector_store %arg20[%c0_133, %c0_134], %293 {strides = array<i32>} : memref<8x32xf32, #tpu.memory_space<vmem>>, vector<8x32xf32>,
      %c0_135 = arith.constant 0 : index
      %c0_136 = arith.constant 0 : index
      %295 = vector.load %arg5[%c0_135, %c0_136] : memref<8x32xf32, #tpu.memory_space<vmem>>, vector<8x32xf32>
      %c0_137 = arith.constant 0 : index
      %c0_138 = arith.constant 0 : index
      %296 = vector.load %arg21[%c0_137, %c0_138] : memref<8x32xf32, #tpu.memory_space<vmem>>, vector<8x32xf32>
      tpu.vector_store %arg21[%c0_137, %c0_138], %295 {strides = array<i32>} : memref<8x32xf32, #tpu.memory_space<vmem>>, vector<8x32xf32>,
      %c0_139 = arith.constant 0 : index
      %c0_140 = arith.constant 0 : index
      %297 = vector.load %arg6[%c0_139, %c0_140] : memref<16x32xf32, #tpu.memory_space<vmem>>, vector<16x32xf32>
      %c0_141 = arith.constant 0 : index
      %c0_142 = arith.constant 0 : index
      %298 = vector.load %arg22[%c0_141, %c0_142] : memref<16x32xf32, #tpu.memory_space<vmem>>, vector<16x32xf32>
      tpu.vector_store %arg22[%c0_141, %c0_142], %297 {strides = array<i32>} : memref<16x32xf32, #tpu.memory_space<vmem>>, vector<16x32xf32>,
      %c0_143 = arith.constant 0 : index
      %c0_144 = arith.constant 0 : index
      %299 = vector.load %arg7[%c0_143, %c0_144] : memref<1x16xf32, #tpu.memory_space<vmem>>, vector<1x16xf32>
      %c0_145 = arith.constant 0 : index
      %c0_146 = arith.constant 0 : index
      %300 = vector.load %arg23[%c0_145, %c0_146] : memref<1x16xf32, #tpu.memory_space<vmem>>, vector<1x16xf32>
      tpu.vector_store %arg23[%c0_145, %c0_146], %299 {strides = array<i32>} : memref<1x16xf32, #tpu.memory_space<vmem>>, vector<1x16xf32>,
    } else {
    }
    %c0 = arith.constant 0 : index
    %c0_1 = arith.constant 0 : index
    %3 = vector.load %arg20[%c0, %c0_1] : memref<8x32xf32, #tpu.memory_space<vmem>>, vector<8x32xf32>
    %c0_2 = arith.constant 0 : index
    %c0_3 = arith.constant 0 : index
    %4 = vector.load %arg21[%c0_2, %c0_3] : memref<8x32xf32, #tpu.memory_space<vmem>>, vector<8x32xf32>
    %c0_4 = arith.constant 0 : index
    %c0_5 = arith.constant 0 : index
    %5 = vector.load %arg22[%c0_4, %c0_5] : memref<16x32xf32, #tpu.memory_space<vmem>>, vector<16x32xf32>
    %c0_6 = arith.constant 0 : index
    %c0_7 = arith.constant 0 : index
    %6 = vector.load %arg23[%c0_6, %c0_7] : memref<1x16xf32, #tpu.memory_space<vmem>>, vector<1x16xf32>
    %c0_8 = arith.constant 0 : index
    %c0_9 = arith.constant 0 : index
    %7 = vector.load %arg3[%c0_8, %c0_9] : memref<8x1xf32, #tpu.memory_space<vmem>>, vector<8x1xf32>
    %c0_10 = arith.constant 0 : index
    %c0_11 = arith.constant 0 : index
    %c0_12 = arith.constant 0 : index
    %8 = vector.load %arg8[%c0_10, %c0_11, %c0_12] : memref<1x96x32xf32, #tpu.memory_space<vmem>>, vector<1x96x32xf32>
    %9 = vector.shape_cast %8 : vector<1x96x32xf32> to vector<96x32xf32>
    %c0_13 = arith.constant 0 : index
    %c0_14 = arith.constant 0 : index
    %c0_15 = arith.constant 0 : index
    %10 = vector.load %arg9[%c0_13, %c0_14, %c0_15] : memref<1x64x64xf32, #tpu.memory_space<vmem>>, vector<1x64x64xf32>
    %11 = vector.shape_cast %10 : vector<1x64x64xf32> to vector<64x64xf32>
    %c0_16 = arith.constant 0 : index
    %c0_17 = arith.constant 0 : index
    %c0_18 = arith.constant 0 : index
    %12 = vector.load %arg10[%c0_16, %c0_17, %c0_18] : memref<1x64x64xf32, #tpu.memory_space<vmem>>, vector<1x64x64xf32>
    %13 = vector.shape_cast %12 : vector<1x64x64xf32> to vector<64x64xf32>
    %c0_19 = arith.constant 0 : index
    %c0_20 = arith.constant 0 : index
    %c0_21 = arith.constant 0 : index
    %14 = vector.load %arg11[%c0_19, %c0_20, %c0_21] : memref<1x304x304xf32, #tpu.memory_space<vmem>>, vector<1x304x304xf32>
    %15 = vector.shape_cast %14 : vector<1x304x304xf32> to vector<304x304xf32>
    %c0_22 = arith.constant 0 : index
    %c0_23 = arith.constant 0 : index
    %c0_24 = arith.constant 0 : index
    %16 = vector.load %arg12[%c0_22, %c0_23, %c0_24] : memref<1x304x32xf32, #tpu.memory_space<vmem>>, vector<1x304x32xf32>
    %17 = vector.shape_cast %16 : vector<1x304x32xf32> to vector<304x32xf32>
    %c0_25 = arith.constant 0 : index
    %c0_26 = arith.constant 0 : index
    %c0_27 = arith.constant 0 : index
    %18 = vector.load %arg13[%c0_25, %c0_26, %c0_27] : memref<1x64x64xf32, #tpu.memory_space<vmem>>, vector<1x64x64xf32>
    %19 = vector.shape_cast %18 : vector<1x64x64xf32> to vector<64x64xf32>
    %c0_28 = arith.constant 0 : index
    %c0_29 = arith.constant 0 : index
    %c0_30 = arith.constant 0 : index
    %20 = vector.load %arg14[%c0_28, %c0_29, %c0_30] : memref<1x64x64xf32, #tpu.memory_space<vmem>>, vector<1x64x64xf32>
    %21 = vector.shape_cast %20 : vector<1x64x64xf32> to vector<64x64xf32>
    %c0_31 = arith.constant 0 : index
    %c0_32 = arith.constant 0 : index
    %c0_33 = arith.constant 0 : index
    %22 = vector.load %arg15[%c0_31, %c0_32, %c0_33] : memref<1x112x112xf32, #tpu.memory_space<vmem>>, vector<1x112x112xf32>
    %23 = vector.shape_cast %22 : vector<1x112x112xf32> to vector<112x112xf32>
    %c0_34 = arith.constant 0 : index
    %c0_35 = arith.constant 0 : index
    %c0_36 = arith.constant 0 : index
    %24 = vector.load %arg16[%c0_34, %c0_35, %c0_36] : memref<1x112x32xf32, #tpu.memory_space<vmem>>, vector<1x112x32xf32>
    %25 = vector.shape_cast %24 : vector<1x112x32xf32> to vector<112x32xf32>
    %c0_37 = arith.constant 0 : index
    %c0_38 = arith.constant 0 : index
    %c0_39 = arith.constant 0 : index
    %26 = vector.load %arg17[%c0_37, %c0_38, %c0_39] : memref<1x80x80xf32, #tpu.memory_space<vmem>>, vector<1x80x80xf32>
    %27 = vector.shape_cast %26 : vector<1x80x80xf32> to vector<80x80xf32>
    %c0_40 = arith.constant 0 : index
    %c0_41 = arith.constant 0 : index
    %c0_42 = arith.constant 0 : index
    %28 = vector.load %arg18[%c0_40, %c0_41, %c0_42] : memref<1x80x16xf32, #tpu.memory_space<vmem>>, vector<1x80x16xf32>
    %29 = vector.shape_cast %28 : vector<1x80x16xf32> to vector<80x16xf32>
    %c0_43 = arith.constant 0 : index
    %c0_44 = arith.constant 0 : index
    %c0_45 = arith.constant 0 : index
    %30 = vector.load %arg19[%c0_43, %c0_44, %c0_45] : memref<1x16x384xf32, #tpu.memory_space<vmem>>, vector<1x16x384xf32>
    %31 = vector.shape_cast %30 : vector<1x16x384xf32> to vector<16x384xf32>
    %32 = vector.extract_strided_slice %31 {offsets = [0, 0], sizes = [1, 32], strides = [1, 1]} : vector<16x384xf32> to vector<1x32xf32>
    %33 = vector.extract_strided_slice %31 {offsets = [1, 0], sizes = [1, 32], strides = [1, 1]} : vector<16x384xf32> to vector<1x32xf32>
    %34 = vector.extract_strided_slice %31 {offsets = [2, 0], sizes = [1, 64], strides = [1, 1]} : vector<16x384xf32> to vector<1x64xf32>
    %35 = vector.extract_strided_slice %31 {offsets = [3, 0], sizes = [1, 64], strides = [1, 1]} : vector<16x384xf32> to vector<1x64xf32>
    %36 = vector.extract_strided_slice %31 {offsets = [4, 0], sizes = [1, 304], strides = [1, 1]} : vector<16x384xf32> to vector<1x304xf32>
    %37 = vector.extract_strided_slice %31 {offsets = [5, 0], sizes = [1, 32], strides = [1, 1]} : vector<16x384xf32> to vector<1x32xf32>
    %38 = vector.extract_strided_slice %31 {offsets = [6, 0], sizes = [1, 32], strides = [1, 1]} : vector<16x384xf32> to vector<1x32xf32>
    %39 = vector.extract_strided_slice %31 {offsets = [7, 0], sizes = [1, 64], strides = [1, 1]} : vector<16x384xf32> to vector<1x64xf32>
    %40 = vector.extract_strided_slice %31 {offsets = [8, 0], sizes = [1, 64], strides = [1, 1]} : vector<16x384xf32> to vector<1x64xf32>
    %41 = vector.extract_strided_slice %31 {offsets = [9, 0], sizes = [1, 112], strides = [1, 1]} : vector<16x384xf32> to vector<1x112xf32>
    %42 = vector.extract_strided_slice %31 {offsets = [10, 0], sizes = [1, 32], strides = [1, 1]} : vector<16x384xf32> to vector<1x32xf32>
    %43 = vector.extract_strided_slice %31 {offsets = [11, 0], sizes = [1, 32], strides = [1, 1]} : vector<16x384xf32> to vector<1x32xf32>
    %44 = vector.extract_strided_slice %31 {offsets = [12, 0], sizes = [1, 80], strides = [1, 1]} : vector<16x384xf32> to vector<1x80xf32>
    %45 = vector.extract_strided_slice %31 {offsets = [13, 0], sizes = [1, 16], strides = [1, 1]} : vector<16x384xf32> to vector<1x16xf32>
    %46 = vector.extract_strided_slice %31 {offsets = [14, 0], sizes = [1, 16], strides = [1, 1]} : vector<16x384xf32> to vector<1x16xf32>
    %c0_46 = arith.constant 0 : index
    %c0_47 = arith.constant 0 : index
    %47 = vector.load %arg1[%c0_46, %c0_47] : memref<16x1xi32, #tpu.memory_space<vmem>>, vector<16x1xi32>
    %c0_48 = arith.constant 0 : index
    %c0_49 = arith.constant 0 : index
    %48 = vector.load %arg2[%c0_48, %c0_49] : memref<16x1xi32, #tpu.memory_space<vmem>>, vector<16x1xi32>
    %49 = tpu.iota {dimensions = array<i32: 1>} : vector<16x8xi32>
    %50 = vector.broadcast %47 : vector<16x1xi32> to vector<16x8xi32>
    %51 = arith.cmpi eq, %49, %50 : vector<16x8xi32>
    %52 = tpu.iota {dimensions = array<i32: 1>} : vector<16x8xi32>
    %53 = vector.broadcast %48 : vector<16x1xi32> to vector<16x8xi32>
    %54 = arith.cmpi eq, %52, %53 : vector<16x8xi32>
    %cst = arith.constant 1.000000e+00 : f32
    %cst_50 = arith.constant 0.000000e+00 : f32
    %55 = vector.broadcast %cst : f32 to vector<16x8xf32>
    %56 = vector.broadcast %cst_50 : f32 to vector<16x8xf32>
    %57 = arith.select %51, %55, %56 : vector<16x8xi1>, vector<16x8xf32>
    %cst_51 = arith.constant 1.000000e+00 : f32
    %cst_52 = arith.constant 0.000000e+00 : f32
    %58 = vector.broadcast %cst_51 : f32 to vector<16x8xf32>
    %59 = vector.broadcast %cst_52 : f32 to vector<16x8xf32>
    %60 = arith.select %54, %58, %59 : vector<16x8xi1>, vector<16x8xf32>
    %61 = arith.truncf %57 : vector<16x8xf32> to vector<16x8xbf16>
    %62 = arith.truncf %60 : vector<16x8xf32> to vector<16x8xbf16>
    %63 = vector.extract_strided_slice %9 {offsets = [0, 0], sizes = [32, 32], strides = [1, 1]} : vector<96x32xf32> to vector<32x32xf32>
    %cst_53 = arith.constant dense<0.000000e+00> : vector<8x32xf32>
    %64 = tpu.matmul %3, %63, %cst_53 {dimension_numbers = #tpu.dot_dimension_numbers<[1], [0], [0], [1], [0, 0, 1, 1], [], []>} : vector<8x32xf32>, vector<32x32xf32>, vector<8x32xf32> -> vector<8x32xf32>
    %65 = vector.extract_strided_slice %9 {offsets = [32, 0], sizes = [32, 32], strides = [1, 1]} : vector<96x32xf32> to vector<32x32xf32>
    %cst_54 = arith.constant dense<0.000000e+00> : vector<8x32xf32>
    %66 = tpu.matmul %4, %65, %cst_54 {dimension_numbers = #tpu.dot_dimension_numbers<[1], [0], [0], [1], [0, 0, 1, 1], [], []>} : vector<8x32xf32>, vector<32x32xf32>, vector<8x32xf32> -> vector<8x32xf32>
    %67 = arith.truncf %64 : vector<8x32xf32> to vector<8x32xbf16>
    %cst_55 = arith.constant dense<0.000000e+00> : vector<16x32xf32>
    %68 = tpu.matmul %61, %67, %cst_55 {dimension_numbers = #tpu.dot_dimension_numbers<[1], [0], [0], [1], [0, 0, 1, 1], [], []>} : vector<16x8xbf16>, vector<8x32xbf16>, vector<16x32xf32> -> vector<16x32xf32>
    %69 = arith.truncf %66 : vector<8x32xf32> to vector<8x32xbf16>
    %cst_56 = arith.constant dense<0.000000e+00> : vector<16x32xf32>
    %70 = tpu.matmul %62, %69, %cst_56 {dimension_numbers = #tpu.dot_dimension_numbers<[1], [0], [0], [1], [0, 0, 1, 1], [], []>} : vector<16x8xbf16>, vector<8x32xbf16>, vector<16x32xf32> -> vector<16x32xf32>
    %71 = arith.addf %68, %70 : vector<16x32xf32>
    %72 = vector.extract_strided_slice %9 {offsets = [64, 0], sizes = [32, 32], strides = [1, 1]} : vector<96x32xf32> to vector<32x32xf32>
    %cst_57 = arith.constant dense<0.000000e+00> : vector<16x32xf32>
    %73 = tpu.matmul %5, %72, %cst_57 {dimension_numbers = #tpu.dot_dimension_numbers<[1], [0], [0], [1], [0, 0, 1, 1], [], []>} : vector<16x32xf32>, vector<32x32xf32>, vector<16x32xf32> -> vector<16x32xf32>
    %74 = arith.addf %71, %73 : vector<16x32xf32>
    %75 = vector.broadcast %32 : vector<1x32xf32> to vector<16x32xf32>
    %76 = arith.mulf %74, %75 : vector<16x32xf32>
    %cst_58 = arith.constant dense<0.000000e+00> : vector<16xf32>
    %77 = vector.multi_reduction <add>, %76, %cst_58 [1] : vector<16x32xf32> to vector<16xf32>
    %78 = vector.shape_cast %77 : vector<16xf32> to vector<16x1xf32>
    %cst_59 = arith.constant 0.000000e+00 : f32
    %79 = vector.broadcast %cst_59 : f32 to vector<16x1xf32>
    %80 = arith.cmpf oge, %78, %79 : vector<16x1xf32>
    %cst_60 = arith.constant 2.000000e-01 : f32
    %81 = vector.broadcast %cst_60 : f32 to vector<16x1xf32>
    %82 = arith.mulf %81, %78 : vector<16x1xf32>
    %83 = arith.select %80, %78, %82 : vector<16x1xi1>, vector<16x1xf32>
    %cst_61 = arith.constant -1.000000e+30 : f32
    %84 = vector.shape_cast %83 : vector<16x1xf32> to vector<16x1xf32>
    %85 = vector.broadcast %84 : vector<16x1xf32> to vector<16x8xf32>
    %86 = vector.broadcast %cst_61 : f32 to vector<16x8xf32>
    %87 = arith.select %51, %85, %86 : vector<16x8xi1>, vector<16x8xf32>
    %cst_62 = arith.constant dense<0xFF800000> : vector<8xf32>
    %88 = vector.multi_reduction <maximumf>, %87, %cst_62 [0] : vector<16x8xf32> to vector<8xf32>
    %89 = vector.shape_cast %88 : vector<8xf32> to vector<1x8xf32>
    %cst_63 = arith.constant 0.000000e+00 : f32
    %90 = vector.shape_cast %89 : vector<1x8xf32> to vector<1x8xf32>
    %91 = vector.broadcast %90 : vector<1x8xf32> to vector<16x8xf32>
    %92 = vector.broadcast %cst_63 : f32 to vector<16x8xf32>
    %93 = arith.select %51, %91, %92 : vector<16x8xi1>, vector<16x8xf32>
    %cst_64 = arith.constant dense<0.000000e+00> : vector<16xf32>
    %94 = vector.multi_reduction <add>, %93, %cst_64 [1] : vector<16x8xf32> to vector<16xf32>
    %95 = vector.shape_cast %94 : vector<16xf32> to vector<16x1xf32>
    %96 = arith.subf %83, %95 : vector<16x1xf32>
    %97 = math.exp %96 : vector<16x1xf32>
    %cst_65 = arith.constant 0.000000e+00 : f32
    %98 = vector.shape_cast %97 : vector<16x1xf32> to vector<16x1xf32>
    %99 = vector.broadcast %98 : vector<16x1xf32> to vector<16x8xf32>
    %100 = vector.broadcast %cst_65 : f32 to vector<16x8xf32>
    %101 = arith.select %51, %99, %100 : vector<16x8xi1>, vector<16x8xf32>
    %cst_66 = arith.constant dense<0.000000e+00> : vector<8xf32>
    %102 = vector.multi_reduction <add>, %101, %cst_66 [0] : vector<16x8xf32> to vector<8xf32>
    %103 = vector.shape_cast %102 : vector<8xf32> to vector<1x8xf32>
    %cst_67 = arith.constant 0.000000e+00 : f32
    %104 = vector.broadcast %cst_67 : f32 to vector<1x8xf32>
    %105 = arith.cmpf ogt, %103, %104 : vector<1x8xf32>
    %cst_68 = arith.constant 1.000000e+00 : f32
    %106 = vector.broadcast %cst_68 : f32 to vector<1x8xf32>
    %107 = arith.divf %106, %103 : vector<1x8xf32>
    %cst_69 = arith.constant 0.000000e+00 : f32
    %108 = vector.broadcast %cst_69 : f32 to vector<1x8xf32>
    %109 = arith.select %105, %107, %108 : vector<1x8xi1>, vector<1x8xf32>
    %cst_70 = arith.constant 0.000000e+00 : f32
    %110 = vector.shape_cast %109 : vector<1x8xf32> to vector<1x8xf32>
    %111 = vector.broadcast %110 : vector<1x8xf32> to vector<16x8xf32>
    %112 = vector.broadcast %cst_70 : f32 to vector<16x8xf32>
    %113 = arith.select %51, %111, %112 : vector<16x8xi1>, vector<16x8xf32>
    %cst_71 = arith.constant dense<0.000000e+00> : vector<16xf32>
    %114 = vector.multi_reduction <add>, %113, %cst_71 [1] : vector<16x8xf32> to vector<16xf32>
    %115 = vector.shape_cast %114 : vector<16xf32> to vector<16x1xf32>
    %116 = arith.mulf %97, %115 : vector<16x1xf32>
    %117 = vector.broadcast %116 : vector<16x1xf32> to vector<16x32xf32>
    %118 = arith.mulf %74, %117 : vector<16x32xf32>
    %119 = arith.mulf %118, %118 : vector<16x32xf32>
    %cst_72 = arith.constant dense<0.000000e+00> : vector<16xf32>
    %120 = vector.multi_reduction <add>, %119, %cst_72 [1] : vector<16x32xf32> to vector<16xf32>
    %121 = vector.shape_cast %120 : vector<16xf32> to vector<16x1xf32>
    %cst_73 = arith.constant 3.200000e+01 : f32
    %122 = vector.broadcast %cst_73 : f32 to vector<16x1xf32>
    %123 = arith.divf %121, %122 : vector<16x1xf32>
    %cst_74 = arith.constant 1.1920929E-7 : f32
    %124 = vector.broadcast %cst_74 : f32 to vector<16x1xf32>
    %125 = arith.addf %123, %124 : vector<16x1xf32>
    %126 = math.rsqrt %125 : vector<16x1xf32>
    %127 = vector.broadcast %126 : vector<16x1xf32> to vector<16x32xf32>
    %128 = arith.mulf %118, %127 : vector<16x32xf32>
    %129 = vector.broadcast %33 : vector<1x32xf32> to vector<16x32xf32>
    %130 = arith.mulf %128, %129 : vector<16x32xf32>
    %131 = arith.addf %5, %130 : vector<16x32xf32>
    %c0_75 = arith.constant 0 : index
    %c0_76 = arith.constant 0 : index
    %132 = vector.load %arg22[%c0_75, %c0_76] : memref<16x32xf32, #tpu.memory_space<vmem>>, vector<16x32xf32>
    tpu.vector_store %arg22[%c0_75, %c0_76], %131 {strides = array<i32>} : memref<16x32xf32, #tpu.memory_space<vmem>>, vector<16x32xf32>,
    %133 = vector.extract_strided_slice %11 {offsets = [0, 0], sizes = [32, 64], strides = [1, 1]} : vector<64x64xf32> to vector<32x64xf32>
    %cst_77 = arith.constant dense<0.000000e+00> : vector<8x64xf32>
    %134 = tpu.matmul %4, %133, %cst_77 {dimension_numbers = #tpu.dot_dimension_numbers<[1], [0], [0], [1], [0, 0, 1, 1], [], []>} : vector<8x32xf32>, vector<32x64xf32>, vector<8x64xf32> -> vector<8x64xf32>
    %135 = arith.truncf %134 : vector<8x64xf32> to vector<8x64xbf16>
    %cst_78 = arith.constant dense<0.000000e+00> : vector<16x64xf32>
    %136 = tpu.matmul %62, %135, %cst_78 {dimension_numbers = #tpu.dot_dimension_numbers<[1], [0], [0], [1], [0, 0, 1, 1], [], []>} : vector<16x8xbf16>, vector<8x64xbf16>, vector<16x64xf32> -> vector<16x64xf32>
    %137 = vector.extract_strided_slice %11 {offsets = [32, 0], sizes = [32, 64], strides = [1, 1]} : vector<64x64xf32> to vector<32x64xf32>
    %cst_79 = arith.constant dense<0.000000e+00> : vector<16x64xf32>
    %138 = tpu.matmul %131, %137, %cst_79 {dimension_numbers = #tpu.dot_dimension_numbers<[1], [0], [0], [1], [0, 0, 1, 1], [], []>} : vector<16x32xf32>, vector<32x64xf32>, vector<16x64xf32> -> vector<16x64xf32>
    %139 = arith.addf %136, %138 : vector<16x64xf32>
    %140 = vector.broadcast %34 : vector<1x64xf32> to vector<16x64xf32>
    %141 = arith.addf %139, %140 : vector<16x64xf32>
    %cst_80 = arith.constant 0.000000e+00 : f32
    %142 = vector.broadcast %cst_80 : f32 to vector<16x64xf32>
    %143 = arith.cmpf oge, %141, %142 : vector<16x64xf32>
    %cst_81 = arith.constant 2.000000e-01 : f32
    %144 = vector.broadcast %cst_81 : f32 to vector<16x64xf32>
    %145 = arith.mulf %144, %141 : vector<16x64xf32>
    %146 = arith.select %143, %141, %145 : vector<16x64xi1>, vector<16x64xf32>
    %cst_82 = arith.constant dense<0.000000e+00> : vector<16x64xf32>
    %147 = tpu.matmul %146, %13, %cst_82 {dimension_numbers = #tpu.dot_dimension_numbers<[1], [0], [0], [1], [0, 0, 1, 1], [], []>} : vector<16x64xf32>, vector<64x64xf32>, vector<16x64xf32> -> vector<16x64xf32>
    %148 = vector.broadcast %35 : vector<1x64xf32> to vector<16x64xf32>
    %149 = arith.addf %147, %148 : vector<16x64xf32>
    %cst_83 = arith.constant dense<0.000000e+00> : vector<8x64xf32>
    %150 = tpu.matmul %57, %149, %cst_83 {dimension_numbers = #tpu.dot_dimension_numbers<[0], [0], [1], [1], [0, 1, 1, 1], [], []>} : vector<16x8xf32>, vector<16x64xf32>, vector<8x64xf32> -> vector<8x64xf32>
    %151 = vector.broadcast %7 : vector<8x1xf32> to vector<8x64xf32>
    %152 = arith.mulf %150, %151 : vector<8x64xf32>
    %153 = arith.mulf %149, %149 : vector<16x64xf32>
    %cst_84 = arith.constant dense<0.000000e+00> : vector<8x64xf32>
    %154 = tpu.matmul %57, %153, %cst_84 {dimension_numbers = #tpu.dot_dimension_numbers<[0], [0], [1], [1], [0, 1, 1, 1], [], []>} : vector<16x8xf32>, vector<16x64xf32>, vector<8x64xf32> -> vector<8x64xf32>
    %155 = vector.broadcast %7 : vector<8x1xf32> to vector<8x64xf32>
    %156 = arith.mulf %154, %155 : vector<8x64xf32>
    %157 = arith.mulf %152, %152 : vector<8x64xf32>
    %158 = arith.subf %156, %157 : vector<8x64xf32>
    %cst_85 = arith.constant 0.000000e+00 : f32
    %159 = vector.broadcast %cst_85 : f32 to vector<8x64xf32>
    %160 = arith.cmpf oge, %158, %159 : vector<8x64xf32>
    %cst_86 = arith.constant 0.00999999977 : f32
    %161 = vector.broadcast %cst_86 : f32 to vector<8x64xf32>
    %162 = arith.mulf %161, %158 : vector<8x64xf32>
    %163 = arith.select %160, %158, %162 : vector<8x64xi1>, vector<8x64xf32>
    %cst_87 = arith.constant 0.000000e+00 : f32
    %164 = vector.broadcast %cst_87 : f32 to vector<8x64xf32>
    %165 = arith.maximumf %163, %164 : vector<8x64xf32>
    %cst_88 = arith.constant 9.99999997E-7 : f32
    %166 = vector.broadcast %cst_88 : f32 to vector<8x64xf32>
    %167 = arith.addf %165, %166 : vector<8x64xf32>
    %168 = math.rsqrt %167 : vector<8x64xf32>
    %cst_89 = arith.constant 9.99999997E-7 : f32
    %169 = vector.broadcast %cst_89 : f32 to vector<8x64xf32>
    %170 = arith.addf %165, %169 : vector<8x64xf32>
    %171 = arith.mulf %170, %168 : vector<8x64xf32>
    %cst_90 = arith.constant dense<0.000000e+00> : vector<16x64xf32>
    %172 = tpu.matmul %57, %152, %cst_90 {dimension_numbers = #tpu.dot_dimension_numbers<[1], [0], [0], [1], [0, 0, 1, 1], [], []>} : vector<16x8xf32>, vector<8x64xf32>, vector<16x64xf32> -> vector<16x64xf32>
    %173 = arith.subf %149, %172 : vector<16x64xf32>
    %174 = arith.mulf %173, %173 : vector<16x64xf32>
    %175 = arith.mulf %174, %173 : vector<16x64xf32>
    %176 = arith.mulf %168, %168 : vector<8x64xf32>
    %cst_91 = arith.constant dense<0.000000e+00> : vector<8x64xf32>
    %177 = tpu.matmul %57, %175, %cst_91 {dimension_numbers = #tpu.dot_dimension_numbers<[0], [0], [1], [1], [0, 1, 1, 1], [], []>} : vector<16x8xf32>, vector<16x64xf32>, vector<8x64xf32> -> vector<8x64xf32>
    %178 = vector.broadcast %7 : vector<8x1xf32> to vector<8x64xf32>
    %179 = arith.mulf %177, %178 : vector<8x64xf32>
    %180 = arith.mulf %176, %168 : vector<8x64xf32>
    %181 = arith.mulf %179, %180 : vector<8x64xf32>
    %182 = arith.mulf %175, %173 : vector<16x64xf32>
    %cst_92 = arith.constant dense<0.000000e+00> : vector<8x64xf32>
    %183 = tpu.matmul %57, %182, %cst_92 {dimension_numbers = #tpu.dot_dimension_numbers<[0], [0], [1], [1], [0, 1, 1, 1], [], []>} : vector<16x8xf32>, vector<16x64xf32>, vector<8x64xf32> -> vector<8x64xf32>
    %184 = vector.broadcast %7 : vector<8x1xf32> to vector<8x64xf32>
    %185 = arith.mulf %183, %184 : vector<8x64xf32>
    %186 = arith.mulf %176, %176 : vector<8x64xf32>
    %187 = arith.mulf %185, %186 : vector<8x64xf32>
    %188 = vector.shape_cast %6 : vector<1x16xf32> to vector<1x16xf32>
    %189 = vector.broadcast %188 : vector<1x16xf32> to vector<8x16xf32>
    %190 = tpu.concatenate %3, %152, %171, %181, %187, %189 in 1 : vector<8x32xf32>, vector<8x64xf32>, vector<8x64xf32>, vector<8x64xf32>, vector<8x64xf32>, vector<8x16xf32> -> vector<8x304xf32>
    %cst_93 = arith.constant dense<0.000000e+00> : vector<8x304xf32>
    %191 = tpu.matmul %190, %15, %cst_93 {dimension_numbers = #tpu.dot_dimension_numbers<[1], [0], [0], [1], [0, 0, 1, 1], [], []>} : vector<8x304xf32>, vector<304x304xf32>, vector<8x304xf32> -> vector<8x304xf32>
    %192 = vector.broadcast %36 : vector<1x304xf32> to vector<8x304xf32>
    %193 = arith.addf %191, %192 : vector<8x304xf32>
    %cst_94 = arith.constant 0.000000e+00 : f32
    %194 = vector.broadcast %cst_94 : f32 to vector<8x304xf32>
    %195 = arith.cmpf oge, %193, %194 : vector<8x304xf32>
    %cst_95 = arith.constant 2.000000e-01 : f32
    %196 = vector.broadcast %cst_95 : f32 to vector<8x304xf32>
    %197 = arith.mulf %196, %193 : vector<8x304xf32>
    %198 = arith.select %195, %193, %197 : vector<8x304xi1>, vector<8x304xf32>
    %cst_96 = arith.constant dense<0.000000e+00> : vector<8x32xf32>
    %199 = tpu.matmul %198, %17, %cst_96 {dimension_numbers = #tpu.dot_dimension_numbers<[1], [0], [0], [1], [0, 0, 1, 1], [], []>} : vector<8x304xf32>, vector<304x32xf32>, vector<8x32xf32> -> vector<8x32xf32>
    %200 = vector.broadcast %37 : vector<1x32xf32> to vector<8x32xf32>
    %201 = arith.addf %199, %200 : vector<8x32xf32>
    %202 = arith.mulf %201, %201 : vector<8x32xf32>
    %cst_97 = arith.constant dense<0.000000e+00> : vector<8xf32>
    %203 = vector.multi_reduction <add>, %202, %cst_97 [1] : vector<8x32xf32> to vector<8xf32>
    %204 = vector.shape_cast %203 : vector<8xf32> to vector<8x1xf32>
    %cst_98 = arith.constant 3.200000e+01 : f32
    %205 = vector.broadcast %cst_98 : f32 to vector<8x1xf32>
    %206 = arith.divf %204, %205 : vector<8x1xf32>
    %cst_99 = arith.constant 1.1920929E-7 : f32
    %207 = vector.broadcast %cst_99 : f32 to vector<8x1xf32>
    %208 = arith.addf %206, %207 : vector<8x1xf32>
    %209 = math.rsqrt %208 : vector<8x1xf32>
    %210 = vector.broadcast %209 : vector<8x1xf32> to vector<8x32xf32>
    %211 = arith.mulf %201, %210 : vector<8x32xf32>
    %212 = vector.broadcast %38 : vector<1x32xf32> to vector<8x32xf32>
    %213 = arith.mulf %211, %212 : vector<8x32xf32>
    %214 = arith.addf %3, %213 : vector<8x32xf32>
    %c0_100 = arith.constant 0 : index
    %c0_101 = arith.constant 0 : index
    %215 = vector.load %arg20[%c0_100, %c0_101] : memref<8x32xf32, #tpu.memory_space<vmem>>, vector<8x32xf32>
    tpu.vector_store %arg20[%c0_100, %c0_101], %214 {strides = array<i32>} : memref<8x32xf32, #tpu.memory_space<vmem>>, vector<8x32xf32>,
    %216 = vector.extract_strided_slice %19 {offsets = [0, 0], sizes = [32, 64], strides = [1, 1]} : vector<64x64xf32> to vector<32x64xf32>
    %cst_102 = arith.constant dense<0.000000e+00> : vector<8x64xf32>
    %217 = tpu.matmul %214, %216, %cst_102 {dimension_numbers = #tpu.dot_dimension_numbers<[1], [0], [0], [1], [0, 0, 1, 1], [], []>} : vector<8x32xf32>, vector<32x64xf32>, vector<8x64xf32> -> vector<8x64xf32>
    %218 = arith.truncf %217 : vector<8x64xf32> to vector<8x64xbf16>
    %cst_103 = arith.constant dense<0.000000e+00> : vector<16x64xf32>
    %219 = tpu.matmul %61, %218, %cst_103 {dimension_numbers = #tpu.dot_dimension_numbers<[1], [0], [0], [1], [0, 0, 1, 1], [], []>} : vector<16x8xbf16>, vector<8x64xbf16>, vector<16x64xf32> -> vector<16x64xf32>
    %220 = vector.extract_strided_slice %19 {offsets = [32, 0], sizes = [32, 64], strides = [1, 1]} : vector<64x64xf32> to vector<32x64xf32>
    %cst_104 = arith.constant dense<0.000000e+00> : vector<16x64xf32>
    %221 = tpu.matmul %131, %220, %cst_104 {dimension_numbers = #tpu.dot_dimension_numbers<[1], [0], [0], [1], [0, 0, 1, 1], [], []>} : vector<16x32xf32>, vector<32x64xf32>, vector<16x64xf32> -> vector<16x64xf32>
    %222 = arith.addf %219, %221 : vector<16x64xf32>
    %223 = vector.broadcast %39 : vector<1x64xf32> to vector<16x64xf32>
    %224 = arith.addf %222, %223 : vector<16x64xf32>
    %cst_105 = arith.constant 0.000000e+00 : f32
    %225 = vector.broadcast %cst_105 : f32 to vector<16x64xf32>
    %226 = arith.cmpf oge, %224, %225 : vector<16x64xf32>
    %cst_106 = arith.constant 2.000000e-01 : f32
    %227 = vector.broadcast %cst_106 : f32 to vector<16x64xf32>
    %228 = arith.mulf %227, %224 : vector<16x64xf32>
    %229 = arith.select %226, %224, %228 : vector<16x64xi1>, vector<16x64xf32>
    %cst_107 = arith.constant dense<0.000000e+00> : vector<16x64xf32>
    %230 = tpu.matmul %229, %21, %cst_107 {dimension_numbers = #tpu.dot_dimension_numbers<[1], [0], [0], [1], [0, 0, 1, 1], [], []>} : vector<16x64xf32>, vector<64x64xf32>, vector<16x64xf32> -> vector<16x64xf32>
    %231 = vector.broadcast %40 : vector<1x64xf32> to vector<16x64xf32>
    %232 = arith.addf %230, %231 : vector<16x64xf32>
    %cst_108 = arith.constant dense<0.000000e+00> : vector<8x64xf32>
    %233 = tpu.matmul %60, %232, %cst_108 {dimension_numbers = #tpu.dot_dimension_numbers<[0], [0], [1], [1], [0, 1, 1, 1], [], []>} : vector<16x8xf32>, vector<16x64xf32>, vector<8x64xf32> -> vector<8x64xf32>
    %234 = vector.shape_cast %6 : vector<1x16xf32> to vector<1x16xf32>
    %235 = vector.broadcast %234 : vector<1x16xf32> to vector<8x16xf32>
    %236 = tpu.concatenate %4, %233, %235 in 1 : vector<8x32xf32>, vector<8x64xf32>, vector<8x16xf32> -> vector<8x112xf32>
    %cst_109 = arith.constant dense<0.000000e+00> : vector<8x112xf32>
    %237 = tpu.matmul %236, %23, %cst_109 {dimension_numbers = #tpu.dot_dimension_numbers<[1], [0], [0], [1], [0, 0, 1, 1], [], []>} : vector<8x112xf32>, vector<112x112xf32>, vector<8x112xf32> -> vector<8x112xf32>
    %238 = vector.broadcast %41 : vector<1x112xf32> to vector<8x112xf32>
    %239 = arith.addf %237, %238 : vector<8x112xf32>
    %cst_110 = arith.constant 0.000000e+00 : f32
    %240 = vector.broadcast %cst_110 : f32 to vector<8x112xf32>
    %241 = arith.cmpf oge, %239, %240 : vector<8x112xf32>
    %cst_111 = arith.constant 2.000000e-01 : f32
    %242 = vector.broadcast %cst_111 : f32 to vector<8x112xf32>
    %243 = arith.mulf %242, %239 : vector<8x112xf32>
    %244 = arith.select %241, %239, %243 : vector<8x112xi1>, vector<8x112xf32>
    %cst_112 = arith.constant dense<0.000000e+00> : vector<8x32xf32>
    %245 = tpu.matmul %244, %25, %cst_112 {dimension_numbers = #tpu.dot_dimension_numbers<[1], [0], [0], [1], [0, 0, 1, 1], [], []>} : vector<8x112xf32>, vector<112x32xf32>, vector<8x32xf32> -> vector<8x32xf32>
    %246 = vector.broadcast %42 : vector<1x32xf32> to vector<8x32xf32>
    %247 = arith.addf %245, %246 : vector<8x32xf32>
    %248 = arith.mulf %247, %247 : vector<8x32xf32>
    %cst_113 = arith.constant dense<0.000000e+00> : vector<8xf32>
    %249 = vector.multi_reduction <add>, %248, %cst_113 [1] : vector<8x32xf32> to vector<8xf32>
    %250 = vector.shape_cast %249 : vector<8xf32> to vector<8x1xf32>
    %cst_114 = arith.constant 3.200000e+01 : f32
    %251 = vector.broadcast %cst_114 : f32 to vector<8x1xf32>
    %252 = arith.divf %250, %251 : vector<8x1xf32>
    %cst_115 = arith.constant 1.1920929E-7 : f32
    %253 = vector.broadcast %cst_115 : f32 to vector<8x1xf32>
    %254 = arith.addf %252, %253 : vector<8x1xf32>
    %255 = math.rsqrt %254 : vector<8x1xf32>
    %256 = vector.broadcast %255 : vector<8x1xf32> to vector<8x32xf32>
    %257 = arith.mulf %247, %256 : vector<8x32xf32>
    %258 = vector.broadcast %43 : vector<1x32xf32> to vector<8x32xf32>
    %259 = arith.mulf %257, %258 : vector<8x32xf32>
    %260 = arith.addf %4, %259 : vector<8x32xf32>
    %c0_116 = arith.constant 0 : index
    %c0_117 = arith.constant 0 : index
    %261 = vector.load %arg21[%c0_116, %c0_117] : memref<8x32xf32, #tpu.memory_space<vmem>>, vector<8x32xf32>
    tpu.vector_store %arg21[%c0_116, %c0_117], %260 {strides = array<i32>} : memref<8x32xf32, #tpu.memory_space<vmem>>, vector<8x32xf32>,
    %cst_118 = arith.constant dense<0.000000e+00> : vector<32xf32>
    %262 = vector.multi_reduction <add>, %214, %cst_118 [0] : vector<8x32xf32> to vector<32xf32>
    %263 = vector.shape_cast %262 : vector<32xf32> to vector<1x32xf32>
    %cst_119 = arith.constant 8.000000e+00 : f32
    %264 = vector.broadcast %cst_119 : f32 to vector<1x32xf32>
    %265 = arith.divf %263, %264 : vector<1x32xf32>
    %cst_120 = arith.constant dense<0.000000e+00> : vector<32xf32>
    %266 = vector.multi_reduction <add>, %260, %cst_120 [0] : vector<8x32xf32> to vector<32xf32>
    %267 = vector.shape_cast %266 : vector<32xf32> to vector<1x32xf32>
    %cst_121 = arith.constant 8.000000e+00 : f32
    %268 = vector.broadcast %cst_121 : f32 to vector<1x32xf32>
    %269 = arith.divf %267, %268 : vector<1x32xf32>
    %270 = tpu.concatenate %6, %265, %269 in 1 : vector<1x16xf32>, vector<1x32xf32>, vector<1x32xf32> -> vector<1x80xf32>
    %cst_122 = arith.constant dense<0.000000e+00> : vector<1x80xf32>
    %271 = tpu.matmul %270, %27, %cst_122 {dimension_numbers = #tpu.dot_dimension_numbers<[1], [0], [0], [1], [0, 0, 1, 1], [], []>} : vector<1x80xf32>, vector<80x80xf32>, vector<1x80xf32> -> vector<1x80xf32>
    %272 = arith.addf %271, %44 : vector<1x80xf32>
    %cst_123 = arith.constant 0.000000e+00 : f32
    %273 = vector.broadcast %cst_123 : f32 to vector<1x80xf32>
    %274 = arith.cmpf oge, %272, %273 : vector<1x80xf32>
    %cst_124 = arith.constant 2.000000e-01 : f32
    %275 = vector.broadcast %cst_124 : f32 to vector<1x80xf32>
    %276 = arith.mulf %275, %272 : vector<1x80xf32>
    %277 = arith.select %274, %272, %276 : vector<1x80xi1>, vector<1x80xf32>
    %cst_125 = arith.constant dense<0.000000e+00> : vector<1x16xf32>
    %278 = tpu.matmul %277, %29, %cst_125 {dimension_numbers = #tpu.dot_dimension_numbers<[1], [0], [0], [1], [0, 0, 1, 1], [], []>} : vector<1x80xf32>, vector<80x16xf32>, vector<1x16xf32> -> vector<1x16xf32>
    %279 = arith.addf %278, %45 : vector<1x16xf32>
    %280 = arith.mulf %279, %279 : vector<1x16xf32>
    %cst_126 = arith.constant dense<0.000000e+00> : vector<1xf32>
    %281 = vector.multi_reduction <add>, %280, %cst_126 [1] : vector<1x16xf32> to vector<1xf32>
    %282 = vector.shape_cast %281 : vector<1xf32> to vector<1x1xf32>
    %cst_127 = arith.constant 1.600000e+01 : f32
    %283 = vector.broadcast %cst_127 : f32 to vector<1x1xf32>
    %284 = arith.divf %282, %283 : vector<1x1xf32>
    %cst_128 = arith.constant 1.1920929E-7 : f32
    %285 = vector.broadcast %cst_128 : f32 to vector<1x1xf32>
    %286 = arith.addf %284, %285 : vector<1x1xf32>
    %287 = math.rsqrt %286 : vector<1x1xf32>
    %288 = vector.broadcast %287 : vector<1x1xf32> to vector<1x16xf32>
    %289 = arith.mulf %279, %288 : vector<1x16xf32>
    %290 = arith.mulf %289, %46 : vector<1x16xf32>
    %291 = arith.addf %6, %290 : vector<1x16xf32>
    %c0_129 = arith.constant 0 : index
    %c0_130 = arith.constant 0 : index
    %292 = vector.load %arg23[%c0_129, %c0_130] : memref<1x16xf32, #tpu.memory_space<vmem>>, vector<1x16xf32>
    tpu.vector_store %arg23[%c0_129, %c0_130], %291 {strides = array<i32>} : memref<1x16xf32, #tpu.memory_space<vmem>>, vector<1x16xf32>,
    return
  }
  func.func @transform_0(%arg0: i32) -> (i32, i32) {
    %c0_i32 = arith.constant 0 : i32
    %c0_i32_0 = arith.constant 0 : i32
    %c0_i32_1 = arith.constant 0 : i32
    return %c0_i32, %c0_i32_0 : i32, i32
  }
  func.func @transform_1(%arg0: i32) -> (i32, i32) {
    %c0_i32 = arith.constant 0 : i32
    %c0_i32_0 = arith.constant 0 : i32
    %c0_i32_1 = arith.constant 0 : i32
    return %c0_i32, %c0_i32_0 : i32, i32
  }
  func.func @transform_2(%arg0: i32) -> (i32, i32) {
    %c0_i32 = arith.constant 0 : i32
    %c0_i32_0 = arith.constant 0 : i32
    %c0_i32_1 = arith.constant 0 : i32
    return %c0_i32, %c0_i32_0 : i32, i32
  }
  func.func @transform_3(%arg0: i32) -> (i32, i32) {
    %c0_i32 = arith.constant 0 : i32
    %c0_i32_0 = arith.constant 0 : i32
    %c0_i32_1 = arith.constant 0 : i32
    return %c0_i32, %c0_i32_0 : i32, i32
  }
  func.func @transform_4(%arg0: i32) -> (i32, i32) {
    %c0_i32 = arith.constant 0 : i32
    %c0_i32_0 = arith.constant 0 : i32
    %c0_i32_1 = arith.constant 0 : i32
    return %c0_i32, %c0_i32_0 : i32, i32
  }
  func.func @transform_5(%arg0: i32) -> (i32, i32) {
    %c0_i32 = arith.constant 0 : i32
    %c0_i32_0 = arith.constant 0 : i32
    %c0_i32_1 = arith.constant 0 : i32
    return %c0_i32, %c0_i32_0 : i32, i32
  }
  func.func @transform_6(%arg0: i32) -> (i32, i32) {
    %c0_i32 = arith.constant 0 : i32
    %c0_i32_0 = arith.constant 0 : i32
    %c0_i32_1 = arith.constant 0 : i32
    return %c0_i32, %c0_i32_0 : i32, i32
  }
  func.func @transform_7(%arg0: i32) -> (i32, i32, i32) {
    %c0_i32 = arith.constant 0 : i32
    %c0_i32_0 = arith.constant 0 : i32
    %c0_i32_1 = arith.constant 0 : i32
    return %arg0, %c0_i32, %c0_i32_0 : i32, i32, i32
  }
  func.func @transform_8(%arg0: i32) -> (i32, i32, i32) {
    %c0_i32 = arith.constant 0 : i32
    %c0_i32_0 = arith.constant 0 : i32
    %c0_i32_1 = arith.constant 0 : i32
    return %arg0, %c0_i32, %c0_i32_0 : i32, i32, i32
  }
  func.func @transform_9(%arg0: i32) -> (i32, i32, i32) {
    %c0_i32 = arith.constant 0 : i32
    %c0_i32_0 = arith.constant 0 : i32
    %c0_i32_1 = arith.constant 0 : i32
    return %arg0, %c0_i32, %c0_i32_0 : i32, i32, i32
  }
  func.func @transform_10(%arg0: i32) -> (i32, i32, i32) {
    %c0_i32 = arith.constant 0 : i32
    %c0_i32_0 = arith.constant 0 : i32
    %c0_i32_1 = arith.constant 0 : i32
    return %arg0, %c0_i32, %c0_i32_0 : i32, i32, i32
  }
  func.func @transform_11(%arg0: i32) -> (i32, i32, i32) {
    %c0_i32 = arith.constant 0 : i32
    %c0_i32_0 = arith.constant 0 : i32
    %c0_i32_1 = arith.constant 0 : i32
    return %arg0, %c0_i32, %c0_i32_0 : i32, i32, i32
  }
  func.func @transform_12(%arg0: i32) -> (i32, i32, i32) {
    %c0_i32 = arith.constant 0 : i32
    %c0_i32_0 = arith.constant 0 : i32
    %c0_i32_1 = arith.constant 0 : i32
    return %arg0, %c0_i32, %c0_i32_0 : i32, i32, i32
  }
  func.func @transform_13(%arg0: i32) -> (i32, i32, i32) {
    %c0_i32 = arith.constant 0 : i32
    %c0_i32_0 = arith.constant 0 : i32
    %c0_i32_1 = arith.constant 0 : i32
    return %arg0, %c0_i32, %c0_i32_0 : i32, i32, i32
  }
  func.func @transform_14(%arg0: i32) -> (i32, i32, i32) {
    %c0_i32 = arith.constant 0 : i32
    %c0_i32_0 = arith.constant 0 : i32
    %c0_i32_1 = arith.constant 0 : i32
    return %arg0, %c0_i32, %c0_i32_0 : i32, i32, i32
  }
  func.func @transform_15(%arg0: i32) -> (i32, i32, i32) {
    %c0_i32 = arith.constant 0 : i32
    %c0_i32_0 = arith.constant 0 : i32
    %c0_i32_1 = arith.constant 0 : i32
    return %arg0, %c0_i32, %c0_i32_0 : i32, i32, i32
  }
  func.func @transform_16(%arg0: i32) -> (i32, i32, i32) {
    %c0_i32 = arith.constant 0 : i32
    %c0_i32_0 = arith.constant 0 : i32
    %c0_i32_1 = arith.constant 0 : i32
    return %arg0, %c0_i32, %c0_i32_0 : i32, i32, i32
  }
  func.func @transform_17(%arg0: i32) -> (i32, i32, i32) {
    %c0_i32 = arith.constant 0 : i32
    %c0_i32_0 = arith.constant 0 : i32
    %c0_i32_1 = arith.constant 0 : i32
    return %arg0, %c0_i32, %c0_i32_0 : i32, i32, i32
  }
  func.func @transform_18(%arg0: i32) -> (i32, i32, i32) {
    %c0_i32 = arith.constant 0 : i32
    %c0_i32_0 = arith.constant 0 : i32
    %c0_i32_1 = arith.constant 0 : i32
    return %arg0, %c0_i32, %c0_i32_0 : i32, i32, i32
  }
  func.func @transform_19(%arg0: i32) -> (i32, i32) {
    %c0_i32 = arith.constant 0 : i32
    %c0_i32_0 = arith.constant 0 : i32
    %c0_i32_1 = arith.constant 0 : i32
    return %c0_i32, %c0_i32_0 : i32, i32
  }
  func.func @transform_20(%arg0: i32) -> (i32, i32) {
    %c0_i32 = arith.constant 0 : i32
    %c0_i32_0 = arith.constant 0 : i32
    %c0_i32_1 = arith.constant 0 : i32
    return %c0_i32, %c0_i32_0 : i32, i32
  }
  func.func @transform_21(%arg0: i32) -> (i32, i32) {
    %c0_i32 = arith.constant 0 : i32
    %c0_i32_0 = arith.constant 0 : i32
    %c0_i32_1 = arith.constant 0 : i32
    return %c0_i32, %c0_i32_0 : i32, i32
  }
  func.func @transform_22(%arg0: i32) -> (i32, i32) {
    %c0_i32 = arith.constant 0 : i32
    %c0_i32_0 = arith.constant 0 : i32
    %c0_i32_1 = arith.constant 0 : i32
    return %c0_i32, %c0_i32_0 : i32, i32
  }
}

</mosaic_0001>

<bundles_post_ra>
// kernel: graph_network_forward.3
= control target key start
LH: loop header
LB: loop body
LE: loop exit
PB: predicated region body
PF: predicated region fallthrough
CT: control target
= control target key end

     0   :  { %s759_s0 = inlined_call_operand.vmem [shape: f32[8,4], index: 0, kind: input, shape index: {}]   ;;  %s760_s1 = inlined_call_operand.vmem [shape: f32[8,4], index: 1, kind: input, shape index: {}]   ;;  %s761_s2 = inlined_call_operand.vmem [shape: s32[8,1], index: 2, kind: input, shape index: {}]   ;;  %s762_s3 = inlined_call_operand.vmem [shape: f32[5,32], index: 3, kind: input, shape index: {}]   ;;  %s763_s4 = inlined_call_operand.vmem [shape: f32[16,4], index: 4, kind: input, shape index: {}]   ;;  %s764_s5 = inlined_call_operand.vmem [shape: f32[4,32], index: 5, kind: input, shape index: {}]   ;;  %s765_s6 = inlined_call_operand.vmem [shape: f32[1,32], index: 6, kind: input, shape index: {}]   ;;  %s766_s7 = inlined_call_operand.hbm [shape: f32[32,32], index: 7, kind: input, shape index: {}]   ;;  %s767_s8 = inlined_call_operand.vmem [shape: f32[1,32], index: 8, kind: input, shape index: {}]   ;;  %s768_s9 = inlined_call_operand.vmem [shape: f32[4,32], index: 9, kind: input, shape index: {}]   ;;  %s769_s10 = inlined_call_operand.hbm [shape: f32[32,32], index: 10, kind: input, shape index: {}]   ;;  %s770_s11 = inlined_call_operand.vmem [shape: f32[1,32], index: 11, kind: input, shape index: {}]   ;;  %s771_s12 = inlined_call_operand.hbm [shape: f32[32,32], index: 12, kind: input, shape index: {}]   ;;  %s772_s13 = inlined_call_operand.vmem [shape: f32[1,32], index: 13, kind: input, shape index: {}]   ;;  %s773_s14 = inlined_call_operand.vmem [shape: f32[4,32], index: 14, kind: input, shape index: {}]   ;;  %s774_s15 = inlined_call_operand.vmem [shape: f32[1,32], index: 15, kind: input, shape index: {}]   ;;  %s775_s16 = inlined_call_operand.hbm [shape: f32[32,32], index: 16, kind: input, shape index: {}]   ;;  %s776_s17 = inlined_call_operand.vmem [shape: f32[1,32], index: 17, kind: input, shape index: {}]   ;;  %s777_s18 = inlined_call_operand.vmem [shape: f32[8,32], index: 18, kind: output, shape index: {0}]   ;;  %s778_s19 = inlined_call_operand.vmem [shape: f32[8,32], index: 19, kind: output, shape index: {1}]   ;;  %s779_s20 = inlined_call_operand.vmem [shape: f32[16,32], index: 20, kind: output, shape index: {2}]  }
   0x1   :  { %781 = sst [smem:[#allocation12_spill]] %s759_s0 }
   0x2   :  { %782 = sst [smem:[#allocation13_spill]] %s760_s1 }
   0x3   :  { %783 = sst [smem:[#allocation14_spill]] %s761_s2 }
   0x4   :  { %784 = sst [smem:[#allocation15_spill]] %s762_s3 }
   0x5   :  { %785 = sst [smem:[#allocation16_spill]] %s763_s4 }
   0x6   :  { %26 = vsyncpa [#allocation3], 0 }
   0x7   :  { %27 = vsyncpa [#allocation5], 0 }
   0x8   :  { %28 = vsyncpa [#allocation8], 0  ;;  %s64_s23 = sshll.u32 %s769_s10, 4  ;;  %s561_s24 = smov [#allocation4]   ;;  %s65_s23 = int_to_ptr.hbm [resolvable:$true] %s64_s23 }
   0x9   :  { %s66_s2 = sshll.u32 %s561_s24, 4  ;;  %s47_s26 = sshll.u32 %s766_s7, 4  ;;  %s67_s2 = int_to_ptr.vmem [resolvable:$true] %s66_s2  ;;  %s48_s26 = int_to_ptr.hbm [resolvable:$true] %s47_s26 }
   0xa   :  { %s562_s27 = smov 128   ;;  %s563_s28 = smov 8  }
   0xb   :  { %72 = dma.hbm_to_vmem [thread:$0]  %s65_s23, 512, %s67_s2, [#allocation5], %s562_s27, %s562_s27, %s563_s28  }
   0xc   :  { %s564_s4 = smov [#allocation2]   ;;  %s79_s21 = sshll.u32 %s771_s12, 4  ;;  %s80_s21 = int_to_ptr.hbm [resolvable:$true] %s79_s21 }
   0xd   :  { %s49_s29 = sshll.u32 %s564_s4, 4  ;;  %s98_s22 = sshll.u32 %s775_s16, 4  ;;  %s50_s29 = int_to_ptr.vmem [resolvable:$true] %s49_s29  ;;  %s99_s22 = int_to_ptr.hbm [resolvable:$true] %s98_s22 }
   0xe   :  { %55 = dma.hbm_to_vmem [thread:$0]  %s48_s26, 512, %s50_s29, [#allocation3], %s562_s27, %s562_s27, %s563_s28  }
   0xf   :  { %s565_s24 = smov [#allocation6]   ;;  %s566_s7 = smov [#allocation7]  }
  0x10   :  { %s81_s25 = sshll.u32 %s565_s24, 4  ;;  %s100_s23 = sshll.u32 %s566_s7, 4  ;;  %s82_s25 = int_to_ptr.vmem [resolvable:$true] %s81_s25  ;;  %s101_s23 = int_to_ptr.vmem [resolvable:$true] %s100_s23 }
  0x11   :  { %87 = dma.hbm_to_vmem [thread:$0]  %s80_s21, 512, %s82_s25, [#allocation5], %s562_s27, %s562_s27, %s563_s28  }
  0x12   :  { %106 = dma.hbm_to_vmem [thread:$0]  %s99_s22, 512, %s101_s23, [#allocation8], %s562_s27, %s562_s27, %s563_s28  }
  0x13   :  { %555 = dma.done.wait [#allocation3], 512  }
  0x14   :  { %556 = vsyncadd [#allocation3], 4294966784 }
  0x15   :  { %557 = dma.done.wait [#allocation5], 1024  }
  0x16   :  { %558 = vsyncadd [#allocation5], 4294966272 }
  0x17   :  { %559 = dma.done.wait [#allocation8], 512  }
  0x18   :  { %560 = vsyncadd [#allocation8], 4294966784  ;;  %v567_v0 = vmov 0   ;;  %vm135_vm0 = vcmask 1043456   ;;  %s786_s2 = sld [smem:[#allocation14_spill]]  ;;  %vm131_vm1 = vcmask 31744   ;;  %v196_v6 = vlaneseq }
  0x19   :  { %452 = vset.pattern.permute.xlu0 %v567_v0  ;;  %v126_v2 = vld [vmem:[%s764_s5] sm:$0xf]  ;;  %s787_s4 = sld [smem:[#allocation12_spill]]  ;;  %vm208_vm2 = vcmask 1044480   ;;  %v165_v5 = vld [vmem:[#allocation2 + $0x18] sm:$0xff]  ;;  %vm204_vm3 = vcmask 39936  }
  0x1a   :  { %426 = vmatpush.msk.msra.mxu0 %vm135_vm0, %v126_v2  ;;  %s788_s0 = sld [smem:[#allocation15_spill]]  ;;  %v197_v7 = vand.u32 127, %v196_v6  ;;  %v568_v9 = vmov 0.0   ;;  %v164_v11 = vld [vmem:[#allocation2 + $0x10] sm:$0xff]  ;;  %v163_v12 = vld [vmem:[#allocation2 + $0x8] sm:$0xff]  ;;  %v237_v13 = vld [vmem:[#allocation4 + $0x18] sm:$0xff] }
  0x1b   :  { %253 = vmatpush.msra.mxu3 %v237_v13  ;;  %v236_v14 = vld [vmem:[#allocation4 + $0x10] sm:$0xff]  ;;  %v162_v15 = vld [vmem:[#allocation2] sm:$0xff]  ;;  %v235_v16 = vld [vmem:[#allocation4 + $0x8] sm:$0xff]  ;;  %s789_s25 = sld [smem:[#allocation16_spill]]  ;;  %vm170_vm6 = vcmask 261120  }
  0x1c   :  { %186 = vmatpush.msrb.mxu0 %v165_v5  ;;  %v329_v17 = vld [vmem:[%s773_s14] sm:$0xf]  ;;  %v375_v29 = vld [vmem:[#allocation7 + $0x18] sm:$0xff]  ;;  %v374_v32 = vld [vmem:[#allocation7 + $0x10] sm:$0xff] }
  0x1d   :  { %254 = vmatpush.msra.mxu3 %v236_v14  ;;  %v233_v18 = vld [vmem:[%s768_s9] sm:$0xf]  ;;  %435 = vmatpush.msk.msra.mxu1 %vm135_vm0, %v329_v17  ;;  %v373_v34 = vld [vmem:[#allocation7 + $0x8] sm:$0xff]  ;;  %v298_v41 = vld [vmem:[#allocation6 + $0x18] sm:$0xff] }
  0x1e   :  { %v195_v1 = vld [vmem:[%s786_s2] sm:$0xff]  ;;  %187 = vmatpush.msrb.mxu0 %v164_v11  ;;  %s790_s2 = sld [smem:[#allocation13_spill]]  ;;  %v297_v44 = vld [vmem:[#allocation6 + $0x10] sm:$0xff]  ;;  %v296_v46 = vld [vmem:[#allocation6 + $0x8] sm:$0xff] }
  0x1f   :  { %199 = vperm.xlu0 %452, %v195_v1   ;;  %v125_v3 = vld [vmem:[%s787_s4] sm:$0xff]  ;;  %255 = vmatpush.msra.mxu3 %v235_v16 }
  0x20   :  { %427 = vmatmul.msk.f32.vlgmr.msra.gmra.mxu0 %vm131_vm1, %v125_v3  ;;  %v203_v4 = vld [vmem:[%s788_s0] sm:$0x1f]  ;;  %398 = vmatpush.msrb.mxu1 %v375_v29 }
  0x21   :  { %429 = vmatpush.msk.msra.mxu2 %vm208_vm2, %v203_v4  ;;  %188 = vmatpush.msrb.mxu0 %v163_v12  ;;  %v327_v19 = vld [vmem:[%s789_s25] sm:$0xff]  ;;  %v328_v26 = vld [vmem:[%s789_s25 + $0x8] sm:$0xff] }
  0x22   :  { %436 = vmatmul.msk.f32.vlgmr.msra.gmra.mxu1 %vm131_vm1, %v327_v19  ;;  %v453_v20 = vld [vmem:[%s765_s6] ss:$0 sm:$0xff] }
  0x23   :  { %189 = vmatpush.msrb.mxu0 %v162_v15  ;;  %v234_v25 = vld [vmem:[#allocation4] sm:$0xff]  ;;  %399 = vmatpush.msrb.mxu1 %v374_v32 }
  0x24   :  { %256 = vmatpush.msra.mxu3 %v234_v25  ;;  %v232_v27 = vld [vmem:[%s790_s2] sm:$0xff]  ;;  %318 = vmatpush.msrb.mxu2 %v298_v41 }
  0x25   :  { %432 = vmatpush.msk.msra.mxu0 %vm135_vm0, %v233_v18  ;;  %v455_v30 = vld [vmem:[%s774_s15] ss:$0 sm:$0xff]  ;;  %400 = vmatpush.msrb.mxu1 %v373_v34 }
  0x26   :  { %440 = vmatpush.msrb.mxu3 %v375_v29  ;;  %v372_v36 = vld [vmem:[#allocation7] sm:$0xff]  ;;  %319 = vmatpush.msrb.mxu2 %v297_v44 }
  0x27   :  { %401 = vmatpush.msrb.mxu1 %v372_v36  ;;  %v454_v38 = vld [vmem:[%s767_s8] ss:$0 sm:$0xff] }
  0x28   :  { %441 = vmatpush.msrb.mxu3 %v374_v32  ;;  %320 = vmatpush.msrb.mxu2 %v296_v46  ;;  %v295_v47 = vld [vmem:[#allocation6] sm:$0xff] }
  0x29   :  { %v456_v50 = vld [vmem:[%s770_s11] ss:$0 sm:$0xff] }
  0x2a   :  { %437 = vmatmul.msk.f32.gmra.mxu1 %vm131_vm1, %v328_v26  ;;  %442 = vmatpush.msrb.mxu3 %v373_v34  ;;  %v457_v56 = vld [vmem:[%s776_s17] ss:$0 sm:$0xff] }
  0x2b   :  { %321 = vmatpush.msrb.mxu2 %v295_v47  ;;  %v458_v61 = vld [vmem:[%s772_s13] ss:$0 sm:$0xff] }
  0x2c   :  { %443 = vmatpush.msrb.mxu3 %v372_v36 }
  0x91   :  { %v200_v8 = vpop.permute.xlu0 %199 }
  0x92   :  { %vm201_vm4 = vcmp.eq.s32.totalorder %v197_v7, %v200_v8 }
  0x93   :  { %v202_v10 = vsel %vm201_vm4, 1.0, %v568_v9 }
  0x94   :  { %430 = vmatmul.msk.f32.vlgmr.msra.gmra.mxu2 %vm204_vm3, %v202_v10 }
  0x9d   :  { %v156_v21 = vpop.f32.mrf.mxu0 }
  0x9e   :  { %v157_v22 = vadd.f32 %v453_v20, %v156_v21 }
  0x9f   :  { %v360_v31 = vpop.f32.mrf.mxu1 }
  0xa0   :  { %vm159_vm5 = vcmp.ge.f32.partialorder %v157_v22, 0.0  ;;  %v160_v23 = vmul.f32 0.2, %v157_v22  ;;  %v361_v33 = vadd.f32 %v455_v30, %v360_v31 }
  0xa2   :  { %v161_v24 = vsel %vm159_vm5, %v157_v22, %v160_v23  ;;  %vm366_vm7 = vcmp.ge.f32.partialorder %v361_v33, 0.0  ;;  %v368_v35 = vmul.f32 0.2, %v361_v33 }
  0xa3   :  { %428 = vmatmul.msk.f32.vlgmr.msrb.gmra.mxu0 %vm170_vm6, %v161_v24 }
  0xa4   :  { %v370_v37 = vsel %vm366_vm7, %v361_v33, %v368_v35 }
  0xa5   :  { %438 = vmatmul.msk.f32.vlgmr.msrb.gmra.mxu1 %vm170_vm6, %v370_v37 }
  0xa7   :  { %v363_v42 = vpop.f32.mrf.mxu1 }
  0xa8   :  { %v364_v43 = vadd.f32 %v455_v30, %v363_v42 }
  0xaa   :  { %v369_v45 = vmul.f32 0.2, %v364_v43  ;;  %vm367_vm8 = vcmp.ge.f32.partialorder %v364_v43, 0.0 }
  0xab   :  { %433 = vmatmul.msk.f32.vlgmr.msra.gmra.mxu0 %vm131_vm1, %v232_v27 }
  0xac   :  { %v371_v48 = vsel %vm367_vm8, %v364_v43, %v369_v45 }
 0x117   :  { %v229_v28 = vpop.f32.mrf.mxu2 }
 0x118   :  { %431 = vmatmul.msk.f32.vlgmr.msra.gmra.mxu3 %vm170_vm6, %v229_v28 }
 0x120   :  { %v191_v39 = vpop.f32.mrf.mxu0  ;;  %439 = vmatmul.msk.f32.vlgmr.msrb.gmra.mxu3 %vm170_vm6, %v371_v48 }
 0x121   :  { %v192_v40 = vadd.f32 %v454_v38, %v191_v39 }
 0x122   :  { %v403_v57 = vpop.f32.mrf.mxu1 }
 0x123   :  { %194 = vst.msk [vmem:[%s777_s18] sm:$0xff] %vm170_vm6, %v192_v40  ;;  %v404_v58 = vadd.f32 %v457_v56, %v403_v57 }
 0x125   :  { %409 = vst.msk [vmem:[%s779_s20] sm:$0xff] %vm170_vm6, %v404_v58 }
 0x128   :  { %v284_v49 = vpop.f32.mrf.mxu0 }
 0x19b   :  { %v258_v51 = vpop.f32.mrf.mxu3 }
 0x19c   :  { %v285_v52 = vadd.f32 %v284_v49, %v258_v51 }
 0x19e   :  { %v291_v53 = vadd.f32 %v456_v50, %v285_v52 }
 0x1a0   :  { %v293_v54 = vmul.f32 0.2, %v291_v53  ;;  %vm292_vm9 = vcmp.ge.f32.partialorder %v291_v53, 0.0 }
 0x1a2   :  { %v294_v55 = vsel %vm292_vm9, %v291_v53, %v293_v54 }
 0x1a3   :  { %434 = vmatmul.msk.f32.vlgmr.msrb.gmra.mxu2 %vm170_vm6, %v294_v55  ;;  %v406_v59 = vpop.f32.mrf.mxu3 }
 0x1a4   :  { %v407_v60 = vadd.f32 %v457_v56, %v406_v59 }
 0x1a6   :  { %410 = vst.msk [vmem:[%s779_s20 + $0x8] sm:$0xff] %vm170_vm6, %v407_v60 }
 0x226   :  { %v323_v62 = vpop.f32.mrf.mxu2 }
 0x227   :  { %v324_v63 = vadd.f32 %v458_v61, %v323_v62 }
 0x229   :  { %326 = vst.msk [vmem:[%s778_s19] sm:$0xff] %vm170_vm6, %v324_v63 }
 0x22a   :  { %423 = vsyncpa [#allocation3], 1 }
 0x22b   :  { %424 = vsyncpa [#allocation5], 1 }
 0x22c   :  { %425 = vsyncpa [#allocation8], 1 }

// kernel: graph_network_forward.5
= control target key start
LH: loop header
LB: loop body
LE: loop exit
PB: predicated region body
PF: predicated region fallthrough
CT: control target
= control target key end

     0   :  { %21 = vsyncpa [#allocation3], 0  ;;  %s457_s0 = inlined_call_operand.vmem [shape: f32[8,32], index: 0, kind: input, shape index: {}]   ;;  %s458_s1 = inlined_call_operand.vmem [shape: f32[8,32], index: 1, kind: input, shape index: {}]   ;;  %s459_s2 = inlined_call_operand.vmem [shape: f32[8,32], index: 2, kind: input, shape index: {}]   ;;  %s460_s3 = inlined_call_operand.vmem [shape: f32[8,32], index: 3, kind: input, shape index: {}]   ;;  %s461_s4 = inlined_call_operand.vmem [shape: f32[16,32], index: 4, kind: input, shape index: {}]   ;;  %s462_s5 = inlined_call_operand.vmem [shape: f32[16,32], index: 5, kind: input, shape index: {}]   ;;  %s463_s6 = inlined_call_operand.vmem [shape: f32[1,16], index: 6, kind: input, shape index: {}]   ;;  %s464_s7 = inlined_call_operand.vmem [shape: f32[1,16], index: 7, kind: input, shape index: {}]   ;;  %s465_s8 = inlined_call_operand.vmem [shape: f32[32,32], index: 8, kind: input, shape index: {}]   ;;  %s466_s9 = inlined_call_operand.vmem [shape: f32[1,32], index: 9, kind: input, shape index: {}]   ;;  %s467_s10 = inlined_call_operand.vmem [shape: f32[32,128], index: 10, kind: input, shape index: {}]   ;;  %s468_s11 = inlined_call_operand.vmem [shape: f32[1,128], index: 11, kind: input, shape index: {}]   ;;  %s469_s12 = inlined_call_operand.hbm [shape: f32[8,32], index: 12, kind: output, shape index: {0}]   ;;  %s470_s13 = inlined_call_operand.hbm [shape: f32[8,32], index: 13, kind: output, shape index: {1}]   ;;  %s471_s14 = inlined_call_operand.vmem [shape: f32[16,128], index: 14, kind: output, shape index: {2}]   ;;  %s472_s15 = inlined_call_operand.hbm [shape: f32[1,16], index: 15, kind: output, shape index: {3}]  }
   0x1   :  { %v70_v0 = vld [vmem:[%s465_s8 + $0x18] sm:$0xff]  ;;  %v69_v1 = vld [vmem:[%s465_s8 + $0x10] sm:$0xff]  ;;  %v68_v2 = vld [vmem:[%s465_s8 + $0x8] sm:$0xff] }
   0x2   :  { %204 = vmatpush.msra.mxu2 %v70_v0  ;;  %v62_v3 = vld [vmem:[%s461_s4 + $0x8] sm:$0xff]  ;;  %93 = vmatpush.msra.mxu0 %v70_v0  ;;  %v61_v5 = vld [vmem:[%s461_s4] sm:$0xff]  ;;  %v113_v7 = vld [vmem:[%s467_s10 + $0x18] sm:$0xff] }
   0x3   :  { %v64_v4 = vld [vmem:[%s462_s5 + $0x8] sm:$0xff]  ;;  %v63_v6 = vld [vmem:[%s462_s5] sm:$0xff]  ;;  %208 = vmatpush.msra.mxu3 %v113_v7  ;;  %136 = vmatpush.msra.mxu1 %v113_v7 }
   0x4   :  { %205 = vmatpush.msra.mxu2 %v69_v1  ;;  %94 = vmatpush.msra.mxu0 %v69_v1  ;;  %v67_v8 = vld [vmem:[%s465_s8] sm:$0xff]  ;;  %v66_v9 = vadd.f32 %v64_v4, %v62_v3  ;;  %v65_v10 = vadd.f32 %v63_v6, %v61_v5 }
   0x5   :  { %22 = vsyncpa [#allocation5], 0  ;;  %vm50_vm0 = vcmask 261120   ;;  %v112_v11 = vld [vmem:[%s467_s10 + $0x10] sm:$0xff]  ;;  %v111_v12 = vld [vmem:[%s467_s10 + $0x8] sm:$0xff]  ;;  %s294_s29 = smov [#allocation2]  }
   0x6   :  { %206 = vmatpush.msra.mxu2 %v68_v2  ;;  %95 = vmatpush.msra.mxu0 %v68_v2  ;;  %v110_v13 = vld [vmem:[%s467_s10] sm:$0xff]  ;;  %s293_s10 = smov [#allocation4]   ;;  %s154_s30 = sshll.u32 %s294_s29, 4  ;;  %vm59_vm3 = vcmask 122880   ;;  %s155_s30 = int_to_ptr.vmem [resolvable:$true] %s154_s30 }
   0x7   :  { %209 = vmatpush.msra.mxu3 %v112_v11  ;;  %137 = vmatpush.msra.mxu1 %v112_v11  ;;  %v215_v14 = vld [vmem:[%s466_s9] ss:$0 sm:$0xff]  ;;  %s165_s26 = sshll.u32 %s293_s10, 4  ;;  %s167_s9 = sshll.u32 %s470_s13, 4  ;;  %s166_s26 = int_to_ptr.vmem [resolvable:$true] %s165_s26  ;;  %s168_s9 = int_to_ptr.hbm [resolvable:$true] %s167_s9 }
   0x8   :  { %207 = vmatpush.msra.mxu2 %v67_v8  ;;  %96 = vmatpush.msra.mxu0 %v67_v8  ;;  %s156_s18 = sshll.u32 %s469_s12, 4  ;;  %v52_v23 = vld [vmem:[%s459_s2] sm:$0xff]  ;;  %s295_s8 = smov [#allocation6]   ;;  %s157_s18 = int_to_ptr.hbm [resolvable:$true] %s156_s18 }
   0x9   :  { %201 = vmatmul.msk.f32.vlgmr.msra.gmra.mxu2 %vm50_vm0, %v66_v9  ;;  %200 = vmatmul.msk.f32.vlgmr.msra.gmra.mxu0 %vm50_vm0, %v65_v10  ;;  %v53_v24 = vld [vmem:[%s460_s3] sm:$0xff]  ;;  %s178_s21 = sshll.u32 %s295_s8, 4  ;;  %s180_s13 = sshll.u32 %s472_s15, 4  ;;  %s179_s21 = int_to_ptr.vmem [resolvable:$true] %s178_s21  ;;  %s181_s13 = int_to_ptr.hbm [resolvable:$true] %s180_s13 }
   0xa   :  { %210 = vmatpush.msra.mxu3 %v111_v12  ;;  %138 = vmatpush.msra.mxu1 %v111_v12  ;;  %v54_v25 = vadd.f32 %v53_v24, %v52_v23  ;;  %v47_v26 = vld [vmem:[%s457_s0] sm:$0xff] }
   0xb   :  { %v48_v27 = vld [vmem:[%s458_s1] sm:$0xff] }
   0xc   :  { %211 = vmatpush.msra.mxu3 %v110_v13  ;;  %139 = vmatpush.msra.mxu1 %v110_v13  ;;  %v56_v28 = vld [vmem:[%s463_s6] sm:$0x1]  ;;  %v49_v29 = vadd.f32 %v48_v27, %v47_v26  ;;  %55 = vst.msk [vmem:[#allocation4] sm:$0xff] %vm50_vm0, %v54_v25 }
   0xd   :  { %v57_v30 = vld [vmem:[%s464_s7] sm:$0x1]  ;;  %170 = dma.vmem_to_hbm [thread:$0]  %s166_s26, 128, %s168_s9, [#allocation5]  }
   0xe   :  { %v58_v31 = vadd.f32 %v57_v30, %v56_v28  ;;  %51 = vst.msk [vmem:[#allocation2] sm:$0xff] %vm50_vm0, %v49_v29  ;;  %v216_v32 = vld [vmem:[%s468_s11] ss:$0 sm:$0xff] }
   0xf   :  { %159 = dma.vmem_to_hbm [thread:$0]  %s155_s30, 128, %s157_s18, [#allocation3]  }
  0x10   :  { %60 = vst.msk [vmem:[#allocation6] sm:$0x1] %vm59_vm3, %v58_v31 }
  0x11   :  { %183 = dma.vmem_to_hbm [thread:$0]  %s179_s21, 16, %s181_s13, [#allocation5]  }
  0x86   :  { %v98_v15 = vpop.f32.mrf.mxu0 }
  0x87   :  { %v99_v16 = vadd.f32 %v215_v14, %v98_v15 }
  0x89   :  { %v106_v17 = vmul.f32 0.2, %v99_v16  ;;  %vm104_vm1 = vcmp.ge.f32.partialorder %v99_v16, 0.0 }
  0x8b   :  { %v108_v18 = vsel %vm104_vm1, %v99_v16, %v106_v17 }
  0x8c   :  { %v101_v19 = vpop.f32.mrf.mxu2  ;;  %202 = vmatmul.msk.f32.vlgmr.msra.gmra.mxu1 %vm50_vm0, %v108_v18 }
  0x8d   :  { %v102_v20 = vadd.f32 %v215_v14, %v101_v19 }
  0x8f   :  { %v107_v21 = vmul.f32 0.2, %v102_v20  ;;  %vm105_vm2 = vcmp.ge.f32.partialorder %v102_v20, 0.0 }
  0x91   :  { %v109_v22 = vsel %vm105_vm2, %v102_v20, %v107_v21 }
  0x92   :  { %203 = vmatmul.msk.f32.vlgmr.msra.gmra.mxu3 %vm50_vm0, %v109_v22 }
 0x109   :  { %v141_v33 = vpop.f32.mrf.mxu1 }
 0x10a   :  { %v142_v34 = vadd.f32 %v216_v32, %v141_v33 }
 0x10c   :  { %147 = vst [vmem:[%s471_s14] sm:$0xff] %v142_v34 }
 0x115   :  { %v144_v35 = vpop.f32.mrf.mxu3 }
 0x116   :  { %v145_v36 = vadd.f32 %v216_v32, %v144_v35 }
 0x118   :  { %148 = vst [vmem:[%s471_s14 + $0x8] sm:$0xff] %v145_v36 }
 0x119   :  { %289 = dma.done.wait [#allocation3], 128  }
 0x11a   :  { %290 = vsyncadd [#allocation3], 4294967168 }
 0x11b   :  { %291 = dma.done.wait [#allocation5], 144  }
 0x11c   :  { %292 = vsyncadd [#allocation5], 4294967152 }
 0x11d   :  { %198 = vsyncpa [#allocation3], 1 }
 0x11e   :  { %199 = vsyncpa [#allocation5], 1 }

// kernel: graph_network_forward.4
= control target key start
LH: loop header
LB: loop body
LE: loop exit
PB: predicated region body
PF: predicated region fallthrough
CT: control target
= control target key end

     0   :  { %s3614_s0 = inlined_call_operand.vmem [shape: s32[16,1], index: 0, kind: input, shape index: {}]   ;;  %s3615_s1 = inlined_call_operand.vmem [shape: s32[16,1], index: 1, kind: input, shape index: {}]   ;;  %s3616_s2 = inlined_call_operand.vmem [shape: f32[8,1], index: 2, kind: input, shape index: {}]   ;;  %s3617_s3 = inlined_call_operand.vmem [shape: f32[8,32], index: 3, kind: input, shape index: {}]   ;;  %s3618_s4 = inlined_call_operand.vmem [shape: f32[8,32], index: 4, kind: input, shape index: {}]   ;;  %s3619_s5 = inlined_call_operand.vmem [shape: f32[16,32], index: 5, kind: input, shape index: {}]   ;;  %s3620_s6 = inlined_call_operand.vmem [shape: f32[1,16], index: 6, kind: input, shape index: {}]   ;;  %s3621_s7 = inlined_call_operand.vmem [shape: f32[2,96,32], index: 7, kind: input, shape index: {}]   ;;  %s3622_s8 = inlined_call_operand.vmem [shape: f32[2,64,64], index: 8, kind: input, shape index: {}]   ;;  %s3623_s9 = inlined_call_operand.vmem [shape: f32[2,64,64], index: 9, kind: input, shape index: {}]   ;;  %s3624_s10 = inlined_call_operand.hbm [shape: f32[2,304,304], index: 10, kind: input, shape index: {}]   ;;  %s3625_s11 = inlined_call_operand.vmem [shape: f32[2,304,32], index: 11, kind: input, shape index: {}]   ;;  %s3626_s12 = inlined_call_operand.vmem [shape: f32[2,64,64], index: 12, kind: input, shape index: {}]   ;;  %s3627_s13 = inlined_call_operand.vmem [shape: f32[2,64,64], index: 13, kind: input, shape index: {}]   ;;  %s3628_s14 = inlined_call_operand.vmem [shape: f32[2,112,112], index: 14, kind: input, shape index: {}]   ;;  %s3629_s15 = inlined_call_operand.vmem [shape: f32[2,112,32], index: 15, kind: input, shape index: {}]   ;;  %s3630_s16 = inlined_call_operand.vmem [shape: f32[2,80,80], index: 16, kind: input, shape index: {}]   ;;  %s3631_s17 = inlined_call_operand.vmem [shape: f32[2,80,16], index: 17, kind: input, shape index: {}]   ;;  %s3632_s18 = inlined_call_operand.vmem [shape: f32[2,16,384], index: 18, kind: input, shape index: {}]   ;;  %s3633_s19 = inlined_call_operand.vmem [shape: f32[8,32], index: 19, kind: output, shape index: {0}]   ;;  %s3634_s20 = inlined_call_operand.vmem [shape: f32[8,32], index: 20, kind: output, shape index: {1}]   ;;  %s3635_s21 = inlined_call_operand.vmem [shape: f32[16,32], index: 21, kind: output, shape index: {2}]   ;;  %s3636_s22 = inlined_call_operand.vmem [shape: f32[1,16], index: 22, kind: output, shape index: {3}]  }
   0x1   :  { %3648 = sst [smem:[#allocation8_spill]] %s3614_s0 }
   0x2   :  { %3649 = sst [smem:[#allocation9_spill]] %s3615_s1 }
   0x3   :  { %3650 = sst [smem:[#allocation10_spill]] %s3616_s2 }
   0x4   :  { %3651 = sst [smem:[#allocation11_spill]] %s3617_s3 }
   0x5   :  { %3652 = sst [smem:[#allocation12_spill]] %s3618_s4 }
   0x6   :  { %3653 = sst [smem:[#allocation13_spill]] %s3619_s5 }
   0x7   :  { %3654 = sst [smem:[#allocation14_spill]] %s3620_s6 }
   0x8   :  { %3655 = sst [smem:[#allocation15_spill]] %s3621_s7 }
   0x9   :  { %3656 = sst [smem:[#allocation16_spill]] %s3622_s8 }
   0xa   :  { %3657 = sst [smem:[#allocation17_spill]] %s3623_s9 }
   0xb   :  { %3658 = sst [smem:[#allocation18_spill]] %s3624_s10 }
   0xc   :  { %3659 = sst [smem:[#allocation19_spill]] %s3625_s11 }
   0xd   :  { %3660 = sst [smem:[#allocation20_spill]] %s3626_s12 }
   0xe   :  { %3661 = sst [smem:[#allocation21_spill]] %s3627_s13 }
   0xf   :  { %3662 = sst [smem:[#allocation22_spill]] %s3628_s14 }
  0x10   :  { %3663 = sst [smem:[#allocation23_spill]] %s3629_s15 }
  0x11   :  { %3664 = sst [smem:[#allocation24_spill]] %s3630_s16 }
  0x12   :  { %3665 = sst [smem:[#allocation25_spill]] %s3633_s19 }
  0x13   :  { %3666 = sst [smem:[#allocation26_spill]] %s3634_s20 }
  0x14   :  { %3667 = sst [smem:[#allocation27_spill]] %s3635_s21 }
  0x15   :  { %3668 = sst [smem:[#allocation28_spill]] %s3636_s22 }
  0x16   :  { %28 = vsyncpa [#allocation3], 0 }
  0x17   :  { %30 = vsyncpa [#allocation3 + $0x1], 0  ;;  %s2946_s3 = smov 0   ;;  %s2948_s28 = smov 0  }
  0x18   :  { %s2950_s29 = smov 0   ;;  %s2952_s30 = smov 0  }
  0x19 LB: > { %3669 = sst [smem:[#allocation5_spill]] %s2814_s29  ;;  %s2965_s4 = sadd.s32 4294967295, %s2818_s30   ;;  %s2818_s30 = sphi %s2952_s30, %s3703_s30   ;;  %s2814_s29 = sphi %s2950_s29, %s3705_s29   ;;  %s2810_s28 = sphi %s2948_s28, %s3707_s28   ;;  %s2806_s3 = sphi %s2946_s3, %s3706_s3  }
  0x1a   : > { %s2968_s0 = sadd.s32 1, %s2818_s30   ;;  %s268_s1 = sadd.s32 1, %s2814_s29 }
  0x1b   : > { %3670 = sst [smem:[#allocation6_spill]] %s2968_s0  ;;  %s265_s23 = ssub.s32 %s2818_s30, %s2968_s0 }
  0x1c   : > { %p266_p0 = scmp.eq.s32.totalorder %s265_s23, 0  ;;  %p275_p1 = scmp.ne.s32.totalorder %s2814_s29, %s2810_s28 }
  0x1d   : > { %p276_p2 = scmp.eq.s32.totalorder %s2818_s30, 0  ;;  %p281_p3 = scmp.ne.s32.totalorder %s2810_s28, %s2806_s3 }
  0x1e   : > { %s2978_s5 = scalar_select %p266_p0, %s2814_s29, %s268_s1  }
  0x1f   : > { %p277_p4 = por %p276_p2, %p275_p1  ;;  %p282_p5 = scmp.eq.s32.totalorder %s2965_s4, 0 }
  0x20   : > { %3671 = sst [smem:[#allocation7_spill]] %s2978_s5  ;;  %p2675_p6 = scmp.lt.s32.totalorder %s2818_s30, 2 }
  0x21   : > { %p2982_p7 = por %p282_p5, %p281_p3  ;;  %s642_s6 = sand.u32 1, %s2814_s29  }
  0x22   : > { %s2661_s25 = smul.u32 912, %s642_s6  ;;  %p2988_p8 = pnand %p2675_p6, %p277_p4 }
  0x23   : > { %s2662_s26 = smul.u32 912, %s2818_s30  ;;  %s3674_s10 = sld [smem:[#allocation18_spill]] }
  0x24   : > { %s646_s1 = scalar_lea.vmem [#allocation2], %s2661_s25  ;;  %p2605_p9 = scmp.ge.s32.totalorder %s2818_s30, 1 }
  0x25   : > { %s654_s5 = sshll.u32 %s646_s1, 4  ;;  %s643_s22 = scalar_lea.sflag [#allocation3], %s642_s6  ;;  %s655_s5 = int_to_ptr.vmem [resolvable:$true] %s654_s5 }
  0x26   : > { %p2758_p11 = pneg %p2988_p8 }
  0x29   : > { %s651_s3 = scalar_lea.hbm %s3674_s10, %s2662_s26  ;;  %s2761_s27 = scalar_lea.hbm %s3674_s10, 1824 }
  0x2a   : > { %s652_s0 = sshll.u32 %s651_s3, 4  ;;  %s653_s0 = int_to_ptr.hbm [resolvable:$true] %s652_s0 }
  0x2b   : > { %s2754_s21 = sshra.s32 %s653_s0, 4  ;;  %s2755_s21 = int_to_ptr.hbm [resolvable:$true] %s2754_s21 }
  0x2c   : > { %s2756_s29 = scalar_lea.hbm %s2755_s21, 912  ;;  %p2762_p0 = scmp.lt.s32.totalorder %s2755_s21, %s3674_s10 }
  0x2d   : > { %p2757_p10 = scmp.ne.s32.totalorder %s2755_s21, %s2756_s29  ;;  %p2763_p1 = scmp.lt.s32.totalorder %s2761_s27, %s2756_s29 }
  0x2f   : > { %p2759_p12 = pnand %p2758_p11, %p2757_p10  ;;  %p2764_p2 = por %p2763_p1, %p2762_p0 }
  0x31   : > { %p2760_p13 = pneg %p2759_p12 }
  0x33   : > { %p2765_p3 = pnand %p2764_p2, %p2760_p13 }
  0x35   : > { %2768 = shalt.err (!%p2765_p3)
}
  0x36   : > { %s2820_s6 = smov 384   ;;  %s2821_s23 = smov 24  }
  0x37   : > { %2674 = dma.hbm_to_vmem [thread:$0]  (!%p2988_p8), %s653_s0, 14592, %s655_s5, %s643_s22, %s2820_s6, %s2820_s6, %s2821_s23  }
  0x38   : > { %p726_p4 = scmp.lt.s32.totalorder %s2818_s30, 3 }
  0x3a   : > { %p727_p5 = pnand %p2605_p9, %p726_p4 }
  0x3b   : > { %s732_s19 = sand.u32 (!%p727_p5), 1, %s2810_s28  }
  0x3c   : > { %730 = sbr.rel (%p727_p5) target bundleno = 3787 (0xecb), region = 96  ;;  %s733_s21 = scalar_lea.sflag (!%p727_p5), [#allocation3], %s732_s19 }
  0x3d   : > { %s2663_s20 = smul.u32 (!%p727_p5), 912, %s732_s19 }
  0x3f   : > { %s3010_s29 = scalar_lea.vmem (!%p727_p5), [#allocation2], %s2663_s20 }
  0x41   : > { %2801 = dma.done.wait (%p2982_p7), %s733_s21, 14592  }
  0x42   : > { %2803 = vsyncadd (%p2982_p7), %s733_s21, 4294952704  ;;  %p848_p6 = scmp.lt.s32.totalorder %s2965_s4, 1  ;;  %s3675_s8 = sld [smem:[#allocation16_spill]] }
  0x43   : > { %s3676_s9 = sld [smem:[#allocation17_spill]]  ;;  %p2621_p7 = scmp.ne.s32.totalorder %s2965_s4, 0 }
  0x44   : > { %s849_s22 = scalar_select %p848_p6, %s2965_s4, 1 }
  0x45   : > { %s3677_s7 = sld [smem:[#allocation15_spill]] }
  0x46   : > { %s2664_s0 = smul.u32 96, %s849_s22  ;;  %s2657_s30 = sshll.u32 %s849_s22, 6 }
  0x47   : > { %s2665_s23 = smul.u32 304, %s849_s22  ;;  %s3678_s12 = sld [smem:[#allocation20_spill]] }
  0x48   : > { %s3021_s3 = scalar_lea.vmem %s3675_s8, %s2657_s30  ;;  %s3679_s13 = sld [smem:[#allocation21_spill]] }
  0x49   : > { %s3026_s26 = scalar_lea.vmem %s3676_s9, %s2657_s30  ;;  %s3680_s11 = sld [smem:[#allocation19_spill]] }
  0x4a   : > { %s2666_s9 = smul.u32 112, %s849_s22  ;;  %s3681_s14 = sld [smem:[#allocation22_spill]] }
  0x4b   : > { %s3031_s24 = scalar_lea.vmem %s3677_s7, %s2664_s0  ;;  %s2667_s25 = smul.u32 80, %s849_s22 }
  0x4c   : > { %s3682_s15 = sld [smem:[#allocation23_spill]] }
  0x4d   : > { %s3036_s21 = scalar_lea.vmem %s3678_s12, %s2657_s30  ;;  %s3683_s16 = sld [smem:[#allocation24_spill]] }
  0x4e   : > { %s3041_s2 = scalar_lea.vmem %s3679_s13, %s2657_s30  ;;  %s3066_s1 = scalar_lea.vmem %s3631_s17, %s2667_s25 }
  0x4f   : > { %s3046_s27 = scalar_lea.vmem %s3680_s11, %s2665_s23  ;;  %s2668_s11 = smul.u32 48, %s849_s22 }
  0x50   : > { %s3051_s7 = scalar_lea.vmem %s3681_s14, %s2666_s9  ;;  %907 = sbr.rel (%p2621_p7) target bundleno = 96 (0x60), region = 104 }
  0x51   : > { %s3071_s6 = scalar_lea.vmem %s3632_s18, %s2668_s11  ;;  %s3684_s20 = sld [smem:[#allocation11_spill]] (!%p2621_p7) }
  0x52   : > { %s3056_s12 = scalar_lea.vmem %s3682_s15, %s2666_s9  ;;  %s3685_s14 = sld [smem:[#allocation12_spill]] (!%p2621_p7) }
  0x53   : > { %s3061_s5 = scalar_lea.vmem %s3683_s16, %s2667_s25  ;;  %s3686_s22 = sld [smem:[#allocation13_spill]] (!%p2621_p7) }
  0x54   : > { %s3687_s11 = sld [smem:[#allocation25_spill]] (!%p2621_p7) }
  0x55   : > { %vm909_vm0 = vcmask 261120   ;;  %s3688_s19 = sld [smem:[#allocation26_spill]]  ;;  %vm918_vm1 = vcmask 122880  }
  0x56   : > { %s3689_s10 = sld [smem:[#allocation14_spill]] }
  0x57   : > { %v908_v0 = vld [vmem:[%s3684_s20] sm:$0xff]  ;;  %s3690_s25 = sld [smem:[#allocation27_spill]] }
  0x58   : > { %v911_v1 = vld [vmem:[%s3685_s14] sm:$0xff]  ;;  %s3691_s0 = sld [smem:[#allocation28_spill]] }
  0x59   : > { %v913_v2 = vld [vmem:[%s3686_s22] sm:$0xff]  ;;  %v914_v3 = vld [vmem:[%s3686_s22 + $0x8] sm:$0xff] }
  0x5a   : > { %910 = vst.msk [vmem:[%s3687_s11] sm:$0xff] %vm909_vm0, %v908_v0 }
  0x5b   : > { %912 = vst.msk [vmem:[%s3688_s19] sm:$0xff] %vm909_vm0, %v911_v1 }
  0x5c   : > { %v917_v4 = vld [vmem:[%s3689_s10] sm:$0x1] }
  0x5d   : > { %915 = vst.msk [vmem:[%s3690_s25] sm:$0xff] %vm909_vm0, %v913_v2 }
  0x5e   : > { %916 = vst.msk [vmem:[%s3690_s25 + $0x8] sm:$0xff] %vm909_vm0, %v914_v3 }
  0x5f   : > { %919 = vst.msk [vmem:[%s3691_s0] sm:$0x1] %vm918_vm1, %v917_v4 }
  0x60 PF: > { %v929_v5 = vld [vmem:[%s3031_s24 + $0x18] sm:$0xff]  ;;  %v928_v7 = vld [vmem:[%s3031_s24 + $0x10] sm:$0xff]  ;;  %s3692_s4 = sld [smem:[#allocation9_spill]]  ;;  %v2822_v11 = vmov 0   ;;  %v927_v12 = vld [vmem:[%s3031_s24 + $0x8] sm:$0xff]  ;;  %vm1202_vm2 = vcmask 261120   ;;  %v1178_v32 = vlaneseq }
  0x61   : > { %v933_v6 = vld [vmem:[%s3031_s24 + $0x38] sm:$0xff]  ;;  %1218 = vmatpush.msra.mxu0 %v929_v5  ;;  %v932_v8 = vld [vmem:[%s3031_s24 + $0x30] sm:$0xff]  ;;  %s3693_s20 = sld [smem:[#allocation8_spill]]  ;;  %2720 = vset.pattern.permute.xlu1 %v2822_v11  ;;  %v931_v13 = vld [vmem:[%s3031_s24 + $0x28] sm:$0xff]  ;;  %vm1255_vm7 = vcmask 1043456   ;;  %v2823_v42 = vmov 0.0  }
  0x62   : > { %1241 = vmatpush.msra.mxu1 %v933_v6  ;;  %2719 = vset.pattern.permute.xlu0 %v2822_v11  ;;  %v926_v14 = vld [vmem:[%s3031_s24] sm:$0xff]  ;;  %s3694_s30 = sld [smem:[#allocation25_spill]]  ;;  %v941_v18 = vld [vmem:[%s3021_s3 + $0x18] sm:$0xff]  ;;  %v940_v19 = vld [vmem:[%s3021_s3 + $0x10] sm:$0xff]  ;;  %v1179_v33 = vand.u32 127, %v1178_v32  ;;  %vm1251_vm8 = vcmask 64512  }
  0x63   : > { %1219 = vmatpush.msra.mxu0 %v928_v7  ;;  %v930_v15 = vld [vmem:[%s3031_s24 + $0x20] sm:$0xff]  ;;  %s3695_s23 = sld [smem:[#allocation26_spill]]  ;;  %v939_v22 = vld [vmem:[%s3021_s3 + $0x8] sm:$0xff]  ;;  %v937_v24 = vld [vmem:[%s3031_s24 + $0x58] sm:$0xff]  ;;  %s2826_s15 = smov 32  }
  0x64   : > { %1242 = vmatpush.msra.mxu1 %v932_v8  ;;  %v938_v23 = vld [vmem:[%s3021_s3] sm:$0xff]  ;;  %v936_v25 = vld [vmem:[%s3031_s24 + $0x50] sm:$0xff]  ;;  %v935_v26 = vld [vmem:[%s3031_s24 + $0x48] sm:$0xff]  ;;  %s3696_s19 = sld [smem:[#allocation27_spill]] }
  0x65   : > { %1220 = vmatpush.msra.mxu0 %v927_v12  ;;  %v934_v27 = vld [vmem:[%s3031_s24 + $0x40] sm:$0xff]  ;;  %s3701_s8 = sld [smem:[#allocation10_spill]] }
  0x66   : > { %v1176_v9 = vld [vmem:[%s3692_s4] sm:$0xff]  ;;  %1243 = vmatpush.msra.mxu1 %v931_v13  ;;  %v1177_v20 = vld [vmem:[%s3692_s4 + $0x8] sm:$0xff] }
  0x67   : > { %v1174_v10 = vld [vmem:[%s3693_s20] sm:$0xff]  ;;  %1189 = vperm.xlu1 %2720, %v1176_v9   ;;  %1221 = vmatpush.msra.mxu0 %v926_v14  ;;  %v1175_v21 = vld [vmem:[%s3693_s20 + $0x8] sm:$0xff] }
  0x68   : > { %1181 = vperm.xlu0 %2719, %v1174_v10   ;;  %v920_v16 = vld [vmem:[%s3694_s30] sm:$0xff]  ;;  %1244 = vmatpush.msra.mxu1 %v930_v15 }
  0x69   : > { %v921_v17 = vld [vmem:[%s3695_s23] sm:$0xff]  ;;  %2622 = vmatmul.msk.f32.vlgmr.msra.gmra.mxu0 %vm1202_vm2, %v920_v16 }
  0x6a   : > { %2623 = vmatmul.msk.f32.vlgmr.msra.gmra.mxu1 %vm1202_vm2, %v921_v17  ;;  %1311 = vmatpush.msrb.mxu0 %v937_v24  ;;  %v3144_v28 = vld [vmem:[%s3696_s19] sm:$0xff]  ;;  %v3151_v31 = vld [vmem:[%s3696_s19 + $0x8] sm:$0xff] }
  0x6b   : > { %1464 = vmatpush.msrb.mxu1 %v941_v18  ;;  %v3189_v55 = vld [vmem:[%s3071_s6] sm:$0xff] }
  0x6c   : > { %1312 = vmatpush.msrb.mxu0 %v936_v25  ;;  %v1324_v59 = vperm.slane %v3189_v55, 0 }
  0x6d   : > { %1465 = vmatpush.msrb.mxu1 %v940_v19 }
  0x6e   : > { %1313 = vmatpush.msrb.mxu0 %v935_v26 }
  0x6f   : > { %1192 = vperm.xlu1 %2720, %v1177_v20   ;;  %1466 = vmatpush.msrb.mxu1 %v939_v22 }
  0x70   : > { %1184 = vperm.xlu0 %2719, %v1175_v21   ;;  %1314 = vmatpush.msrb.mxu0 %v934_v27  ;;  %v925_v27 = vld [vmem:[%s3701_s8] sm:$0xff] }
  0x71   : > { %1467 = vmatpush.msrb.mxu1 %v938_v23  ;;  %2626 = vmatmul.msk.f32.vlgmr.msrb.gmra.mxu0 %vm1202_vm2, %v3144_v28 }
  0x72   : > { %2628 = vmatmul.msk.f32.vlgmr.msrb.gmra.mxu1 %vm1202_vm2, %v921_v17 }
  0x79   : > { %2627 = vmatmul.msk.f32.gmra.mxu0 %vm1202_vm2, %v3151_v31 }
  0xd9   : > { %v1190_v29 = vpop.permute.xlu1 %1189 }
  0xda   : > { %v1182_v30 = vpop.permute.xlu0 %1181  ;;  %vm1194_vm3 = vcmp.eq.s32.totalorder %v1179_v33, %v1190_v29 }
  0xdb   : > { %vm3155_vm4 = vcmp.eq.s32.totalorder %v1179_v33, %v1182_v30  ;;  %v3163_v43 = vsel %vm1194_vm3, 1.0, %v2823_v42 }
  0xdc   : > { %v3169_v45 = vsel %vm3155_vm4, 1.0, %v2823_v42 }
  0xe1   : > { %v1193_v34 = vpop.permute.xlu1 %1192 }
  0xe2   : > { %v1185_v35 = vpop.permute.xlu0 %1184  ;;  %vm1195_vm5 = vcmp.eq.s32.totalorder %v1179_v33, %v1193_v34 }
  0xe3   : > { %vm3159_vm6 = vcmp.eq.s32.totalorder %v1179_v33, %v1185_v35  ;;  %v3165_v44 = vsel %vm1195_vm5, 1.0, %v2823_v42 }
  0xe4   : > { %v3173_v46 = vsel %vm3159_vm6, 1.0, %v2823_v42  ;;  %v1201_v49 = vpack.c.bf16 %v3165_v44, %v3163_v43 }
  0xe5   : > { %v3181_v50 = vpack.c.bf16 %v3173_v46, %v3169_v45 }
  0xe6   : > { %v1223_v38 = vpop.f32.mrf.mxu0 }
  0xe7   : > { %v1246_v39 = vpop.f32.mrf.mxu1  ;;  %v1249_v40 = vpack.c.bf16 %v1223_v38, %v1223_v38 }
  0xe8   : > { %v1250_v41 = vpack.c.bf16 %v1246_v39, %v1246_v39 }
  0xe9   : > { %v1277_v48 = vsel %vm1255_vm7, %v1249_v40, 0 }
  0xea   : > { %v1257_v47 = vsel %vm1255_vm7, %v1250_v41, 0  ;;  %1286 = vmatpush.bf16.msra.mxu3 %v1277_v48 }
  0xeb   : > { %1266 = vmatpush.bf16.msra.mxu2 %v1257_v47 }
  0xed   : > { %2625 = vmatmul.msk.bf16.vlgmr.msra.gmra.mxu3 %vm1251_vm8, %v3181_v50 }
  0xee   : > { %2624 = vmatmul.msk.bf16.vlgmr.msra.gmra.mxu2 %vm1251_vm8, %v1201_v49  ;;  %v1316_v54 = vpop.f32.mrf.mxu0 }
  0xef   : > { %v1469_v51 = vpop.f32.mrf.mxu1 }
  0xf0   : > { %v1472_v52 = vpack.c.bf16 %v1469_v51, %v1469_v51 }
  0xf2   : > { %v1503_v53 = vsel %vm1255_vm7, %v1472_v52, 0 }
  0xf3   : > { %1512 = vmatpush.bf16.msrb.mxu3 %v1503_v53 }
  0xf6   : > { %v1319_v63 = vpop.f32.mrf.mxu0 }
  0xfd   : > { %2631 = vmatmul.msk.bf16.vlgmr.msrb.gmra.mxu3 %vm1251_vm8, %v1201_v49 }
 0x170   : > { %v1288_v57 = vpop.f32.mrf.mxu3 }
 0x171   : > { %v1268_v56 = vpop.f32.mrf.mxu2 }
 0x172   : > { %v1289_v58 = vadd.f32 %v1288_v57, %v1268_v56 }
 0x174   : > { %v3192_v60 = vadd.f32 %v1316_v54, %v1289_v58 }
 0x176   : > { %v1325_v61 = vmul.f32 %v1324_v59, %v3192_v60 }
 0x178   : > { %v1327_v62 = vsel %vm1202_vm2, %v1325_v61, 0.0  ;;  %v1290_v1 = vpop.f32.mrf.mxu3 }
 0x179   : > { %v1270_v0 = vpop.f32.mrf.mxu2  ;;  %1328 = vadd.xlane.f32.xlu2 %v1327_v62 }
 0x17a   : > { %v1291_v2 = vadd.f32 %v1290_v1, %v1270_v0 }
 0x17c   : > { %v3196_v3 = vadd.f32 %v1319_v63, %v1291_v2 }
 0x17e   : > { %v1326_v4 = vmul.f32 %v1324_v59, %v3196_v3 }
 0x180   : > { %v1330_v5 = vsel %vm1202_vm2, %v1326_v4, 0.0 }
 0x181   : > { %1331 = vadd.xlane.f32.xlu2 %v1330_v5 }
 0x1ec   : > { %v1329_v6 = vpop.xlane.xlu2 %1328 }
 0x1ed   : > { %v1335_v7 = vmul.f32 0.2, %v1329_v6  ;;  %vm1333_vm9 = vcmp.ge.f32.partialorder %v1329_v6, 0.0 }
 0x1ef   : > { %v1337_v8 = vsel %vm1333_vm9, %v1329_v6, %v1335_v7 }
 0x1f0   : > { %v1339_v11 = vsel %vm3155_vm4, %v1337_v8, -1e+30 }
 0x1f1   : > { %v1341_v14 = vsel %vm1251_vm8, %v1339_v11, -inf }
 0x1f4   : > { %v1332_v9 = vpop.xlane.xlu2 %1331 }
 0x1f5   : > { %vm1334_vm10 = vcmp.ge.f32.partialorder %v1332_v9, 0.0  ;;  %v1336_v10 = vmul.f32 0.2, %v1332_v9 }
 0x1f7   : > { %v1338_v12 = vsel %vm1334_vm10, %v1332_v9, %v1336_v10 }
 0x1f8   : > { %v1340_v13 = vsel %vm3159_vm6, %v1338_v12, -1e+30 }
 0x1f9   : > { %v1342_v15 = vsel %vm1251_vm8, %v1340_v13, -inf }
 0x1fa   : > { %v1343_v16 = vmax.f32 %v1341_v14, %v1342_v15 }
 0x1fc   : > { %v1344_v17 = vrot.slane %v1343_v16, 4 }
 0x1fe   : > { %v1345_v18 = vmax.f32 %v1343_v16, %v1344_v17 }
 0x200   : > { %v1346_v19 = vrot.slane %v1345_v18, 2 }
 0x202   : > { %v1347_v20 = vmax.f32 %v1345_v18, %v1346_v19 }
 0x204   : > { %v1348_v21 = vrot.slane %v1347_v20, 1 }
 0x206   : > { %v1349_v22 = vmax.f32 %v1347_v20, %v1348_v21 }
 0x208   : > { %v1351_v23 = vsel %vm3159_vm6, %v1349_v22, 0.0  ;;  %v1350_v24 = vsel %vm3155_vm4, %v1349_v22, 0.0  ;;  %v944_v22 = vld [vmem:[%s3021_s3 + $0x30] sm:$0xff] }
 0x209   : > { %v1355_v25 = vsel %vm1251_vm8, %v1351_v23, 0.0  ;;  %v1352_v26 = vsel %vm1251_vm8, %v1350_v24, 0.0  ;;  %v943_v24 = vld [vmem:[%s3021_s3 + $0x28] sm:$0xff] }
 0x20a   : > { %1356 = vadd.xlane.f32.xlu1 %v1355_v25  ;;  %1353 = vadd.xlane.f32.xlu0 %v1352_v26  ;;  %v942_v25 = vld [vmem:[%s3021_s3 + $0x20] sm:$0xff] }
 0x21e   : > { %1617 = vperm.xlu0 %2719, %v925_v27  }
 0x27d   : > { %v1357_v29 = vpop.xlane.xlu1 %1356  ;;  %v1354_v30 = vpop.xlane.xlu0 %1353 }
 0x27e   : > { %v1359_v32 = vsub.f32 %v1338_v12, %v1357_v29  ;;  %v1358_v33 = vsub.f32 %v1337_v8, %v1354_v30 }
 0x280   : > { %v1362_v34 = vmul.f32 1.442695, %v1359_v32  ;;  %v1360_v35 = vmul.f32 1.442695, %v1358_v33  ;;  %v953_v32 = vld [vmem:[%s3026_s26 + $0x38] sm:$0xff]  ;;  %v952_v33 = vld [vmem:[%s3026_s26 + $0x30] sm:$0xff] }
 0x281   : > { %1544 = vmatpush.msra.mxu0 %v953_v32 }
 0x282   : > { %2727 = vpow2.f32 %v1362_v34  ;;  %v951_v34 = vld [vmem:[%s3026_s26 + $0x28] sm:$0xff] }
 0x283   : > { %2729 = vpow2.f32 %v1360_v35  ;;  %1545 = vmatpush.msra.mxu0 %v952_v33 }
 0x285   : > { %1546 = vmatpush.msra.mxu0 %v951_v34 }
 0x288   : > { %v2728_v38 = vpop.eup %2727 }
 0x289   : > { %v2730_v39 = vpop.eup %2729  ;;  %v1365_v40 = vsel %vm3159_vm6, %v2728_v38, 0.0 }
 0x28a   : > { %v1367_v41 = vsel %vm1251_vm8, %v1365_v40, 0.0  ;;  %v1364_v42 = vsel %vm3155_vm4, %v2730_v39, 0.0 }
 0x28b   : > { %v1366_v47 = vsel %vm1251_vm8, %v1364_v42, 0.0 }
 0x28c   : > { %v1368_v48 = vadd.f32 %v1367_v41, %v1366_v47 }
 0x28e   : > { %v1369_v49 = vrot.slane %v1368_v48, 4 }
 0x290   : > { %v1370_v51 = vadd.f32 %v1369_v49, %v1368_v48 }
 0x292   : > { %v1371_v52 = vrot.slane %v1370_v51, 2 }
 0x294   : > { %v1372_v53 = vadd.f32 %v1371_v52, %v1370_v51 }
 0x296   : > { %v1373_v54 = vrot.slane %v1372_v53, 1 }
 0x298   : > { %v1374_v56 = vadd.f32 %v1373_v54, %v1372_v53  ;;  %v1445_v54 = vperm.slane %v3189_v55, 1 }
 0x29a   : > { %2731 = vrcp.f32 %v1374_v56  ;;  %v1387_v61 = vand.u32 2147483648, %v1374_v56  ;;  %v1385_v63 = vand.u32 2147483647, %v1374_v56  ;;  %vm1381_vm12 = vweird.f32 %v1374_v56 }
 0x29b   : > { %vm1375_vm15 = vcmp.gt.f32.partialorder %v1374_v56, 0.0 }
 0x29c   : > { %v1388_v1 = vor.u32 1.1754944e-38, %v1387_v61  ;;  %vm1386_vm14 = vcmp.eq.f32.partialorder %v1385_v63, 8.507059e+37 }
 0x2a0   : > { %v2732_v57 = vpop.eup %2731 }
 0x2a1   : > { %v1377_v58 = vmul.f32 %v2732_v57, %v1374_v56  ;;  %vm1382_vm11 = vweird.f32 %v2732_v57 }
 0x2a2   : > { %vm1383_vm13 = vmor %vm1381_vm12, %vm1382_vm11  ;;  %vm1529_vm11 = vcmask 523264  }
 0x2a3   : > { %v1378_v59 = vsub.f32 1.0, %v1377_v58 }
 0x2a5   : > { %v1379_v62 = vmul.f32 %v2732_v57, %v1378_v59 }
 0x2a7   : > { %v1380_v0 = vadd.f32 %v2732_v57, %v1379_v62 }
 0x2a9   : > { %v1384_v2 = vsel %vm1383_vm13, %v2732_v57, %v1380_v0  ;;  %vm1591_vm13 = vcmask 130048  }
 0x2aa   : > { %v1389_v4 = vsel %vm1386_vm14, %v1388_v1, %v1384_v2 }
 0x2ab   : > { %v1391_v5 = vsel %vm1375_vm15, %v1389_v4, 0.0 }
 0x2ac   : > { %v1392_v6 = vsel %vm3155_vm4, %v1391_v5, 0.0  ;;  %v1393_v8 = vsel %vm3159_vm6, %v1391_v5, 0.0  ;;  %v949_v5 = vld [vmem:[%s3026_s26 + $0x18] sm:$0xff] }
 0x2ad   : > { %v1394_v7 = vsel %vm1251_vm8, %v1392_v6, 0.0  ;;  %v1397_v9 = vsel %vm1251_vm8, %v1393_v8, 0.0  ;;  %v948_v6 = vld [vmem:[%s3026_s26 + $0x10] sm:$0xff]  ;;  %v946_v8 = vld [vmem:[%s3026_s26] sm:$0xff] }
 0x2ae   : > { %1395 = vadd.xlane.f32.xlu2 %v1394_v7  ;;  %v947_v7 = vld [vmem:[%s3026_s26 + $0x8] sm:$0xff] }
 0x2b6   : > { %1398 = vadd.xlane.f32.xlu2 %v1397_v9  ;;  %v1514_v9 = vpop.f32.mrf.mxu3 }
 0x321   : > { %v1396_v10 = vpop.xlane.xlu2 %1395 }
 0x322   : > { %v1400_v11 = vmul.f32 %v2730_v39, %v1396_v10  ;;  %v950_v39 = vld [vmem:[%s3026_s26 + $0x20] sm:$0xff]  ;;  %s2825_s26 = smov 96  }
 0x323   : > { %1547 = vmatpush.msra.mxu0 %v950_v39 }
 0x324   : > { %v1402_v12 = vmul.f32 %v1400_v11, %v3192_v60  ;;  %v2824_v60 = vmov 32.0  }
 0x325   : > { %2733 = vrcp.f32 %v2824_v60  ;;  %1548 = vmatpush.msra.mxu0 %v949_v5 }
 0x326   : > { %v1404_v13 = vmul.f32 %v1402_v12, %v1402_v12 }
 0x327   : > { %1549 = vmatpush.msra.mxu0 %v948_v6 }
 0x328   : > { %v1406_v14 = vsel %vm1202_vm2, %v1404_v13, 0.0 }
 0x329   : > { %1407 = vadd.xlane.f32.xlu2 %v1406_v14  ;;  %v1399_v36 = vpop.xlane.xlu2 %1398  ;;  %1550 = vmatpush.msra.mxu0 %v947_v7 }
 0x32a   : > { %v1401_v15 = vmul.f32 %v2728_v38, %v1399_v36  ;;  %v1516_v36 = vpop.f32.mrf.mxu3 }
 0x32b   : > { %v2734_v18 = vpop.eup %2733  ;;  %1551 = vmatpush.msra.mxu0 %v946_v8 }
 0x32c   : > { %v3230_v16 = vmul.f32 %v1401_v15, %v3196_v3  ;;  %v1413_v19 = vmul.f32 32.0, %v2734_v18  ;;  %v945_v3 = vld [vmem:[%s3021_s3 + $0x38] sm:$0xff]  ;;  %vm1417_vm0 = vweird.f32 %v2734_v18 }
 0x32d   : > { %1491 = vmatpush.msrb.mxu2 %v945_v3 }
 0x32e   : > { %v1405_v37 = vmul.f32 %v3230_v16, %v3230_v16  ;;  %v1414_v20 = vsub.f32 1.0, %v1413_v19  ;;  %v1528_v19 = vperm.slane %v3189_v55, 3 }
 0x32f   : > { %1492 = vmatpush.msrb.mxu2 %v944_v22 }
 0x330   : > { %v1409_v17 = vsel %vm1202_vm2, %v1405_v37, 0.0  ;;  %v1415_v21 = vmul.f32 %v2734_v18, %v1414_v20 }
 0x331   : > { %1410 = vadd.xlane.f32.xlu2 %v1409_v17  ;;  %1493 = vmatpush.msrb.mxu2 %v943_v24 }
 0x332   : > { %v1416_v23 = vadd.f32 %v2734_v18, %v1415_v21 }
 0x333   : > { %1494 = vmatpush.msrb.mxu2 %v942_v25  ;;  %v1618_v25 = vpop.permute.xlu0 %1617 }
 0x334   : > { %v3241_v26 = vsel %vm1417_vm0, %v2734_v18, %v1416_v23 }
 0x35a   : > { %1559 = vxpose.xlu2.b32.start [1/2] (short) (narrow) %v3169_v45, 8 }
 0x362   : > { %1560 = vxpose.xlu2.b32.end [2/2] (short) (narrow) %v3173_v46, 8 }
 0x39c   : > { %v1408_v27 = vpop.xlane.xlu2 %1407 }
 0x39d   : > { %v1419_v29 = vmul.f32 %v3241_v26, %v1408_v27 }
 0x39f   : > { %v1421_v30 = vadd.f32 1.1920929e-07, %v1419_v29 }
 0x3a1   : > { %2735 = vrsqrt.f32 %v1421_v30  ;;  %vm1429_vm3 = vweird.f32 %v1421_v30 }
 0x3a4   : > { %v1411_v35 = vpop.xlane.xlu2 %1410 }
 0x3a5   : > { %v1420_v38 = vmul.f32 %v3241_v26, %v1411_v35 }
 0x3a7   : > { %v2736_v40 = vpop.eup %2735  ;;  %v1422_v41 = vadd.f32 1.1920929e-07, %v1420_v38 }
 0x3a8   : > { %v1424_v42 = vmul.f32 %v2736_v40, %v1421_v30  ;;  %vm1430_vm1 = vweird.f32 %v2736_v40 }
 0x3a9   : > { %2737 = vrsqrt.f32 %v1422_v41  ;;  %vm1431_vm4 = vmor %vm1429_vm3, %vm1430_vm1  ;;  %vm1439_vm6 = vweird.f32 %v1422_v41  ;;  %vm1768_vm3 = vcmask 785408  }
 0x3aa   : > { %v1425_v47 = vmul.f32 %v2736_v40, %v1424_v42 }
 0x3ac   : > { %v1426_v48 = vmul.f32 0.5, %v1425_v47 }
 0x3ae   : > { %v1427_v49 = vsub.f32 1.5, %v1426_v48 }
 0x3af   : > { %v2738_v51 = vpop.eup %2737 }
 0x3b0   : > { %v1428_v52 = vmul.f32 %v2736_v40, %v1427_v49  ;;  %v1434_v53 = vmul.f32 %v2738_v51, %v1422_v41  ;;  %vm1440_vm5 = vweird.f32 %v2738_v51 }
 0x3b1   : > { %vm1441_vm9 = vmor %vm1439_vm6, %vm1440_vm5 }
 0x3b2   : > { %v1432_v56 = vsel %vm1431_vm4, %v2736_v40, %v1428_v52  ;;  %v1435_v57 = vmul.f32 %v2738_v51, %v1434_v53  ;;  %vm1776_vm4 = vcmask 392192  }
 0x3b3   : > { %v1443_v58 = vmul.f32 %v1432_v56, %v1402_v12 }
 0x3b4   : > { %v1436_v59 = vmul.f32 0.5, %v1435_v57 }
 0x3b5   : > { %v1446_v61 = vmul.f32 %v1445_v54, %v1443_v58 }
 0x3b6   : > { %v1437_v62 = vsub.f32 1.5, %v1436_v59 }
 0x3b7   : > { %v3251_v63 = vadd.f32 %v1446_v61, %v3144_v28 }
 0x3b8   : > { %v1438_v0 = vmul.f32 %v2738_v51, %v1437_v62 }
 0x3b9   : > { %1450 = vst.msk [vmem:[%s3696_s19] sm:$0xff] %vm1202_vm2, %v3251_v63  ;;  %2629 = vmatmul.msk.f32.vlgmr.msrb.gmra.mxu2 %vm1202_vm2, %v3251_v63 }
 0x3ba   : > { %v1442_v1 = vsel %vm1441_vm9, %v2738_v51, %v1438_v0 }
 0x3bb   : > { %v1444_v2 = vmul.f32 %v1442_v1, %v3230_v16 }
 0x3bd   : > { %v1447_v4 = vmul.f32 %v1445_v54, %v1444_v2 }
 0x3bf   : > { %v3262_v28 = vadd.f32 %v1447_v4, %v3151_v31  ;;  %v1519_v31 = vperm.slane %v3189_v55, 2 }
 0x3c1   : > { %1451 = vst.msk [vmem:[%s3696_s19 + $0x8] sm:$0xff] %vm1202_vm2, %v3262_v28  ;;  %2630 = vmatmul.msk.f32.gmra.mxu2 %vm1202_vm2, %v3262_v28  ;;  %s3702_s19 = sld [smem:[#allocation28_spill]] }
 0x3f3   : > { %v1575_v23 = vpop.trf.xlu2 }
 0x43c   : > { %v1496_v10 = vpop.f32.mrf.mxu2 }
 0x43d   : > { %v1515_v11 = vadd.f32 %v1514_v9, %v1496_v10  ;;  %v3293_v10 = vld [vmem:[%s3702_s19] ss:$0 sm:$0xff] }
 0x43f   : > { %v1520_v12 = vadd.f32 %v1519_v31, %v1515_v11  ;;  %v1047_v11 = vld [vmem:[%s3010_s29 + $0x2e8] sm:$0xff] }
 0x441   : > { %vm1522_vm10 = vcmp.ge.f32.partialorder %v1520_v12, 0.0  ;;  %v1524_v13 = vmul.f32 0.2, %v1520_v12 }
 0x443   : > { %v1526_v14 = vsel %vm1522_vm10, %v1520_v12, %v1524_v13  ;;  %v1000_v12 = vld [vmem:[%s3010_s29 + $0x170] sm:$0xff] }
 0x444   : > { %v1499_v15 = vpop.f32.mrf.mxu2  ;;  %2632 = vmatmul.msk.f32.vlgmr.msra.gmra.mxu0 %vm1529_vm11, %v1526_v14  ;;  %v1044_v13 = vld [vmem:[%s3010_s29 + $0x2d0] sm:$0xff]  ;;  %v997_v14 = vld [vmem:[%s3010_s29 + $0x158] sm:$0xff] }
 0x445   : > { %v1517_v16 = vadd.f32 %v1516_v36, %v1499_v15  ;;  %v1041_v36 = vld [vmem:[%s3010_s29 + $0x2b8] sm:$0xff]  ;;  %v994_v15 = vld [vmem:[%s3010_s29 + $0x140] sm:$0xff] }
 0x447   : > { %v1521_v37 = vadd.f32 %v1519_v31, %v1517_v16  ;;  %v1038_v16 = vld [vmem:[%s3010_s29 + $0x2a0] sm:$0xff] }
 0x449   : > { %vm1523_vm12 = vcmp.ge.f32.partialorder %v1521_v37, 0.0  ;;  %v1525_v17 = vmul.f32 0.2, %v1521_v37 }
 0x44b   : > { %v1527_v60 = vsel %vm1523_vm12, %v1521_v37, %v1525_v17  ;;  %v991_v37 = vld [vmem:[%s3010_s29 + $0x128] sm:$0xff] }
 0x44c   : > { %2633 = vmatmul.msk.f32.gmra.mxu0 %vm1529_vm11, %v1527_v60  ;;  %v1035_v17 = vld [vmem:[%s3010_s29 + $0x288] sm:$0xff]  ;;  %v988_v60 = vld [vmem:[%s3010_s29 + $0x110] sm:$0xff] }
 0x4c1   : > { %v1553_v18 = vpop.f32.mrf.mxu0 }
 0x4c2   : > { %v1554_v3 = vadd.f32 %v1553_v18, %v1528_v19  ;;  %v999_v18 = vld [vmem:[%s3010_s29 + $0x168] sm:$0xff] }
 0x4c3   : > { %1780 = vmatpush.msrb.mxu0 %v999_v18  ;;  %v1031_v18 = vld [vmem:[%s3010_s29 + $0x268] sm:$0xff] }
 0x4c4   : > { %v1621_v24 = vmul.f32 %v1554_v3, %v1554_v3 }
 0x4c9   : > { %v1556_v20 = vpop.f32.mrf.mxu0 }
 0x4ca   : > { %v1557_v21 = vadd.f32 %v1556_v20, %v1528_v19  ;;  %v996_v19 = vld [vmem:[%s3010_s29 + $0x150] sm:$0xff] }
 0x4cb   : > { %v1032_v20 = vld [vmem:[%s3010_s29 + $0x270] sm:$0xff]  ;;  %1781 = vmatpush.msrb.mxu0 %v996_v19 }
 0x4cc   : > { %v1622_v22 = vmul.f32 %v1557_v21, %v1557_v21  ;;  %1609 = vmatpush.msra.mxu1 %v1557_v21  ;;  %v1036_v19 = vld [vmem:[%s3010_s29 + $0x290] sm:$0xff] }
 0x4ce   : > { %1610 = vmatpush.msra.mxu1 %v1554_v3 }
 0x4cf   : > { %2634 = vmatmul.msk.f32.vlgmr.msra.gmra.mxu1 %vm1591_vm13, %v1575_v23 }
 0x4d0   : > { %1637 = vmatpush.msrb.mxu1 %v1622_v22  ;;  %v1029_v22 = vld [vmem:[%s3010_s29 + $0x258] sm:$0xff] }
 0x4d2   : > { %1638 = vmatpush.msrb.mxu1 %v1621_v24  ;;  %v1065_v24 = vld [vmem:[%s3010_s29 + $0x378] sm:$0xff] }
 0x4d7   : > { %2635 = vmatmul.msk.f32.vlgmr.msrb.gmra.mxu1 %vm1591_vm13, %v1575_v23 }
 0x54c   : > { %v1612_v27 = vpop.f32.mrf.mxu1 }
 0x54d   : > { %v1620_v29 = vmul.f32 %v1618_v25, %v1612_v27  ;;  %v1062_v27 = vld [vmem:[%s3010_s29 + $0x360] sm:$0xff] }
 0x54f   : > { %1683 = vmatpush.msra.mxu2 %v1620_v29  ;;  %v1644_v32 = vmul.f32 %v1620_v29, %v1620_v29 }
 0x550   : > { %2636 = vmatmul.msk.f32.vlgmr.msra.gmra.mxu2 %vm1251_vm8, %v3169_v45 }
 0x551   : > { %1800 = vmatpush.msrb.mxu2 %v1047_v11  ;;  %v1046_v11 = vld [vmem:[%s3010_s29 + $0x2e0] sm:$0xff] }
 0x553   : > { %1801 = vmatpush.msrb.mxu2 %v1044_v13  ;;  %v995_v13 = vld [vmem:[%s3010_s29 + $0x148] sm:$0xff] }
 0x554   : > { %v1640_v55 = vpop.f32.mrf.mxu1 }
 0x555   : > { %v1643_v30 = vmul.f32 %v1640_v55, %v1618_v25  ;;  %1802 = vmatpush.msrb.mxu2 %v1041_v36  ;;  %v979_v55 = vld [vmem:[%s3010_s29 + $0xc8] sm:$0xff]  ;;  %v992_v36 = vld [vmem:[%s3010_s29 + $0x130] sm:$0xff] }
 0x557   : > { %v1645_v33 = vsub.f32 %v1643_v30, %v1644_v32  ;;  %1803 = vmatpush.msrb.mxu2 %v1038_v16  ;;  %v987_v30 = vld [vmem:[%s3010_s29 + $0x108] sm:$0xff]  ;;  %v1037_v16 = vld [vmem:[%s3010_s29 + $0x298] sm:$0xff] }
 0x558   : > { %2637 = vmatmul.msk.f32.gmra.mxu2 %vm1251_vm8, %v3173_v46  ;;  %v1059_v32 = vld [vmem:[%s3010_s29 + $0x348] sm:$0xff] }
 0x559   : > { %vm1646_vm14 = vcmp.ge.f32.partialorder %v1645_v33, 0.0  ;;  %v1647_v34 = vmul.f32 0.01, %v1645_v33  ;;  %1804 = vmatpush.msrb.mxu2 %v1035_v17  ;;  %v1034_v17 = vld [vmem:[%s3010_s29 + $0x280] sm:$0xff] }
 0x55b   : > { %v1648_v35 = vsel %vm1646_vm14, %v1645_v33, %v1647_v34  ;;  %1805 = vmatpush.msrb.mxu2 %v1032_v20  ;;  %v1023_v33 = vld [vmem:[%s3010_s29 + $0x228] sm:$0xff]  ;;  %v976_v34 = vld [vmem:[%s3010_s29 + $0xb0] sm:$0xff]  ;;  %v957_v20 = vld [vmem:[%s3010_s29 + $0x18] sm:$0xff] }
 0x55c   : > { %v1649_v38 = vmax.f32 %v1648_v35, 0.0  ;;  %v984_v35 = vld [vmem:[%s3010_s29 + $0xf0] sm:$0xff] }
 0x55d   : > { %1806 = vmatpush.msrb.mxu2 %v1029_v22  ;;  %v1033_v22 = vld [vmem:[%s3010_s29 + $0x278] sm:$0xff] }
 0x55e   : > { %v1650_v39 = vadd.f32 1e-06, %v1649_v38  ;;  %v1056_v38 = vld [vmem:[%s3010_s29 + $0x330] sm:$0xff] }
 0x560   : > { %2739 = vrsqrt.f32 %v1650_v39  ;;  %vm1657_vm0 = vweird.f32 %v1650_v39 }
 0x566   : > { %v2740_v40 = vpop.eup %2739 }
 0x567   : > { %v1652_v41 = vmul.f32 %v2740_v40, %v1650_v39  ;;  %vm1658_vm15 = vweird.f32 %v2740_v40 }
 0x568   : > { %vm1659_vm1 = vmor %vm1657_vm0, %vm1658_vm15 }
 0x569   : > { %v1653_v42 = vmul.f32 %v2740_v40, %v1652_v41  ;;  %v981_v41 = vld [vmem:[%s3010_s29 + $0xd8] sm:$0xff] }
 0x56b   : > { %v1654_v47 = vmul.f32 0.5, %v1653_v42  ;;  %v1053_v42 = vld [vmem:[%s3010_s29 + $0x318] sm:$0xff] }
 0x56d   : > { %v1655_v48 = vsub.f32 1.5, %v1654_v47  ;;  %v1017_v47 = vld [vmem:[%s3010_s29 + $0x1f8] sm:$0xff] }
 0x56f   : > { %v1656_v45 = vmul.f32 %v2740_v40, %v1655_v48  ;;  %v970_v48 = vld [vmem:[%s3010_s29 + $0x80] sm:$0xff] }
 0x571   : > { %v1660_v49 = vsel %vm1659_vm1, %v2740_v40, %v1656_v45  ;;  %v973_v40 = vld [vmem:[%s3010_s29 + $0x98] sm:$0xff]  ;;  %v978_v45 = vld [vmem:[%s3010_s29 + $0xc0] sm:$0xff] }
 0x572   : > { %v1661_v51 = vmul.f32 %v1660_v49, %v1650_v39  ;;  %v1697_v0 = vmul.f32 %v1660_v49, %v1660_v49  ;;  %v1020_v39 = vld [vmem:[%s3010_s29 + $0x210] sm:$0xff] }
 0x574   : > { %1753 = vrot.lane.b32.xlu1 %v1661_v51, %s2825_s26  ;;  %v1744_v4 = vmul.f32 %v1697_v0, %v1697_v0  ;;  %v1719_v8 = vmul.f32 %v1697_v0, %v1660_v49  ;;  %v1050_v49 = vld [vmem:[%s3010_s29 + $0x300] sm:$0xff]  ;;  %v1005_v0 = vld [vmem:[%s3010_s29 + $0x198] sm:$0xff] }
 0x575   : > { %v1014_v51 = vld [vmem:[%s3010_s29 + $0x1e0] sm:$0xff] }
 0x5d3   : > { %v1685_v46 = vpop.f32.mrf.mxu2 }
 0x5d4   : > { %v1691_v52 = vsub.f32 %v1554_v3, %v1685_v46  ;;  %v993_v3 = vld [vmem:[%s3010_s29 + $0x138] sm:$0xff]  ;;  %v967_v46 = vld [vmem:[%s3010_s29 + $0x68] sm:$0xff] }
 0x5d5   : > { %1782 = vmatpush.msrb.mxu0 %v993_v3  ;;  %v1028_v3 = vld [vmem:[%s3010_s29 + $0x250] sm:$0xff] }
 0x5d6   : > { %v1693_v54 = vmul.f32 %v1691_v52, %v1691_v52 }
 0x5d8   : > { %v1695_v59 = vmul.f32 %v1693_v54, %v1691_v52  ;;  %v964_v54 = vld [vmem:[%s3010_s29 + $0x50] sm:$0xff] }
 0x5da   : > { %v1721_v62 = vmul.f32 %v1695_v59, %v1691_v52  ;;  %v975_v52 = vld [vmem:[%s3010_s29 + $0xa8] sm:$0xff] }
 0x5db   : > { %v1688_v53 = vpop.f32.mrf.mxu2 }
 0x5dc   : > { %v1692_v56 = vsub.f32 %v1557_v21, %v1688_v53  ;;  %v985_v21 = vld [vmem:[%s3010_s29 + $0xf8] sm:$0xff]  ;;  %v1011_v53 = vld [vmem:[%s3010_s29 + $0x1c8] sm:$0xff] }
 0x5de   : > { %v1694_v57 = vmul.f32 %v1692_v56, %v1692_v56 }
 0x5e0   : > { %v1696_v58 = vmul.f32 %v1694_v57, %v1692_v56  ;;  %v1048_v57 = vld [vmem:[%s3010_s29 + $0x2f0] sm:$0xff] }
 0x5e2   : > { %v1722_v61 = vmul.f32 %v1696_v58, %v1692_v56  ;;  %1712 = vmatpush.msra.mxu3 %v1696_v58  ;;  %v972_v56 = vld [vmem:[%s3010_s29 + $0x90] sm:$0xff] }
 0x5e3   : > { %v1008_v58 = vld [vmem:[%s3010_s29 + $0x1b0] sm:$0xff] }
 0x5e4   : > { %1713 = vmatpush.msra.mxu3 %v1695_v59  ;;  %1737 = vmatpush.msra.mxu1 %v1722_v61  ;;  %v961_v59 = vld [vmem:[%s3010_s29 + $0x38] sm:$0xff] }
 0x5e5   : > { %2638 = vmatmul.msk.f32.vlgmr.msra.gmra.mxu3 %vm1591_vm13, %v1575_v23  ;;  %v969_v61 = vld [vmem:[%s3010_s29 + $0x78] sm:$0xff] }
 0x5e6   : > { %1738 = vmatpush.msra.mxu1 %v1721_v62  ;;  %1830 = vmatpush.msrb.mxu3 %v1065_v24  ;;  %v1045_v62 = vld [vmem:[%s3010_s29 + $0x2d8] sm:$0xff] }
 0x5e7   : > { %2639 = vmatmul.msk.f32.vlgmr.msra.gmra.mxu1 %vm1591_vm13, %v1575_v23  ;;  %v982_v23 = vld [vmem:[%s3010_s29 + $0xe0] sm:$0xff]  ;;  %v977_v24 = vld [vmem:[%s3010_s29 + $0xb8] sm:$0xff] }
 0x5e8   : > { %1840 = vmatpush.msrb.mxu1 %v1000_v12  ;;  %1831 = vmatpush.msrb.mxu3 %v1062_v27  ;;  %v960_v12 = vld [vmem:[%s3010_s29 + $0x30] sm:$0xff]  ;;  %v1030_v27 = vld [vmem:[%s3010_s29 + $0x260] sm:$0xff] }
 0x5ea   : > { %1841 = vmatpush.msrb.mxu1 %v997_v14  ;;  %1832 = vmatpush.msrb.mxu3 %v1059_v32  ;;  %v1043_v14 = vld [vmem:[%s3010_s29 + $0x2c8] sm:$0xff] }
 0x5eb   : > { %v1027_v32 = vld [vmem:[%s3010_s29 + $0x248] sm:$0xff] }
 0x5ec   : > { %1842 = vmatpush.msrb.mxu1 %v994_v15  ;;  %1833 = vmatpush.msrb.mxu3 %v1056_v38  ;;  %v989_v15 = vld [vmem:[%s3010_s29 + $0x118] sm:$0xff]  ;;  %v1024_v38 = vld [vmem:[%s3010_s29 + $0x230] sm:$0xff] }
 0x5ee   : > { %1843 = vmatpush.msrb.mxu1 %v991_v37  ;;  %1834 = vmatpush.msrb.mxu3 %v1053_v42  ;;  %v986_v37 = vld [vmem:[%s3010_s29 + $0x100] sm:$0xff]  ;;  %v1021_v42 = vld [vmem:[%s3010_s29 + $0x218] sm:$0xff] }
 0x5f0   : > { %1844 = vmatpush.msrb.mxu1 %v988_v60  ;;  %1835 = vmatpush.msrb.mxu3 %v1050_v49  ;;  %v983_v60 = vld [vmem:[%s3010_s29 + $0xe8] sm:$0xff]  ;;  %v1018_v49 = vld [vmem:[%s3010_s29 + $0x200] sm:$0xff] }
 0x5f2   : > { %1845 = vmatpush.msrb.mxu1 %v985_v21  ;;  %1860 = vmatpush.msra.mxu3 %v1048_v57  ;;  %v980_v21 = vld [vmem:[%s3010_s29 + $0xd0] sm:$0xff]  ;;  %v1007_v57 = vld [vmem:[%s3010_s29 + $0x1a8] sm:$0xff] }
 0x5f4   : > { %1846 = vmatpush.msrb.mxu1 %v982_v23  ;;  %1861 = vmatpush.msra.mxu3 %v1045_v62  ;;  %v954_v23 = vld [vmem:[%s3010_s29] sm:$0xff]  ;;  %v1009_v62 = vld [vmem:[%s3010_s29 + $0x1b8] sm:$0xff] }
 0x5f6   : > { %1847 = vmatpush.msrb.mxu1 %v979_v55  ;;  %v974_v55 = vld [vmem:[%s3010_s29 + $0xa0] sm:$0xff] }
 0x5f8   : > { %1848 = vmatpush.msrb.mxu1 %v976_v34  ;;  %v971_v34 = vld [vmem:[%s3010_s29 + $0x88] sm:$0xff] }
 0x5fa   : > { %1849 = vmatpush.msrb.mxu1 %v973_v40  ;;  %v968_v40 = vld [vmem:[%s3010_s29 + $0x70] sm:$0xff] }
 0x5fc   : > { %1850 = vmatpush.msrb.mxu1 %v970_v48  ;;  %v965_v48 = vld [vmem:[%s3010_s29 + $0x58] sm:$0xff] }
 0x5fe   : > { %1851 = vmatpush.msrb.mxu1 %v967_v46  ;;  %v962_v46 = vld [vmem:[%s3010_s29 + $0x40] sm:$0xff] }
 0x600   : > { %1852 = vmatpush.msrb.mxu1 %v964_v54  ;;  %v1051_v54 = vld [vmem:[%s3010_s29 + $0x308] sm:$0xff] }
 0x602   : > { %1853 = vmatpush.msrb.mxu1 %v961_v59  ;;  %v956_v59 = vld [vmem:[%s3010_s29 + $0x10] sm:$0xff] }
 0x664   : > { %v1740_v1 = vpop.f32.mrf.mxu1 }
 0x665   : > { %v1743_v2 = vmul.f32 %v1740_v1, %v1618_v25  ;;  %v958_v1 = vld [vmem:[%s3010_s29 + $0x20] sm:$0xff] }
 0x666   : > { %1854 = vmatpush.msrb.mxu1 %v958_v1  ;;  %v1003_v1 = vld [vmem:[%s3010_s29 + $0x188] sm:$0xff] }
 0x667   : > { %v1745_v5 = vmul.f32 %v1744_v4, %v1743_v2  ;;  %v1042_v2 = vld [vmem:[%s3010_s29 + $0x2c0] sm:$0xff] }
 0x668   : > { %v1715_v6 = vpop.f32.mrf.mxu3  ;;  %v1002_v4 = vld [vmem:[%s3010_s29 + $0x180] sm:$0xff]  ;;  %1862 = vmatpush.msra.mxu3 %v1042_v2 }
 0x669   : > { %v1718_v7 = vmul.f32 %v1715_v6, %v1618_v25  ;;  %1761 = vrot.lane.b32.xlu1 %v1745_v5, %s2825_s26  ;;  %v990_v25 = vld [vmem:[%s3010_s29 + $0x120] sm:$0xff]  ;;  %v955_v5 = vld [vmem:[%s3010_s29 + $0x8] sm:$0xff]  ;;  %v1001_v6 = vld [vmem:[%s3010_s29 + $0x178] sm:$0xff] }
 0x66a   : > { %1783 = vmatpush.msrb.mxu0 %v990_v25  ;;  %1855 = vmatpush.msrb.mxu1 %v955_v5  ;;  %v1025_v25 = vld [vmem:[%s3010_s29 + $0x238] sm:$0xff] }
 0x66b   : > { %v1720_v9 = vmul.f32 %v1719_v8, %v1718_v7  ;;  %v1049_v7 = vld [vmem:[%s3010_s29 + $0x2f8] sm:$0xff]  ;;  %v963_v8 = vld [vmem:[%s3010_s29 + $0x48] sm:$0xff] }
 0x66c   : > { %1784 = vmatpush.msrb.mxu0 %v987_v30  ;;  %1920 = vmatpush.msra.mxu1 %v1049_v7  ;;  %v1022_v30 = vld [vmem:[%s3010_s29 + $0x220] sm:$0xff] }
 0x66d   : > { %v2721_v31 = vpack.i.bf16 %v1620_v29, %v1720_v9  ;;  %v1026_v29 = vld [vmem:[%s3010_s29 + $0x240] sm:$0xff] }
 0x66e   : > { %1807 = vmatpush.msrb.mxu2 %v1026_v29  ;;  %1785 = vmatpush.msrb.mxu0 %v984_v35  ;;  %v998_v9 = vld [vmem:[%s3010_s29 + $0x160] sm:$0xff]  ;;  %v1019_v35 = vld [vmem:[%s3010_s29 + $0x208] sm:$0xff] }
 0x66f   : > { %2722 = vrot.lane.b32.xlu0 %v2721_v31, %s2826_s15  ;;  %v1039_v31 = vld [vmem:[%s3010_s29 + $0x2a8] sm:$0xff]  ;;  %1921 = vmatpush.msra.mxu1 %v1046_v11  ;;  %v1066_v29 = vld [vmem:[%s3010_s29 + $0x380] sm:$0xff] }
 0x670   : > { %1808 = vmatpush.msrb.mxu2 %v1023_v33  ;;  %1786 = vmatpush.msrb.mxu0 %v981_v41  ;;  %v1063_v33 = vld [vmem:[%s3010_s29 + $0x368] sm:$0xff]  ;;  %v1016_v41 = vld [vmem:[%s3010_s29 + $0x1f0] sm:$0xff] }
 0x671   : > { %1863 = vmatpush.msra.mxu3 %v1039_v31  ;;  %1922 = vmatpush.msra.mxu1 %v1043_v14  ;;  %v3410_v7 = vld [vmem:[%s3694_s30] sm:$0xff]  ;;  %v1067_v31 = vld [vmem:[%s3010_s29 + $0x388] sm:$0xff]  ;;  %v1061_v14 = vld [vmem:[%s3010_s29 + $0x358] sm:$0xff] }
 0x672   : > { %1809 = vmatpush.msrb.mxu2 %v1020_v39  ;;  %1787 = vmatpush.msrb.mxu0 %v978_v45  ;;  %v1060_v39 = vld [vmem:[%s3010_s29 + $0x350] sm:$0xff]  ;;  %v1013_v45 = vld [vmem:[%s3010_s29 + $0x1d8] sm:$0xff] }
 0x673   : > { %1864 = vmatpush.msra.mxu3 %v1036_v19  ;;  %v1099_v19 = vld [vmem:[%s3046_s27 + $0xf8] sm:$0xff] }
 0x674   : > { %1810 = vmatpush.msrb.mxu2 %v1017_v47  ;;  %1788 = vmatpush.msrb.mxu0 %v975_v52  ;;  %v1057_v47 = vld [vmem:[%s3010_s29 + $0x338] sm:$0xff]  ;;  %v1010_v52 = vld [vmem:[%s3010_s29 + $0x1c0] sm:$0xff] }
 0x675   : > { %1865 = vmatpush.msra.mxu3 %v1033_v22  ;;  %v1078_v22 = vld [vmem:[%s3046_s27 + $0x50] sm:$0xff] }
 0x676   : > { %1811 = vmatpush.msrb.mxu2 %v1014_v51  ;;  %1789 = vmatpush.msrb.mxu0 %v972_v56  ;;  %v1054_v51 = vld [vmem:[%s3010_s29 + $0x320] sm:$0xff]  ;;  %v959_v56 = vld [vmem:[%s3010_s29 + $0x28] sm:$0xff] }
 0x677   : > { %1764 = vrot.lane.b32.xlu0 %v3293_v10, %s2826_s15  ;;  %1866 = vmatpush.msra.mxu3 %v1030_v27  ;;  %v1075_v27 = vld [vmem:[%s3046_s27 + $0x38] sm:$0xff] }
 0x678   : > { %1812 = vmatpush.msrb.mxu2 %v1011_v53  ;;  %1790 = vmatpush.msrb.mxu0 %v969_v61  ;;  %v1015_v53 = vld [vmem:[%s3010_s29 + $0x1e8] sm:$0xff]  ;;  %v1004_v61 = vld [vmem:[%s3010_s29 + $0x190] sm:$0xff] }
 0x679   : > { %1867 = vmatpush.msra.mxu3 %v1027_v32  ;;  %v1073_v32 = vld [vmem:[%s3046_s27 + $0x28] sm:$0xff] }
 0x67a   : > { %1813 = vmatpush.msrb.mxu2 %v1008_v58  ;;  %v1012_v58 = vld [vmem:[%s3010_s29 + $0x1d0] sm:$0xff] }
 0x67b   : > { %1868 = vmatpush.msra.mxu3 %v1024_v38  ;;  %v1071_v38 = vld [vmem:[%s3046_s27 + $0x18] sm:$0xff] }
 0x67c   : > { %1814 = vmatpush.msrb.mxu2 %v1005_v0  ;;  %v1006_v0 = vld [vmem:[%s3010_s29 + $0x1a0] sm:$0xff] }
 0x67d   : > { %1869 = vmatpush.msra.mxu3 %v1021_v42  ;;  %v1105_v42 = vld [vmem:[%s3046_s27 + $0x128] sm:$0xff] }
 0x67e   : > { %1815 = vmatpush.msrb.mxu2 %v1002_v4 }
 0x67f   : > { %1870 = vmatpush.msra.mxu3 %v1018_v49  ;;  %v1068_v49 = vld [vmem:[%s3046_s27] sm:$0xff] }
 0x680   : > { %1900 = vmatpush.msra.mxu2 %v1001_v6 }
 0x681   : > { %1871 = vmatpush.msra.mxu3 %v1015_v53  ;;  %v1102_v53 = vld [vmem:[%s3046_s27 + $0x110] sm:$0xff] }
 0x682   : > { %1901 = vmatpush.msra.mxu2 %v998_v9 }
 0x683   : > { %1872 = vmatpush.msra.mxu3 %v1012_v58  ;;  %v1100_v58 = vld [vmem:[%s3046_s27 + $0x100] sm:$0xff] }
 0x684   : > { %1902 = vmatpush.msra.mxu2 %v995_v13  ;;  %v1064_v13 = vld [vmem:[%s3010_s29 + $0x370] sm:$0xff] }
 0x685   : > { %1873 = vmatpush.msra.mxu3 %v1009_v62 }
 0x686   : > { %1903 = vmatpush.msra.mxu2 %v992_v36 }
 0x687   : > { %1874 = vmatpush.msra.mxu3 %v1006_v0  ;;  %v3466_v0 = vld [vmem:[%s3071_s6] sm:$0xff] }
 0x688   : > { %1904 = vmatpush.msra.mxu2 %v989_v15 }
 0x689   : > { %1875 = vmatpush.msra.mxu3 %v1003_v1  ;;  %v1773_v1 = vperm.slane %v3466_v0, 4 }
 0x68a   : > { %1905 = vmatpush.msra.mxu2 %v986_v37  ;;  %v1055_v37 = vld [vmem:[%s3010_s29 + $0x328] sm:$0xff] }
 0x68c   : > { %1906 = vmatpush.msra.mxu2 %v983_v60  ;;  %v1052_v60 = vld [vmem:[%s3010_s29 + $0x310] sm:$0xff] }
 0x68e   : > { %1907 = vmatpush.msra.mxu2 %v980_v21  ;;  %v1098_v21 = vld [vmem:[%s3046_s27 + $0xf0] sm:$0xff] }
 0x690   : > { %1908 = vmatpush.msra.mxu2 %v977_v24  ;;  %v1076_v24 = vld [vmem:[%s3046_s27 + $0x40] sm:$0xff] }
 0x692   : > { %1909 = vmatpush.msra.mxu2 %v974_v55  ;;  %v1074_v55 = vld [vmem:[%s3046_s27 + $0x30] sm:$0xff] }
 0x694   : > { %1910 = vmatpush.msra.mxu2 %v971_v34  ;;  %v1072_v34 = vld [vmem:[%s3046_s27 + $0x20] sm:$0xff] }
 0x696   : > { %1911 = vmatpush.msra.mxu2 %v968_v40  ;;  %v1070_v40 = vld [vmem:[%s3046_s27 + $0x10] sm:$0xff] }
 0x698   : > { %1912 = vmatpush.msra.mxu2 %v965_v48  ;;  %v1090_v48 = vld [vmem:[%s3046_s27 + $0xb0] sm:$0xff] }
 0x699   : > { %2157 = vxpose.xlu0.b32.start [1/2] (short) (narrow) %v3163_v43, 8  ;;  %v966_v43 = vld [vmem:[%s3010_s29 + $0x60] sm:$0xff] }
 0x69a   : > { %1791 = vmatpush.msrb.mxu0 %v966_v43  ;;  %1913 = vmatpush.msra.mxu2 %v962_v46  ;;  %v1754_v43 = vpop.permute.xlu1 %1753  ;;  %v1103_v46 = vld [vmem:[%s3046_s27 + $0x118] sm:$0xff] }
 0x69c   : > { %1792 = vmatpush.msrb.mxu0 %v963_v8  ;;  %1914 = vmatpush.msra.mxu2 %v959_v56  ;;  %v1101_v56 = vld [vmem:[%s3046_s27 + $0x108] sm:$0xff] }
 0x69e   : > { %1793 = vmatpush.msrb.mxu0 %v960_v12  ;;  %1915 = vmatpush.msra.mxu2 %v956_v59  ;;  %v1085_v59 = vld [vmem:[%s3046_s27 + $0x88] sm:$0xff] }
 0x6a0   : > { %1794 = vmatpush.msrb.mxu0 %v957_v20  ;;  %v1080_v20 = vld [vmem:[%s3046_s27 + $0x60] sm:$0xff] }
 0x6a1   : > { %2158 = vxpose.xlu0.b32.end [2/2] (short) (narrow) %v3165_v44, 8  ;;  %v1040_v44 = vld [vmem:[%s3010_s29 + $0x2b0] sm:$0xff] }
 0x6a2   : > { %1923 = vmatpush.msra.mxu1 %v1040_v44  ;;  %1795 = vmatpush.msrb.mxu0 %v954_v23  ;;  %v1083_v44 = vld [vmem:[%s3046_s27 + $0x78] sm:$0xff]  ;;  %v1077_v23 = vld [vmem:[%s3046_s27 + $0x48] sm:$0xff] }
 0x6a4   : > { %1924 = vmatpush.msra.mxu1 %v1037_v16  ;;  %1890 = vmatpush.msra.mxu0 %v1066_v29  ;;  %v1058_v16 = vld [vmem:[%s3010_s29 + $0x340] sm:$0xff] }
 0x6a5   : > { %v1096_v29 = vld [vmem:[%s3046_s27 + $0xe0] sm:$0xff] }
 0x6a6   : > { %1925 = vmatpush.msra.mxu1 %v1034_v17  ;;  %1891 = vmatpush.msra.mxu0 %v1063_v33  ;;  %v1082_v17 = vld [vmem:[%s3046_s27 + $0x70] sm:$0xff] }
 0x6a7   : > { %v1094_v33 = vld [vmem:[%s3046_s27 + $0xd0] sm:$0xff] }
 0x6a8   : > { %1926 = vmatpush.msra.mxu1 %v1031_v18  ;;  %1892 = vmatpush.msra.mxu0 %v1060_v39  ;;  %v1081_v18 = vld [vmem:[%s3046_s27 + $0x68] sm:$0xff]  ;;  %v1092_v39 = vld [vmem:[%s3046_s27 + $0xc0] sm:$0xff] }
 0x6aa   : > { %1927 = vmatpush.msra.mxu1 %v1028_v3  ;;  %1893 = vmatpush.msra.mxu0 %v1057_v47  ;;  %v1079_v3 = vld [vmem:[%s3046_s27 + $0x58] sm:$0xff]  ;;  %v1069_v47 = vld [vmem:[%s3046_s27 + $0x8] sm:$0xff] }
 0x6ac   : > { %1928 = vmatpush.msra.mxu1 %v1025_v25  ;;  %1894 = vmatpush.msra.mxu0 %v1054_v51  ;;  %v1097_v25 = vld [vmem:[%s3046_s27 + $0xe8] sm:$0xff] }
 0x6ad   : > { %v1089_v51 = vld [vmem:[%s3046_s27 + $0xa8] sm:$0xff] }
 0x6ae   : > { %1929 = vmatpush.msra.mxu1 %v1022_v30  ;;  %1895 = vmatpush.msra.mxu0 %v1051_v54  ;;  %v1095_v30 = vld [vmem:[%s3046_s27 + $0xd8] sm:$0xff] }
 0x6af   : > { %v1087_v54 = vld [vmem:[%s3046_s27 + $0x98] sm:$0xff] }
 0x6b0   : > { %1930 = vmatpush.msra.mxu1 %v1019_v35  ;;  %v1093_v35 = vld [vmem:[%s3046_s27 + $0xc8] sm:$0xff] }
 0x6b2   : > { %1931 = vmatpush.msra.mxu1 %v1016_v41  ;;  %v1091_v41 = vld [vmem:[%s3046_s27 + $0xb8] sm:$0xff] }
 0x6b4   : > { %1932 = vmatpush.msra.mxu1 %v1013_v45  ;;  %v1104_v45 = vld [vmem:[%s3046_s27 + $0x120] sm:$0xff] }
 0x6b6   : > { %1933 = vmatpush.msra.mxu1 %v1010_v52  ;;  %v1088_v52 = vld [vmem:[%s3046_s27 + $0xa0] sm:$0xff] }
 0x6b8   : > { %1934 = vmatpush.msra.mxu1 %v1007_v57  ;;  %v1086_v57 = vld [vmem:[%s3046_s27 + $0x90] sm:$0xff] }
 0x6ba   : > { %1935 = vmatpush.msra.mxu1 %v1004_v61  ;;  %v1084_v61 = vld [vmem:[%s3046_s27 + $0x80] sm:$0xff]  ;;  %s2828_s27 = smov 16  }
 0x6db   : > { %v1762_v6 = vpop.permute.xlu1 %1761 }
 0x6e1   : > { %v2723_v2 = vpop.permute.xlu0 %2722 }
 0x6e2   : > { %v2725_v4 = vunpack.i.h.bf16 %v2723_v2  ;;  %v2724_v5 = vunpack.i.l.bf16 %v2723_v2 }
 0x6e4   : > { %v1767_v8 = vsel %vm1202_vm2, %v3410_v7, %v2725_v4  ;;  %v1770_v9 = vsel %vm1202_vm2, %v1754_v43, %v2724_v5 }
 0x6e5   : > { %v1769_v11 = vsel %vm1768_vm3, %v1767_v8, %v1754_v43  ;;  %v1771_v12 = vsel %vm1768_vm3, %v1770_v9, %v1762_v6  ;;  %v1171_v9 = vld [vmem:[%s3071_s6 + $0x8] sm:$0xff] }
 0x6e6   : > { %1796 = vmatmul.f32.vlgmr.msrb.gmra.mxu0 %v1769_v11  ;;  %1816 = vmatmul.f32.vlgmr.msrb.gmra.mxu2 %v1771_v12 }
 0x6e7   : > { %1856 = vmatmul.f32.vlgmr.msrb.gmra.mxu1 %v1769_v11  ;;  %1950 = vmatpush.msrb.mxu0 %v1067_v31 }
 0x6e8   : > { %2023 = vmatpush.msrb.mxu2 %v1105_v42  ;;  %v1113_v42 = vld [vmem:[%s3036_s21 + $0x38] sm:$0xff] }
 0x6e9   : > { %v1765_v36 = vpop.permute.xlu0 %1764  ;;  %1951 = vmatpush.msrb.mxu0 %v1064_v13  ;;  %v1774_v13 = vperm.slane %v1171_v9, 4 }
 0x6ea   : > { %v1772_v15 = vsel %vm1202_vm2, %v1762_v6, %v1765_v36  ;;  %2024 = vmatpush.msrb.mxu2 %v1104_v45  ;;  %v1172_v6 = vld [vmem:[%s3071_s6 + $0x10] sm:$0xff] }
 0x6eb   : > { %2640 = vmatmul.msk.f32.vlgmr.msrb.gmra.mxu3 %vm1776_vm4, %v1772_v15  ;;  %1952 = vmatpush.msrb.mxu0 %v1061_v14 }
 0x6ec   : > { %1973 = vmatpush.msrb.mxu3 %v1083_v44  ;;  %2025 = vmatpush.msrb.mxu2 %v1103_v46 }
 0x6ed   : > { %1953 = vmatpush.msrb.mxu0 %v1058_v16 }
 0x6ee   : > { %2641 = vmatmul.msk.f32.vlgmr.msra.gmra.mxu0 %vm1776_vm4, %v1772_v15  ;;  %1916 = vmatmul.f32.vlgmr.msra.gmra.mxu2 %v1769_v11  ;;  %v1775_v11 = vperm.slane %v1172_v6, 4 }
 0x6ef   : > { %1936 = vmatmul.f32.vlgmr.msra.gmra.mxu1 %v1771_v12  ;;  %1954 = vmatpush.msrb.mxu0 %v1055_v37 }
 0x6f0   : > { %1974 = vmatpush.msrb.mxu3 %v1082_v17  ;;  %2026 = vmatpush.msrb.mxu2 %v1102_v53 }
 0x6f1   : > { %1955 = vmatpush.msrb.mxu0 %v1052_v60 }
 0x6f2   : > { %1975 = vmatpush.msrb.mxu3 %v1081_v18  ;;  %2027 = vmatpush.msrb.mxu2 %v1101_v56 }
 0x6f3   : > { %1993 = vmatpush.msra.mxu0 %v1099_v19  ;;  %1876 = vmatmul.f32.vlgmr.msra.gmra.mxu3 %v1771_v12 }
 0x6f4   : > { %1976 = vmatpush.msrb.mxu3 %v1080_v20  ;;  %2028 = vmatpush.msrb.mxu2 %v1100_v58 }
 0x6f5   : > { %1994 = vmatpush.msra.mxu0 %v1098_v21 }
 0x6f6   : > { %2642 = vmatmul.msk.f32.vlgmr.msrb.gmra.mxu0 %vm1776_vm4, %v1772_v15  ;;  %1977 = vmatpush.msrb.mxu3 %v1079_v3 }
 0x6f7   : > { %1995 = vmatpush.msra.mxu0 %v1097_v25  ;;  %v1969_v25 = vperm.slane %v3466_v0, 5 }
 0x6f8   : > { %1978 = vmatpush.msrb.mxu3 %v1078_v22 }
 0x6f9   : > { %1996 = vmatpush.msra.mxu0 %v1096_v29 }
 0x6fa   : > { %1979 = vmatpush.msrb.mxu3 %v1077_v23 }
 0x6fb   : > { %1997 = vmatpush.msra.mxu0 %v1095_v30 }
 0x6fc   : > { %1980 = vmatpush.msrb.mxu3 %v1076_v24 }
 0x6fd   : > { %1998 = vmatpush.msra.mxu0 %v1094_v33 }
 0x6fe   : > { %1981 = vmatpush.msrb.mxu3 %v1075_v27 }
 0x6ff   : > { %1999 = vmatpush.msra.mxu0 %v1093_v35 }
 0x700   : > { %1982 = vmatpush.msrb.mxu3 %v1074_v55 }
 0x701   : > { %2000 = vmatpush.msra.mxu0 %v1092_v39  ;;  %v1108_v39 = vld [vmem:[%s3036_s21 + $0x10] sm:$0xff] }
 0x702   : > { %1983 = vmatpush.msrb.mxu3 %v1073_v32 }
 0x703   : > { %2001 = vmatpush.msra.mxu0 %v1091_v41  ;;  %v1106_v41 = vld [vmem:[%s3036_s21] sm:$0xff] }
 0x704   : > { %1984 = vmatpush.msrb.mxu3 %v1072_v34 }
 0x705   : > { %2002 = vmatpush.msra.mxu0 %v1090_v48  ;;  %v1111_v48 = vld [vmem:[%s3036_s21 + $0x28] sm:$0xff] }
 0x706   : > { %1985 = vmatpush.msrb.mxu3 %v1071_v38  ;;  %v1109_v38 = vld [vmem:[%s3036_s21 + $0x18] sm:$0xff] }
 0x707   : > { %2003 = vmatpush.msra.mxu0 %v1089_v51  ;;  %2069 = vmatpush.msrb.mxu1 %v1109_v38  ;;  %v1110_v51 = vld [vmem:[%s3036_s21 + $0x20] sm:$0xff] }
 0x708   : > { %1986 = vmatpush.msrb.mxu3 %v1070_v40  ;;  %v1107_v40 = vld [vmem:[%s3036_s21 + $0x8] sm:$0xff] }
 0x709   : > { %2004 = vmatpush.msra.mxu0 %v1088_v52  ;;  %2070 = vmatpush.msrb.mxu1 %v1108_v39 }
 0x70a   : > { %1987 = vmatpush.msrb.mxu3 %v1069_v47  ;;  %v1112_v47 = vld [vmem:[%s3036_s21 + $0x30] sm:$0xff] }
 0x70b   : > { %2005 = vmatpush.msra.mxu0 %v1087_v54  ;;  %2071 = vmatpush.msrb.mxu1 %v1107_v40  ;;  %v2827_v54 = vmov 8.0  }
 0x70c   : > { %1988 = vmatpush.msrb.mxu3 %v1068_v49 }
 0x70d   : > { %2006 = vmatpush.msra.mxu0 %v1086_v57  ;;  %2072 = vmatpush.msrb.mxu1 %v1106_v41 }
 0x70f   : > { %2007 = vmatpush.msra.mxu0 %v1085_v59  ;;  %2090 = vmatpush.msra.mxu1 %v1113_v42 }
 0x711   : > { %2008 = vmatpush.msra.mxu0 %v1084_v61  ;;  %2091 = vmatpush.msra.mxu1 %v1112_v47  ;;  %v2050_v61 = vperm.slane %v3466_v0, 6  ;;  %v1135_v47 = vld [vmem:[%s3051_s7 + $0x68] sm:$0xff] }
 0x713   : > { %2092 = vmatpush.msra.mxu1 %v1111_v48  ;;  %v1134_v48 = vld [vmem:[%s3051_s7 + $0x60] sm:$0xff] }
 0x715   : > { %2093 = vmatpush.msra.mxu1 %v1110_v51  ;;  %v1131_v51 = vld [vmem:[%s3051_s7 + $0x48] sm:$0xff] }
 0x73d   : > { %v2173_v42 = vpop.trf.xlu0 }
 0x763   : > { %v1797_v62 = vpop.f32.mrf.mxu0 }
 0x764   : > { %v1857_v43 = vpop.f32.mrf.mxu1  ;;  %v1798_v4 = vadd.f32 %v1797_v62, %v1773_v1 }
 0x765   : > { %v1858_v17 = vadd.f32 %v1857_v43, %v1774_v13 }
 0x769   : > { %v1817_v2 = vpop.f32.mrf.mxu2 }
 0x76a   : > { %v1818_v8 = vadd.f32 %v1817_v2, %v1798_v4 }
 0x76b   : > { %v1897_v5 = vpop.f32.mrf.mxu0 }
 0x76c   : > { %v1937_v15 = vpop.f32.mrf.mxu1 }
 0x76e   : > { %v1837_v31 = vpop.f32.mrf.mxu3 }
 0x76f   : > { %v1838_v12 = vadd.f32 %v1837_v31, %v1818_v8 }
 0x771   : > { %vm1960_vm5 = vcmp.ge.f32.partialorder %v1838_v12, 0.0  ;;  %v1963_v14 = vmul.f32 0.2, %v1838_v12  ;;  %v1917_v36 = vpop.f32.mrf.mxu2 }
 0x772   : > { %v1918_v44 = vadd.f32 %v1917_v36, %v1775_v11 }
 0x773   : > { %v1966_v16 = vsel %vm1960_vm5, %v1838_v12, %v1963_v14  ;;  %v1957_v60 = vpop.f32.mrf.mxu0 }
 0x774   : > { %v1938_v37 = vadd.f32 %v1937_v15, %v1918_v44  ;;  %1989 = vmatmul.f32.vlgmr.msrb.gmra.mxu3 %v1966_v16  ;;  %v1121_v15 = vld [vmem:[%s3041_s2 + $0x38] sm:$0xff]  ;;  %v1120_v16 = vld [vmem:[%s3041_s2 + $0x30] sm:$0xff] }
 0x775   : > { %2142 = vmatpush.msra.mxu3 %v1121_v15  ;;  %v1138_v15 = vld [vmem:[%s3056_s12 + $0x10] sm:$0xff] }
 0x776   : > { %v1958_v18 = vadd.f32 %v1957_v60, %v1938_v37  ;;  %v1877_v19 = vpop.f32.mrf.mxu3  ;;  %v1119_v37 = vld [vmem:[%s3041_s2 + $0x28] sm:$0xff] }
 0x777   : > { %v1878_v20 = vadd.f32 %v1877_v19, %v1858_v17  ;;  %2143 = vmatpush.msra.mxu3 %v1120_v16  ;;  %v1116_v19 = vld [vmem:[%s3041_s2 + $0x10] sm:$0xff]  ;;  %v1137_v16 = vld [vmem:[%s3056_s12 + $0x8] sm:$0xff] }
 0x778   : > { %vm1962_vm6 = vcmp.ge.f32.partialorder %v1958_v18, 0.0  ;;  %v1965_v21 = vmul.f32 0.2, %v1958_v18 }
 0x779   : > { %v1898_v3 = vadd.f32 %v1897_v5, %v1878_v20  ;;  %2144 = vmatpush.msra.mxu3 %v1119_v37  ;;  %v1115_v20 = vld [vmem:[%s3041_s2 + $0x8] sm:$0xff]  ;;  %v1136_v37 = vld [vmem:[%s3056_s12] sm:$0xff] }
 0x77a   : > { %v1968_v22 = vsel %vm1962_vm6, %v1958_v18, %v1965_v21  ;;  %v1114_v21 = vld [vmem:[%s3041_s2] sm:$0xff] }
 0x77b   : > { %v1964_v23 = vmul.f32 0.2, %v1898_v3  ;;  %2643 = vmatmul.msk.f32.vlgmr.msrb.gmra.mxu2 %vm1776_vm4, %v1968_v22  ;;  %vm1961_vm9 = vcmp.ge.f32.partialorder %v1898_v3, 0.0  ;;  %v2118_v22 = vperm.slane %v3466_v0, 7 }
 0x77d   : > { %v1967_v24 = vsel %vm1961_vm9, %v1898_v3, %v1964_v23 }
 0x77e   : > { %2009 = vmatmul.f32.vlgmr.msra.gmra.mxu0 %v1967_v24 }
 0x7f7   : > { %v1990_v27 = vpop.f32.mrf.mxu3 }
 0x7f8   : > { %v1991_v29 = vadd.f32 %v1990_v27, %v1969_v25 }
 0x7fb   : > { %v2010_v55 = vpop.f32.mrf.mxu0 }
 0x7fc   : > { %v2011_v30 = vadd.f32 %v2010_v55, %v1991_v29 }
 0x7fe   : > { %v2030_v32 = vpop.f32.mrf.mxu2 }
 0x7ff   : > { %v2031_v33 = vadd.f32 %v2030_v32, %v2011_v30 }
 0x801   : > { %v2033_v34 = vmul.f32 %v2031_v33, %v2031_v33 }
 0x803   : > { %v2034_v35 = vsel %vm1202_vm2, %v2033_v34, 0.0 }
 0x804   : > { %2035 = vadd.xlane.f32.xlu1 %v2034_v35  ;;  %v3515_v35 = vld [vmem:[%s3071_s6 + $0x18] sm:$0xff] }
 0x805   : > { %v2127_v38 = vperm.slane %v3515_v35, 0 }
 0x81d   : > { %2216 = vrot.lane.b32.xlu1 %v3293_v10, %s2825_s26 }
 0x877   : > { %v2036_v45 = vpop.xlane.xlu1 %2035 }
 0x878   : > { %v2037_v49 = vmul.f32 %v2036_v45, %v3241_v26  ;;  %v1133_v45 = vld [vmem:[%s3051_s7 + $0x58] sm:$0xff] }
 0x87a   : > { %v2038_v10 = vadd.f32 1.1920929e-07, %v2037_v49  ;;  %v1132_v49 = vld [vmem:[%s3051_s7 + $0x50] sm:$0xff] }
 0x87c   : > { %2741 = vrsqrt.f32 %v2038_v10  ;;  %vm2045_vm12 = vweird.f32 %v2038_v10 }
 0x87d   : > { %2743 = vrcp.f32 %v2827_v54  ;;  %v1126_v54 = vld [vmem:[%s3051_s7 + $0x20] sm:$0xff] }
 0x882   : > { %v2742_v46 = vpop.eup %2741 }
 0x883   : > { %v2040_v52 = vmul.f32 %v2742_v46, %v2038_v10  ;;  %vm2046_vm10 = vweird.f32 %v2742_v46  ;;  %v2744_v58 = vpop.eup %2743  ;;  %v1130_v10 = vld [vmem:[%s3051_s7 + $0x40] sm:$0xff] }
 0x884   : > { %vm2047_vm14 = vmor %vm2045_vm12, %vm2046_vm10  ;;  %v2302_v43 = vmul.f32 8.0, %v2744_v58  ;;  %vm2306_vm15 = vweird.f32 %v2744_v58 }
 0x885   : > { %v2041_v53 = vmul.f32 %v2742_v46, %v2040_v52  ;;  %v1128_v52 = vld [vmem:[%s3051_s7 + $0x30] sm:$0xff] }
 0x886   : > { %v2303_v5 = vsub.f32 1.0, %v2302_v43  ;;  %v1147_v43 = vld [vmem:[%s3056_s12 + $0x58] sm:$0xff] }
 0x887   : > { %v2042_v56 = vmul.f32 0.5, %v2041_v53  ;;  %v1127_v53 = vld [vmem:[%s3051_s7 + $0x28] sm:$0xff] }
 0x888   : > { %v2304_v9 = vmul.f32 %v2744_v58, %v2303_v5  ;;  %v1144_v5 = vld [vmem:[%s3056_s12 + $0x40] sm:$0xff] }
 0x889   : > { %v2043_v57 = vsub.f32 1.5, %v2042_v56  ;;  %v1125_v56 = vld [vmem:[%s3051_s7 + $0x18] sm:$0xff] }
 0x88a   : > { %v2305_v12 = vadd.f32 %v2744_v58, %v2304_v9  ;;  %v1141_v9 = vld [vmem:[%s3056_s12 + $0x28] sm:$0xff] }
 0x88b   : > { %v2044_v59 = vmul.f32 %v2742_v46, %v2043_v57  ;;  %v1124_v57 = vld [vmem:[%s3051_s7 + $0x10] sm:$0xff] }
 0x88c   : > { %v3495_v14 = vsel %vm2306_vm15, %v2744_v58, %v2305_v12  ;;  %v1123_v58 = vld [vmem:[%s3051_s7 + $0x8] sm:$0xff] }
 0x88d   : > { %v2048_v62 = vsel %vm2047_vm14, %v2742_v46, %v2044_v59  ;;  %v1129_v46 = vld [vmem:[%s3051_s7 + $0x38] sm:$0xff] }
 0x88e   : > { %v2049_v1 = vmul.f32 %v2048_v62, %v2031_v33  ;;  %v1149_v62 = vld [vmem:[%s3056_s12 + $0x68] sm:$0xff] }
 0x890   : > { %v2051_v2 = vmul.f32 %v2050_v61, %v2049_v1  ;;  %v1122_v61 = vld [vmem:[%s3051_s7] sm:$0xff] }
 0x891   : > { %v1148_v1 = vld [vmem:[%s3056_s12 + $0x60] sm:$0xff] }
 0x892   : > { %v2052_v4 = vadd.f32 %v3410_v7, %v2051_v2  ;;  %v1146_v2 = vld [vmem:[%s3056_s12 + $0x50] sm:$0xff] }
 0x894   : > { %2053 = vst.msk [vmem:[%s3694_s30] sm:$0xff] %vm1202_vm2, %v2052_v4  ;;  %2644 = vmatmul.msk.f32.vlgmr.msrb.gmra.mxu1 %vm1202_vm2, %v2052_v4  ;;  %v2294_v6 = vsel %vm1202_vm2, %v2052_v4, 0.0  ;;  %v1145_v4 = vld [vmem:[%s3056_s12 + $0x48] sm:$0xff]  ;;  %s2829_s30 = smov 48  }
 0x895   : > { %v2295_v8 = vrot.slane %v2294_v6, 4  ;;  %2228 = vmatpush.msrb.mxu1 %v1135_v47 }
 0x897   : > { %v2296_v31 = vadd.f32 %v2295_v8, %v2294_v6  ;;  %2229 = vmatpush.msrb.mxu1 %v1134_v48  ;;  %v1143_v6 = vld [vmem:[%s3056_s12 + $0x38] sm:$0xff]  ;;  %v1142_v8 = vld [vmem:[%s3056_s12 + $0x30] sm:$0xff] }
 0x898   : > { %v1152_v48 = vld [vmem:[%s3061_s5 + $0x10] sm:$0xff] }
 0x899   : > { %v2297_v11 = vrot.slane %v2296_v31, 2  ;;  %2230 = vmatpush.msrb.mxu1 %v1133_v45 }
 0x89b   : > { %v2298_v7 = vadd.f32 %v2297_v11, %v2296_v31  ;;  %2231 = vmatpush.msrb.mxu1 %v1132_v49  ;;  %v1140_v31 = vld [vmem:[%s3056_s12 + $0x20] sm:$0xff]  ;;  %v1139_v11 = vld [vmem:[%s3056_s12 + $0x18] sm:$0xff]  ;;  %v1151_v49 = vld [vmem:[%s3061_s5 + $0x8] sm:$0xff] }
 0x89c   : > { %2645 = vmatmul.msk.f32.vlgmr.msra.gmra.mxu1 %vm1202_vm2, %v3251_v63  ;;  %v1118_v63 = vld [vmem:[%s3041_s2 + $0x20] sm:$0xff] }
 0x89d   : > { %v2299_v13 = vrot.slane %v2298_v7, 1  ;;  %2145 = vmatpush.msra.mxu3 %v1118_v63  ;;  %2232 = vmatpush.msrb.mxu1 %v1131_v51  ;;  %v2221_v63 = vperm.slane %v3515_v35, 1 }
 0x89f   : > { %v2300_v36 = vadd.f32 %v2299_v13, %v2298_v7  ;;  %2233 = vmatpush.msrb.mxu1 %v1130_v10  ;;  %v2217_v7 = vpop.permute.xlu1 %2216  ;;  %v2753_v13 = vld [vmem:[%s3695_s23] sm:$0xff] }
 0x8a1   : > { %v2308_v44 = vmul.f32 %v3495_v14, %v2300_v36  ;;  %2234 = vmatpush.msrb.mxu1 %v1129_v46 }
 0x8a3   : > { %2318 = vrot.lane.b32.xlu1 %v2308_v44, %s2828_s27  ;;  %2235 = vmatpush.msrb.mxu1 %v1128_v52 }
 0x8a4   : > { %2646 = vmatmul.msk.f32.gmra.mxu1 %vm1202_vm2, %v3262_v28  ;;  %v1117_v28 = vld [vmem:[%s3041_s2 + $0x18] sm:$0xff] }
 0x8a5   : > { %2146 = vmatpush.msra.mxu3 %v1117_v28  ;;  %2236 = vmatpush.msrb.mxu1 %v1127_v53 }
 0x8a7   : > { %2147 = vmatpush.msra.mxu3 %v1116_v19  ;;  %2237 = vmatpush.msrb.mxu1 %v1126_v54  ;;  %v2249_v19 = vperm.slane %v3515_v35, 2 }
 0x8a9   : > { %2148 = vmatpush.msra.mxu3 %v1115_v20  ;;  %2238 = vmatpush.msrb.mxu1 %v1125_v56 }
 0x8ab   : > { %2149 = vmatpush.msra.mxu3 %v1114_v21  ;;  %2239 = vmatpush.msrb.mxu1 %v1124_v57 }
 0x8ad   : > { %2240 = vmatpush.msrb.mxu1 %v1123_v58 }
 0x8af   : > { %2241 = vmatpush.msrb.mxu1 %v1122_v61  ;;  %v1169_v61 = vld [vmem:[%s3066_s1 + $0x48] sm:$0xff] }
 0x8b0   : > { %2368 = vmatpush.msrb.mxu3 %v1169_v61 }
 0x911   : > { %v2074_v17 = vpop.f32.mrf.mxu1 }
 0x912   : > { %v2077_v60 = vpack.c.bf16 %v2074_v17, %v2074_v17 }
 0x914   : > { %v2102_v18 = vsel %vm1255_vm7, %v2077_v60, 0 }
 0x915   : > { %2111 = vmatpush.bf16.msra.mxu2 %v2102_v18 }
 0x918   : > { %2647 = vmatmul.msk.bf16.vlgmr.msra.gmra.mxu2 %vm1251_vm8, %v3181_v50 }
 0x919   : > { %v2095_v3 = vpop.f32.mrf.mxu1  ;;  %2255 = vmatpush.msrb.mxu2 %v1149_v62  ;;  %v1168_v62 = vld [vmem:[%s3066_s1 + $0x40] sm:$0xff] }
 0x91a   : > { %2369 = vmatpush.msrb.mxu3 %v1168_v62 }
 0x91b   : > { %2256 = vmatpush.msrb.mxu2 %v1148_v1  ;;  %v1167_v1 = vld [vmem:[%s3066_s1 + $0x38] sm:$0xff] }
 0x91c   : > { %2370 = vmatpush.msrb.mxu3 %v1167_v1 }
 0x91d   : > { %2257 = vmatpush.msrb.mxu2 %v1147_v43  ;;  %v1166_v43 = vld [vmem:[%s3066_s1 + $0x30] sm:$0xff] }
 0x91e   : > { %2371 = vmatpush.msrb.mxu3 %v1166_v43 }
 0x91f   : > { %2258 = vmatpush.msrb.mxu2 %v1146_v2  ;;  %v1165_v2 = vld [vmem:[%s3066_s1 + $0x28] sm:$0xff] }
 0x920   : > { %2372 = vmatpush.msrb.mxu3 %v1165_v2 }
 0x921   : > { %v2098_v55 = vpop.f32.mrf.mxu1  ;;  %2259 = vmatpush.msrb.mxu2 %v1145_v4  ;;  %v1164_v4 = vld [vmem:[%s3066_s1 + $0x20] sm:$0xff] }
 0x922   : > { %2373 = vmatpush.msrb.mxu3 %v1164_v4 }
 0x923   : > { %2260 = vmatpush.msrb.mxu2 %v1144_v5  ;;  %v2319_v5 = vpop.permute.xlu1 %2318 }
 0x925   : > { %2261 = vmatpush.msrb.mxu2 %v1143_v6  ;;  %v924_v6 = vld [vmem:[%s3702_s19] sm:$0x1] }
 0x927   : > { %2262 = vmatpush.msrb.mxu2 %v1142_v8  ;;  %v2325_v8 = vsel %vm1591_vm13, %v924_v6, %v2319_v5 }
 0x929   : > { %2263 = vmatpush.msrb.mxu2 %v1141_v9 }
 0x92b   : > { %2264 = vmatpush.msrb.mxu2 %v1140_v31 }
 0x92d   : > { %2265 = vmatpush.msrb.mxu2 %v1139_v11  ;;  %v1162_v11 = vld [vmem:[%s3066_s1 + $0x10] sm:$0xff] }
 0x92f   : > { %2266 = vmatpush.msrb.mxu2 %v1138_v15 }
 0x931   : > { %2267 = vmatpush.msrb.mxu2 %v1137_v16 }
 0x933   : > { %2268 = vmatpush.msrb.mxu2 %v1136_v37  ;;  %v2357_v37 = vrot.slane %v3515_v35, 5 }
 0x99b   : > { %v2113_v23 = vpop.f32.mrf.mxu2 }
 0x99c   : > { %v2114_v24 = vadd.f32 %v2113_v23, %v2095_v3 }
 0x99e   : > { %v2119_v25 = vadd.f32 %v2118_v22, %v2114_v24 }
 0x9a0   : > { %vm2121_vm7 = vcmp.ge.f32.partialorder %v2119_v25, 0.0  ;;  %v2123_v27 = vmul.f32 0.2, %v2119_v25 }
 0x9a2   : > { %v2125_v29 = vsel %vm2121_vm7, %v2119_v25, %v2123_v27 }
 0x9a3   : > { %v2115_v50 = vpop.f32.mrf.mxu2  ;;  %2648 = vmatmul.msk.f32.vlgmr.msra.gmra.mxu3 %vm1529_vm11, %v2125_v29 }
 0x9a4   : > { %v2116_v30 = vadd.f32 %v2115_v50, %v2098_v55  ;;  %v1159_v55 = vld [vmem:[%s3061_s5 + $0x48] sm:$0xff]  ;;  %v1158_v50 = vld [vmem:[%s3061_s5 + $0x40] sm:$0xff] }
 0x9a6   : > { %v2120_v32 = vadd.f32 %v2118_v22, %v2116_v30 }
 0x9a8   : > { %vm2122_vm8 = vcmp.ge.f32.partialorder %v2120_v32, 0.0  ;;  %v2124_v33 = vmul.f32 0.2, %v2120_v32 }
 0x9aa   : > { %v2126_v34 = vsel %vm2122_vm8, %v2120_v32, %v2124_v33  ;;  %v1157_v32 = vld [vmem:[%s3061_s5 + $0x38] sm:$0xff] }
 0x9ab   : > { %2649 = vmatmul.msk.f32.gmra.mxu3 %vm1529_vm11, %v2126_v34  ;;  %vm2222_vm11 = vcmask 916480   ;;  %v1156_v34 = vld [vmem:[%s3061_s5 + $0x30] sm:$0xff] }
 0xa26   : > { %v2151_v0 = vpop.f32.mrf.mxu3 }
 0xa27   : > { %v2152_v41 = vadd.f32 %v2151_v0, %v2127_v38 }
 0xa2e   : > { %v2154_v39 = vpop.f32.mrf.mxu3 }
 0xa2f   : > { %v2155_v40 = vadd.f32 %v2154_v39, %v2127_v38  ;;  %v1154_v39 = vld [vmem:[%s3061_s5 + $0x20] sm:$0xff] }
 0xa31   : > { %2206 = vmatpush.msrb.mxu0 %v2155_v40  ;;  %v2290_v40 = vperm.slane %v3515_v35, 3 }
 0xa33   : > { %2207 = vmatpush.msrb.mxu0 %v2152_v41 }
 0xa34   : > { %2650 = vmatmul.msk.f32.vlgmr.msrb.gmra.mxu0 %vm1591_vm13, %v2173_v42  ;;  %v1153_v42 = vld [vmem:[%s3061_s5 + $0x18] sm:$0xff]  ;;  %vm2383_vm13 = vcmask 122880  }
 0xa35   : > { %2340 = vmatpush.msra.mxu0 %v1159_v55 }
 0xa37   : > { %2341 = vmatpush.msra.mxu0 %v1158_v50 }
 0xa39   : > { %2342 = vmatpush.msra.mxu0 %v1157_v32 }
 0xa3b   : > { %2343 = vmatpush.msra.mxu0 %v1156_v34  ;;  %v2407_v34 = vrot.slane %v3515_v35, 6 }
 0xab1   : > { %v2209_v59 = vpop.f32.mrf.mxu0 }
 0xab2   : > { %2213 = vrot.lane.b32.xlu2 %v2209_v59, %s2826_s15  ;;  %v1150_v59 = vld [vmem:[%s3061_s5] sm:$0xff] }
 0xb0c   : > { %v2214_v12 = vpop.permute.xlu2 %2213 }
 0xb0d   : > { %v2219_v36 = vsel %vm1202_vm2, %v2753_v13, %v2214_v12  ;;  %v1161_v12 = vld [vmem:[%s3066_s1 + $0x8] sm:$0xff] }
 0xb0e   : > { %v2220_v44 = vsel %vm1768_vm3, %v2219_v36, %v2217_v7  ;;  %v1160_v7 = vld [vmem:[%s3066_s1] sm:$0xff] }
 0xb0f   : > { %2651 = vmatmul.msk.f32.vlgmr.msrb.gmra.mxu1 %vm2222_vm11, %v2220_v44 }
 0xb8c   : > { %v2243_v17 = vpop.f32.mrf.mxu1 }
 0xb8d   : > { %v2244_v60 = vadd.f32 %v2243_v17, %v2221_v63 }
 0xb8f   : > { %vm2246_vm0 = vcmp.ge.f32.partialorder %v2244_v60, 0.0  ;;  %v2247_v18 = vmul.f32 0.2, %v2244_v60 }
 0xb91   : > { %v2248_v28 = vsel %vm2246_vm0, %v2244_v60, %v2247_v18 }
 0xb92   : > { %2652 = vmatmul.msk.f32.vlgmr.msrb.gmra.mxu2 %vm2222_vm11, %v2248_v28  ;;  %v2830_v28 = vmov 16.0  }
 0xc15   : > { %v2270_v20 = vpop.f32.mrf.mxu2 }
 0xc16   : > { %v2271_v21 = vadd.f32 %v2270_v20, %v2249_v19 }
 0xc18   : > { %v2273_v3 = vmul.f32 %v2271_v21, %v2271_v21 }
 0xc1a   : > { %v2274_v22 = vsel %vm1202_vm2, %v2273_v3, 0.0 }
 0xc1b   : > { %2275 = vadd.xlane.f32.xlu0 %v2274_v22 }
 0xc8e   : > { %v2276_v23 = vpop.xlane.xlu0 %2275 }
 0xc8f   : > { %v2277_v24 = vmul.f32 %v2276_v23, %v3241_v26  ;;  %v1155_v26 = vld [vmem:[%s3061_s5 + $0x28] sm:$0xff] }
 0xc90   : > { %2344 = vmatpush.msra.mxu0 %v1155_v26 }
 0xc91   : > { %v2278_v25 = vadd.f32 1.1920929e-07, %v2277_v24 }
 0xc92   : > { %2345 = vmatpush.msra.mxu0 %v1154_v39 }
 0xc93   : > { %2745 = vrsqrt.f32 %v2278_v25  ;;  %vm2285_vm3 = vweird.f32 %v2278_v25 }
 0xc94   : > { %2346 = vmatpush.msra.mxu0 %v1153_v42  ;;  %2747 = vrcp.f32 %v2830_v28 }
 0xc96   : > { %2347 = vmatpush.msra.mxu0 %v1152_v48 }
 0xc98   : > { %2348 = vmatpush.msra.mxu0 %v1151_v49 }
 0xc99   : > { %v2746_v27 = vpop.eup %2745 }
 0xc9a   : > { %v2280_v29 = vmul.f32 %v2746_v27, %v2278_v25  ;;  %vm2286_vm1 = vweird.f32 %v2746_v27  ;;  %2349 = vmatpush.msra.mxu0 %v1150_v59  ;;  %v2748_v19 = vpop.eup %2747 }
 0xc9b   : > { %vm2287_vm5 = vmor %vm2285_vm3, %vm2286_vm1  ;;  %v2388_v20 = vmul.f32 16.0, %v2748_v19 }
 0xc9c   : > { %v2281_v30 = vmul.f32 %v2746_v27, %v2280_v29 }
 0xc9e   : > { %v2282_v33 = vmul.f32 0.5, %v2281_v30 }
 0xca0   : > { %v2283_v0 = vsub.f32 1.5, %v2282_v33 }
 0xca2   : > { %v2284_v38 = vmul.f32 %v2746_v27, %v2283_v0 }
 0xca4   : > { %v2288_v41 = vsel %vm2287_vm5, %v2746_v27, %v2284_v38 }
 0xca5   : > { %v2289_v47 = vmul.f32 %v2288_v41, %v2271_v21  ;;  %v2389_v21 = vsub.f32 1.0, %v2388_v20 }
 0xca7   : > { %v2291_v45 = vmul.f32 %v2290_v40, %v2289_v47  ;;  %v2390_v3 = vmul.f32 %v2748_v19, %v2389_v21 }
 0xca9   : > { %v2292_v51 = vadd.f32 %v2753_v13, %v2291_v45  ;;  %v2328_v13 = vrot.slane %v3515_v35, 4  ;;  %v2391_v22 = vadd.f32 %v2748_v19, %v2390_v3 }
 0xcab   : > { %v2309_v10 = vsel %vm1202_vm2, %v2292_v51, 0.0  ;;  %2293 = vst.msk [vmem:[%s3695_s23] sm:$0xff] %vm1202_vm2, %v2292_v51  ;;  %vm2330_vm2 = vcmask 654336  }
 0xcac   : > { %v2310_v46 = vrot.slane %v2309_v10, 4 }
 0xcae   : > { %v2311_v52 = vadd.f32 %v2310_v46, %v2309_v10 }
 0xcb0   : > { %v2312_v53 = vrot.slane %v2311_v52, 2 }
 0xcb2   : > { %v2313_v54 = vadd.f32 %v2312_v53, %v2311_v52 }
 0xcb4   : > { %v2314_v56 = vrot.slane %v2313_v54, 1 }
 0xcb6   : > { %v2315_v57 = vadd.f32 %v2314_v56, %v2313_v54 }
 0xcb8   : > { %v2316_v58 = vmul.f32 %v2315_v57, %v3495_v14  ;;  %v1163_v14 = vld [vmem:[%s3066_s1 + $0x18] sm:$0xff] }
 0xcb9   : > { %2374 = vmatpush.msrb.mxu3 %v1163_v14 }
 0xcba   : > { %2322 = vrot.lane.b32.xlu1 %v2316_v58, %s2829_s30 }
 0xcbb   : > { %2375 = vmatpush.msrb.mxu3 %v1162_v11 }
 0xcbd   : > { %2376 = vmatpush.msrb.mxu3 %v1161_v12 }
 0xcbf   : > { %2377 = vmatpush.msrb.mxu3 %v1160_v7 }
 0xd2c   : > { %v2323_v9 = vpop.permute.xlu1 %2322 }
 0xd2d   : > { %v2326_v31 = vsel %vm1776_vm4, %v2325_v8, %v2323_v9  ;;  %vm2392_vm4 = vweird.f32 %v2748_v19 }
 0xd2e   : > { %2653 = vmatmul.msk.f32.vlgmr.msra.gmra.mxu0 %vm2330_vm2, %v2326_v31  ;;  %v2393_v23 = vsel %vm2392_vm4, %v2748_v19, %v2391_v22 }
 0xdab   : > { %v2351_v36 = vpop.f32.mrf.mxu0 }
 0xdac   : > { %v2352_v44 = vadd.f32 %v2351_v36, %v2328_v13 }
 0xdae   : > { %vm2354_vm6 = vcmp.ge.f32.partialorder %v2352_v44, 0.0  ;;  %v2355_v15 = vmul.f32 0.2, %v2352_v44 }
 0xdb0   : > { %v2356_v16 = vsel %vm2354_vm6, %v2352_v44, %v2355_v15 }
 0xdb1   : > { %2654 = vmatmul.msk.f32.vlgmr.msrb.gmra.mxu3 %vm2330_vm2, %v2356_v16 }
 0xe34   : > { %v2379_v63 = vpop.f32.mrf.mxu3 }
 0xe35   : > { %v2380_v17 = vadd.f32 %v2379_v63, %v2357_v37 }
 0xe37   : > { %v2382_v60 = vmul.f32 %v2380_v17, %v2380_v17 }
 0xe39   : > { %v2384_v18 = vsel %vm2383_vm13, %v2382_v60, 0.0 }
 0xe3a   : > { %2385 = vadd.xlane.f32.xlu1 %v2384_v18 }
 0xead   : > { %v2386_v24 = vpop.xlane.xlu1 %2385 }
 0xeae   : > { %v2394_v25 = vmul.f32 %v2393_v23, %v2386_v24 }
 0xeb0   : > { %v2395_v27 = vadd.f32 1.1920929e-07, %v2394_v25 }
 0xeb2   : > { %2749 = vrsqrt.f32 %v2395_v27  ;;  %vm2402_vm10 = vweird.f32 %v2395_v27 }
 0xeb8   : > { %v2750_v29 = vpop.eup %2749 }
 0xeb9   : > { %v2397_v55 = vmul.f32 %v2750_v29, %v2395_v27  ;;  %vm2403_vm9 = vweird.f32 %v2750_v29 }
 0xeba   : > { %vm2404_vm12 = vmor %vm2402_vm10, %vm2403_vm9 }
 0xebb   : > { %v2398_v50 = vmul.f32 %v2750_v29, %v2397_v55 }
 0xebd   : > { %v2399_v30 = vmul.f32 0.5, %v2398_v50 }
 0xebf   : > { %v2400_v32 = vsub.f32 1.5, %v2399_v30 }
 0xec1   : > { %v2401_v33 = vmul.f32 %v2750_v29, %v2400_v32 }
 0xec3   : > { %v2405_v0 = vsel %vm2404_vm12, %v2750_v29, %v2401_v33 }
 0xec4   : > { %v2406_v26 = vmul.f32 %v2405_v0, %v2380_v17 }
 0xec6   : > { %v2409_v38 = vmul.f32 %v2407_v34, %v2406_v26 }
 0xec8   : > { %v2410_v39 = vadd.f32 %v2409_v38, %v924_v6 }
 0xeca   : > { %2411 = vst.msk [vmem:[%s3702_s19] sm:$0x1] %vm2383_vm13, %v2410_v39 }
 0xecb PF: > { %s3703_s30 = sld [smem:[#allocation6_spill]]  ;;  %s3706_s3 = smov %s2810_s28 }
 0xecc   : > { %s3704_s25 = sld [smem:[#allocation5_spill]] }
 0xecd   : > { %s3705_s29 = sld [smem:[#allocation7_spill]] }
 0xed1   : > { %p33_p8 = scmp.ge.s32.totalorder %s3703_s30, 4  }
 0xed2   : > { %s3707_s28 = smov %s3704_s25 }
 0xed3   :  { %35 = sbr.rel (!%p33_p8) target bundleno = 25 (0x19), region = 193 }
 0xed8   :  { %2441 = vsyncpa [#allocation3], 1 }
 0xed9   :  { %2443 = vsyncpa [#allocation3 + $0x1], 1 }

</bundles_post_ra>
